<compile_context>
chip_gen: v7x
topology: tpu7x:2x2x1
jax: 0.10.0
libtpu: 0.0.40
codegen_flags: <defaults>
</compile_context>

<pallas_src>
import functools

import jax
import jax.numpy as jnp
from jax.experimental import pallas as pl
from jax.experimental.pallas import tpu as pltpu


# --------------------------------------------------------------------------------------
# Fused kernel: one batch element per grid step.
# --------------------------------------------------------------------------------------
def _baseline_encoder_kernel(
    y_ref, note_ref, eps_ref,
    w_emb_ref, b_emb_ref,
    wc_note_ref, wc_emb_ref, b_c_ref,
    wi_all_ref, b_lstm_ref, wh_f_ref, wh_b_ref,
    w_mu_ref, b_mu_ref, w_var_ref, b_var_ref,
    z_ref, mu_ref, var_ref,
    gates_ref,
    *, seq_len, hidden,
):
    T = seq_len
    H = hidden

    # ---- performance_embedding_layer + padded-row mask (mask from RAW y, in-kernel) ----
    y = y_ref[0]                                                        # (T, Dy)
    emb_mask = (jnp.max(jnp.abs(y), axis=-1, keepdims=True) > 0.0).astype(jnp.float32)
    emb = (jnp.dot(y, w_emb_ref[...], preferred_element_type=jnp.float32)
           + b_emb_ref[...]) * emb_mask                                 # (T, P)

    # ---- concat(note_cat, emb) -> performance_contractor, expressed as split matmuls ---
    note = note_ref[0]                                                  # (T, Dn)
    row_absmax = jnp.maximum(jnp.max(jnp.abs(note), axis=-1, keepdims=True),
                             jnp.max(jnp.abs(emb), axis=-1, keepdims=True))
    c_mask = (row_absmax > 0.0).astype(jnp.float32)                     # 0 iff concat row==0
    contracted = (jnp.dot(note, wc_note_ref[...], preferred_element_type=jnp.float32)
                  + jnp.dot(emb, wc_emb_ref[...], preferred_element_type=jnp.float32)
                  + b_c_ref[...]) * c_mask                              # (T, H)

    # ---- BiLSTM: input projections for both directions hoisted out of the recurrence ---
    # lane-dense (T, 8H=128) matmul; [:, :4H] = forward gates, [:, 4H:] = backward gates.
    gates_ref[...] = (jnp.dot(contracted, wi_all_ref[...],
                              preferred_element_type=jnp.float32) + b_lstm_ref[...])

    wh_f = wh_f_ref[...]
    wh_b = wh_b_ref[...]

    def lstm_cell(g, h, c):                                             # PyTorch gate order
        i = jax.nn.sigmoid(g[:, 0 * H:1 * H])
        f = jax.nn.sigmoid(g[:, 1 * H:2 * H])
        gg = jnp.tanh(g[:, 2 * H:3 * H])
        o = jax.nn.sigmoid(g[:, 3 * H:4 * H])
        c_new = f * c + i * gg
        h_new = o * jnp.tanh(c_new)
        return h_new, c_new

    def body(t, carry):
        h_f, c_f, h_b, c_b, acc_f, acc_b = carry
        tb = T - 1 - t
        g_row_f = gates_ref[pl.ds(t, 1), :]                             # (1, 8H)
        g_row_b = gates_ref[pl.ds(tb, 1), :]
        g_f = g_row_f[:, :4 * H] + jnp.dot(h_f, wh_f, preferred_element_type=jnp.float32)
        g_b = g_row_b[:, 4 * H:] + jnp.dot(h_b, wh_b, preferred_element_type=jnp.float32)
        h_f, c_f = lstm_cell(g_f, h_f, c_f)
        h_b, c_b = lstm_cell(g_b, h_b, c_b)
        return (h_f, c_f, h_b, c_b, acc_f + h_f, acc_b + h_b)

    zeros = jnp.zeros((1, H), jnp.float32)
    carry = (zeros, zeros, zeros, zeros, zeros, zeros)
    carry = jax.lax.fori_loop(0, T, body, carry, unroll=True)
    acc_f, acc_b = carry[4], carry[5]

    # ---- mean over time -> mu / var heads -> reparameterize ----------------------------
    # TODO(synk): run_hierarchy_lstm_with_pack uses pack_padded_sequence; with uniform
    #             full-length sequences packing is the identity, so mean divides by T.
    style = jnp.concatenate([acc_f, acc_b], axis=-1) * (1.0 / T)        # (1, 2H)
    mu = jnp.dot(style, w_mu_ref[...], preferred_element_type=jnp.float32) + b_mu_ref[...]
    var = jnp.dot(style, w_var_ref[...], preferred_element_type=jnp.float32) + b_var_ref[...]
    z = mu + eps_ref[0] * jnp.exp(0.5 * var)                            # var = log-variance

    z_ref[0] = z
    mu_ref[0] = mu
    var_ref[0] = var


# --------------------------------------------------------------------------------------
# Wrapper
# --------------------------------------------------------------------------------------
def baseline_encoder_forward(params, score_embedding, y, edges, note_locations, eps_key,
                             return_z=False, num_samples=10):
    # edges / note_locations are part of the PyTorch forward signature but unused.
    del edges, note_locations

    note = score_embedding["total_note_cat"].astype(jnp.float32)
    y = y.astype(jnp.float32)
    N, T, Dy = y.shape
    if note.shape[0] == 1 and N > 1:
        note = jnp.tile(note, (N, 1, 1))
    Dn = note.shape[-1]
    H = params["wh_f"].shape[0]
    Zs = params["w_mu"].shape[1]

    k_eps, k_multi = jax.random.split(eps_key)
    eps = jax.random.normal(k_eps, (N, 1, Zs), jnp.float32)

    kernel = functools.partial(_baseline_encoder_kernel, seq_len=T, hidden=H)
    full2 = lambda a: pl.BlockSpec(a.shape, lambda n: (0, 0))
    per_batch_vec = pl.BlockSpec((1, 1, Zs), lambda n: (n, 0, 0))
    out_sds = jax.ShapeDtypeStruct((N, 1, Zs), jnp.float32)

    z, mu, var = pl.pallas_call(
        kernel,
        out_shape=(out_sds, out_sds, out_sds),
        grid=(N,),
        in_specs=[
            pl.BlockSpec((1, T, Dy), lambda n: (n, 0, 0)),
            pl.BlockSpec((1, T, Dn), lambda n: (n, 0, 0)),
            per_batch_vec,
            full2(params["w_emb"]), full2(params["b_emb"]),
            full2(params["wc_note"]), full2(params["wc_emb"]), full2(params["b_c"]),
            full2(params["wi_all"]), full2(params["b_lstm"]),
            full2(params["wh_f"]), full2(params["wh_b"]),
            full2(params["w_mu"]), full2(params["b_mu"]),
            full2(params["w_var"]), full2(params["b_var"]),
        ],
        out_specs=(per_batch_vec, per_batch_vec, per_batch_vec),
        scratch_shapes=[pltpu.VMEM((T, 8 * H), jnp.float32)],
        compiler_params=pltpu.CompilerParams(dimension_semantics=("parallel",)),
    )(y, note, eps,
      params["w_emb"], params["b_emb"],
      params["wc_note"], params["wc_emb"], params["b_c"],
      params["wi_all"], params["b_lstm"], params["wh_f"], params["wh_b"],
      params["w_mu"], params["b_mu"], params["w_var"], params["b_var"])

    z, mu, var = z[:, 0, :], mu[:, 0, :], var[:, 0, :]

    if return_z:  # sample_multiple_z
        e = jax.random.normal(k_multi, (N, num_samples, Zs), jnp.float32)
        return mu[:, None, :] + e * jnp.exp(0.5 * var)[:, None, :]
    return z, mu, var


# --------------------------------------------------------------------------------------
# Parameters
# --------------------------------------------------------------------------------------
CFG = dict(
    output_size=8,     # net_params.output_size (raw performance feature dim)
    perf_emb_size=16,  # net_params.performance.size
    note_dim=16,       # channels of score_embedding['total_note_cat']
    enc_input=32,      # net_params.encoder.input = note_dim + perf_emb_size
    enc_size=16,       # net_params.encoder.size (LSTM hidden per direction)
    z_size=16,         # net_params.encoded_vector_size
)


def init_params(key, cfg):
    ks = jax.random.split(key, 16)
    nrm = lambda k, s, sc=0.1: sc * jax.random.normal(k, s, jnp.float32)
    Dy, P, Dn = cfg["output_size"], cfg["perf_emb_size"], cfg["note_dim"]
    H, Zs = cfg["enc_size"], cfg["z_size"]
    wi_f = nrm(ks[4], (H, 4 * H))
    wi_b = nrm(ks[5], (H, 4 * H))
    b_f = nrm(ks[6], (4 * H,), 0.01)
    b_b = nrm(ks[7], (4 * H,), 0.01)
    return {
        "w_emb": nrm(ks[0], (Dy, P)),
        "b_emb": nrm(ks[1], (1, P), 0.01),
        # performance_contractor weight split across the concat boundary (note | emb)
        "wc_note": nrm(ks[2], (Dn, H)),
        "wc_emb": nrm(ks[3], (P, H)),
        "b_c": nrm(ks[8], (1, H), 0.01),
        # bidirectional LSTM; both directions' input projections fused along lanes (8H=128)
        "wi_all": jnp.concatenate([wi_f, wi_b], axis=1),            # (H, 8H)
        "b_lstm": jnp.concatenate([b_f, b_b]).reshape(1, 8 * H),    # (1, 8H)
        "wh_f": nrm(ks[9], (H, 4 * H)),
        "wh_b": nrm(ks[10], (H, 4 * H)),
        "w_mu": nrm(ks[11], (2 * H, Zs)),
        "b_mu": jnp.zeros((1, Zs), jnp.float32),
        "w_var": nrm(ks[12], (2 * H, Zs)),
        "b_var": jnp.zeros((1, Zs), jnp.float32),
    }


if __name__ == "__main__":
    key = jax.random.PRNGKey(0)
    k_param, k_y, k_note, k_eps = jax.random.split(key, 4)

    N, T = 2, 16
    params = init_params(k_param, CFG)

    y = jax.random.normal(k_y, (N, T, CFG["output_size"]), jnp.float32)
    y = y.at[:, T - 3:, :].set(0.0)  # trailing padded (all-zero) performance rows
    total_note_cat = jax.random.normal(k_note, (N, T, CFG["note_dim"]), jnp.float32)

    score_embedding = {"total_note_cat": total_note_cat}
    edges = None           # unused by BaselineEncoder.forward
    note_locations = None  # unused by BaselineEncoder.forward

    z, mu, var = baseline_encoder_forward(params, score_embedding, y, edges,
                                          note_locations, k_eps)
    jax.block_until_ready((z, mu, var))
    assert z.shape == (N, CFG["z_size"])
    assert mu.shape == (N, CFG["z_size"])
    assert var.shape == (N, CFG["z_size"])
    print("KERNEL_OK")
</pallas_src>

<mosaic_0001>
module attributes {stable_mosaic.version = 11 : i64} {
  func.func @_baseline_encoder_kernel(%arg0: i32, %arg1: memref<1x16x8xf32, #tpu.memory_space<vmem>>, %arg2: memref<1x16x16xf32, #tpu.memory_space<vmem>>, %arg3: memref<1x1x16xf32, #tpu.memory_space<vmem>>, %arg4: memref<8x16xf32, #tpu.memory_space<vmem>>, %arg5: memref<1x16xf32, #tpu.memory_space<vmem>>, %arg6: memref<16x16xf32, #tpu.memory_space<vmem>>, %arg7: memref<16x16xf32, #tpu.memory_space<vmem>>, %arg8: memref<1x16xf32, #tpu.memory_space<vmem>>, %arg9: memref<16x128xf32, #tpu.memory_space<vmem>>, %arg10: memref<1x128xf32, #tpu.memory_space<vmem>>, %arg11: memref<16x64xf32, #tpu.memory_space<vmem>>, %arg12: memref<16x64xf32, #tpu.memory_space<vmem>>, %arg13: memref<32x16xf32, #tpu.memory_space<vmem>>, %arg14: memref<1x16xf32, #tpu.memory_space<vmem>>, %arg15: memref<32x16xf32, #tpu.memory_space<vmem>>, %arg16: memref<1x16xf32, #tpu.memory_space<vmem>>, %arg17: memref<1x1x16xf32, #tpu.memory_space<vmem>>, %arg18: memref<1x1x16xf32, #tpu.memory_space<vmem>>, %arg19: memref<1x1x16xf32, #tpu.memory_space<vmem>>, %arg20: memref<16x128xf32, #tpu.memory_space<vmem>>) attributes {dimension_semantics = [#tpu.dimension_semantics<parallel>], iteration_bounds = array<i64: 2>, scalar_prefetch = 0 : i64, scratch_operands = 1 : i64, tpu.core_type = #tpu.core_type<tc>, window_params = [{transform_indices = @transform_0, window_bounds = array<i64: 1, 16, 8>}, {transform_indices = @transform_1, window_bounds = array<i64: 1, 16, 16>}, {transform_indices = @transform_2, window_bounds = array<i64: 1, 1, 16>}, {pipeline_mode = #tpu.pipeline_mode<synchronous>, transform_indices = @transform_3, window_bounds = array<i64: 8, 16>}, {pipeline_mode = #tpu.pipeline_mode<synchronous>, transform_indices = @transform_4, window_bounds = array<i64: 1, 16>}, {pipeline_mode = #tpu.pipeline_mode<synchronous>, transform_indices = @transform_5, window_bounds = array<i64: 16, 16>}, {pipeline_mode = #tpu.pipeline_mode<synchronous>, transform_indices = @transform_6, window_bounds = array<i64: 16, 16>}, {pipeline_mode = #tpu.pipeline_mode<synchronous>, transform_indices = @transform_7, window_bounds = array<i64: 1, 16>}, {pipeline_mode = #tpu.pipeline_mode<synchronous>, transform_indices = @transform_8, window_bounds = array<i64: 16, 128>}, {pipeline_mode = #tpu.pipeline_mode<synchronous>, transform_indices = @transform_9, window_bounds = array<i64: 1, 128>}, {pipeline_mode = #tpu.pipeline_mode<synchronous>, transform_indices = @transform_10, window_bounds = array<i64: 16, 64>}, {pipeline_mode = #tpu.pipeline_mode<synchronous>, transform_indices = @transform_11, window_bounds = array<i64: 16, 64>}, {pipeline_mode = #tpu.pipeline_mode<synchronous>, transform_indices = @transform_12, window_bounds = array<i64: 32, 16>}, {pipeline_mode = #tpu.pipeline_mode<synchronous>, transform_indices = @transform_13, window_bounds = array<i64: 1, 16>}, {pipeline_mode = #tpu.pipeline_mode<synchronous>, transform_indices = @transform_14, window_bounds = array<i64: 32, 16>}, {pipeline_mode = #tpu.pipeline_mode<synchronous>, transform_indices = @transform_15, window_bounds = array<i64: 1, 16>}, {transform_indices = @transform_16, window_bounds = array<i64: 1, 1, 16>}, {transform_indices = @transform_17, window_bounds = array<i64: 1, 1, 16>}, {transform_indices = @transform_18, window_bounds = array<i64: 1, 1, 16>}]} {
    %c0 = arith.constant 0 : index
    %c0_0 = arith.constant 0 : index
    %c0_1 = arith.constant 0 : index
    %0 = vector.load %arg1[%c0, %c0_0, %c0_1] : memref<1x16x8xf32, #tpu.memory_space<vmem>>, vector<1x16x8xf32>
    %1 = vector.shape_cast %0 : vector<1x16x8xf32> to vector<16x8xf32>
    %2 = math.absf %1 : vector<16x8xf32>
    %cst = arith.constant dense<0xFF800000> : vector<16xf32>
    %3 = vector.multi_reduction <maximumf>, %2, %cst [1] : vector<16x8xf32> to vector<16xf32>
    %4 = vector.shape_cast %3 : vector<16xf32> to vector<16x1xf32>
    %cst_2 = arith.constant 0.000000e+00 : f32
    %5 = vector.broadcast %cst_2 : f32 to vector<16x1xf32>
    %6 = arith.cmpf ogt, %4, %5 : vector<16x1xf32>
    %7 = arith.extui %6 : vector<16x1xi1> to vector<16x1xi32>
    %8 = arith.sitofp %7 : vector<16x1xi32> to vector<16x1xf32>
    %c0_3 = arith.constant 0 : index
    %c0_4 = arith.constant 0 : index
    %9 = vector.load %arg4[%c0_3, %c0_4] : memref<8x16xf32, #tpu.memory_space<vmem>>, vector<8x16xf32>
    %cst_5 = arith.constant dense<0.000000e+00> : vector<16x16xf32>
    %10 = tpu.matmul %1, %9, %cst_5 {dimension_numbers = #tpu.dot_dimension_numbers<[1], [0], [0], [1], [0, 0, 1, 1], [], []>} : vector<16x8xf32>, vector<8x16xf32>, vector<16x16xf32> -> vector<16x16xf32>
    %c0_6 = arith.constant 0 : index
    %c0_7 = arith.constant 0 : index
    %11 = vector.load %arg5[%c0_6, %c0_7] : memref<1x16xf32, #tpu.memory_space<vmem>>, vector<1x16xf32>
    %12 = vector.broadcast %11 : vector<1x16xf32> to vector<16x16xf32>
    %13 = arith.addf %10, %12 : vector<16x16xf32>
    %14 = vector.broadcast %8 : vector<16x1xf32> to vector<16x16xf32>
    %15 = arith.mulf %13, %14 : vector<16x16xf32>
    %c0_8 = arith.constant 0 : index
    %c0_9 = arith.constant 0 : index
    %c0_10 = arith.constant 0 : index
    %16 = vector.load %arg2[%c0_8, %c0_9, %c0_10] : memref<1x16x16xf32, #tpu.memory_space<vmem>>, vector<1x16x16xf32>
    %17 = vector.shape_cast %16 : vector<1x16x16xf32> to vector<16x16xf32>
    %18 = math.absf %17 : vector<16x16xf32>
    %cst_11 = arith.constant dense<0xFF800000> : vector<16xf32>
    %19 = vector.multi_reduction <maximumf>, %18, %cst_11 [1] : vector<16x16xf32> to vector<16xf32>
    %20 = vector.shape_cast %19 : vector<16xf32> to vector<16x1xf32>
    %21 = math.absf %15 : vector<16x16xf32>
    %cst_12 = arith.constant dense<0xFF800000> : vector<16xf32>
    %22 = vector.multi_reduction <maximumf>, %21, %cst_12 [1] : vector<16x16xf32> to vector<16xf32>
    %23 = vector.shape_cast %22 : vector<16xf32> to vector<16x1xf32>
    %24 = arith.maximumf %20, %23 : vector<16x1xf32>
    %cst_13 = arith.constant 0.000000e+00 : f32
    %25 = vector.broadcast %cst_13 : f32 to vector<16x1xf32>
    %26 = arith.cmpf ogt, %24, %25 : vector<16x1xf32>
    %27 = arith.extui %26 : vector<16x1xi1> to vector<16x1xi32>
    %28 = arith.sitofp %27 : vector<16x1xi32> to vector<16x1xf32>
    %c0_14 = arith.constant 0 : index
    %c0_15 = arith.constant 0 : index
    %29 = vector.load %arg6[%c0_14, %c0_15] : memref<16x16xf32, #tpu.memory_space<vmem>>, vector<16x16xf32>
    %cst_16 = arith.constant dense<0.000000e+00> : vector<16x16xf32>
    %30 = tpu.matmul %17, %29, %cst_16 {dimension_numbers = #tpu.dot_dimension_numbers<[1], [0], [0], [1], [0, 0, 1, 1], [], []>} : vector<16x16xf32>, vector<16x16xf32>, vector<16x16xf32> -> vector<16x16xf32>
    %c0_17 = arith.constant 0 : index
    %c0_18 = arith.constant 0 : index
    %31 = vector.load %arg7[%c0_17, %c0_18] : memref<16x16xf32, #tpu.memory_space<vmem>>, vector<16x16xf32>
    %cst_19 = arith.constant dense<0.000000e+00> : vector<16x16xf32>
    %32 = tpu.matmul %15, %31, %cst_19 {dimension_numbers = #tpu.dot_dimension_numbers<[1], [0], [0], [1], [0, 0, 1, 1], [], []>} : vector<16x16xf32>, vector<16x16xf32>, vector<16x16xf32> -> vector<16x16xf32>
    %33 = arith.addf %30, %32 : vector<16x16xf32>
    %c0_20 = arith.constant 0 : index
    %c0_21 = arith.constant 0 : index
    %34 = vector.load %arg8[%c0_20, %c0_21] : memref<1x16xf32, #tpu.memory_space<vmem>>, vector<1x16xf32>
    %35 = vector.broadcast %34 : vector<1x16xf32> to vector<16x16xf32>
    %36 = arith.addf %33, %35 : vector<16x16xf32>
    %37 = vector.broadcast %28 : vector<16x1xf32> to vector<16x16xf32>
    %38 = arith.mulf %36, %37 : vector<16x16xf32>
    %c0_22 = arith.constant 0 : index
    %c0_23 = arith.constant 0 : index
    %39 = vector.load %arg9[%c0_22, %c0_23] : memref<16x128xf32, #tpu.memory_space<vmem>>, vector<16x128xf32>
    %cst_24 = arith.constant dense<0.000000e+00> : vector<16x128xf32>
    %40 = tpu.matmul %38, %39, %cst_24 {dimension_numbers = #tpu.dot_dimension_numbers<[1], [0], [0], [1], [0, 0, 1, 1], [], []>} : vector<16x16xf32>, vector<16x128xf32>, vector<16x128xf32> -> vector<16x128xf32>
    %c0_25 = arith.constant 0 : index
    %c0_26 = arith.constant 0 : index
    %41 = vector.load %arg10[%c0_25, %c0_26] : memref<1x128xf32, #tpu.memory_space<vmem>>, vector<1x128xf32>
    %42 = vector.broadcast %41 : vector<1x128xf32> to vector<16x128xf32>
    %43 = arith.addf %40, %42 : vector<16x128xf32>
    %c0_27 = arith.constant 0 : index
    %c0_28 = arith.constant 0 : index
    %44 = vector.load %arg20[%c0_27, %c0_28] : memref<16x128xf32, #tpu.memory_space<vmem>>, vector<16x128xf32>
    tpu.vector_store %arg20[%c0_27, %c0_28], %43 {strides = array<i32>} : memref<16x128xf32, #tpu.memory_space<vmem>>, vector<16x128xf32>,
    %c0_29 = arith.constant 0 : index
    %c0_30 = arith.constant 0 : index
    %45 = vector.load %arg11[%c0_29, %c0_30] : memref<16x64xf32, #tpu.memory_space<vmem>>, vector<16x64xf32>
    %c0_31 = arith.constant 0 : index
    %c0_32 = arith.constant 0 : index
    %46 = vector.load %arg12[%c0_31, %c0_32] : memref<16x64xf32, #tpu.memory_space<vmem>>, vector<16x64xf32>
    %cst_33 = arith.constant 0.000000e+00 : f32
    %47 = vector.broadcast %cst_33 : f32 to vector<1x16xf32>
    %c0_i32 = arith.constant 0 : i32
    %c15_i32 = arith.constant 15 : i32
    %48 = arith.subi %c15_i32, %c0_i32 : i32
    %49 = arith.index_cast %c0_i32 : i32 to index
    %c0_34 = arith.constant 0 : index
    %50 = vector.load %arg20[%49, %c0_34] : memref<16x128xf32, #tpu.memory_space<vmem>>, vector<1x128xf32>
    %51 = arith.index_cast %48 : i32 to index
    %c0_35 = arith.constant 0 : index
    %52 = vector.load %arg20[%51, %c0_35] : memref<16x128xf32, #tpu.memory_space<vmem>>, vector<1x128xf32>
    %53 = vector.extract_strided_slice %50 {offsets = [0, 0], sizes = [1, 64], strides = [1, 1]} : vector<1x128xf32> to vector<1x64xf32>
    %cst_36 = arith.constant dense<0.000000e+00> : vector<1x64xf32>
    %54 = tpu.matmul %47, %45, %cst_36 {dimension_numbers = #tpu.dot_dimension_numbers<[1], [0], [0], [1], [0, 0, 1, 1], [], []>} : vector<1x16xf32>, vector<16x64xf32>, vector<1x64xf32> -> vector<1x64xf32>
    %55 = arith.addf %53, %54 : vector<1x64xf32>
    %56 = vector.extract_strided_slice %52 {offsets = [0, 64], sizes = [1, 64], strides = [1, 1]} : vector<1x128xf32> to vector<1x64xf32>
    %cst_37 = arith.constant dense<0.000000e+00> : vector<1x64xf32>
    %57 = tpu.matmul %47, %46, %cst_37 {dimension_numbers = #tpu.dot_dimension_numbers<[1], [0], [0], [1], [0, 0, 1, 1], [], []>} : vector<1x16xf32>, vector<16x64xf32>, vector<1x64xf32> -> vector<1x64xf32>
    %58 = arith.addf %56, %57 : vector<1x64xf32>
    %59 = vector.extract_strided_slice %55 {offsets = [0, 0], sizes = [1, 16], strides = [1, 1]} : vector<1x64xf32> to vector<1x16xf32>
    %60 = arith.negf %59 : vector<1x16xf32>
    %61 = math.exp %60 : vector<1x16xf32>
    %cst_38 = arith.constant 1.000000e+00 : f32
    %62 = vector.broadcast %cst_38 : f32 to vector<1x16xf32>
    %63 = arith.addf %62, %61 : vector<1x16xf32>
    %64 = arith.divf %62, %63 : vector<1x16xf32>
    %65 = vector.extract_strided_slice %55 {offsets = [0, 16], sizes = [1, 16], strides = [1, 1]} : vector<1x64xf32> to vector<1x16xf32>
    %66 = arith.negf %65 : vector<1x16xf32>
    %67 = math.exp %66 : vector<1x16xf32>
    %cst_39 = arith.constant 1.000000e+00 : f32
    %68 = vector.broadcast %cst_39 : f32 to vector<1x16xf32>
    %69 = arith.addf %68, %67 : vector<1x16xf32>
    %70 = arith.divf %68, %69 : vector<1x16xf32>
    %71 = vector.extract_strided_slice %55 {offsets = [0, 32], sizes = [1, 16], strides = [1, 1]} : vector<1x64xf32> to vector<1x16xf32>
    %72 = math.tanh %71 : vector<1x16xf32>
    %73 = vector.extract_strided_slice %55 {offsets = [0, 48], sizes = [1, 16], strides = [1, 1]} : vector<1x64xf32> to vector<1x16xf32>
    %74 = arith.negf %73 : vector<1x16xf32>
    %75 = math.exp %74 : vector<1x16xf32>
    %cst_40 = arith.constant 1.000000e+00 : f32
    %76 = vector.broadcast %cst_40 : f32 to vector<1x16xf32>
    %77 = arith.addf %76, %75 : vector<1x16xf32>
    %78 = arith.divf %76, %77 : vector<1x16xf32>
    %79 = arith.mulf %70, %47 : vector<1x16xf32>
    %80 = arith.mulf %64, %72 : vector<1x16xf32>
    %81 = arith.addf %79, %80 : vector<1x16xf32>
    %82 = math.tanh %81 : vector<1x16xf32>
    %83 = arith.mulf %78, %82 : vector<1x16xf32>
    %84 = vector.extract_strided_slice %58 {offsets = [0, 0], sizes = [1, 16], strides = [1, 1]} : vector<1x64xf32> to vector<1x16xf32>
    %85 = arith.negf %84 : vector<1x16xf32>
    %86 = math.exp %85 : vector<1x16xf32>
    %cst_41 = arith.constant 1.000000e+00 : f32
    %87 = vector.broadcast %cst_41 : f32 to vector<1x16xf32>
    %88 = arith.addf %87, %86 : vector<1x16xf32>
    %89 = arith.divf %87, %88 : vector<1x16xf32>
    %90 = vector.extract_strided_slice %58 {offsets = [0, 16], sizes = [1, 16], strides = [1, 1]} : vector<1x64xf32> to vector<1x16xf32>
    %91 = arith.negf %90 : vector<1x16xf32>
    %92 = math.exp %91 : vector<1x16xf32>
    %cst_42 = arith.constant 1.000000e+00 : f32
    %93 = vector.broadcast %cst_42 : f32 to vector<1x16xf32>
    %94 = arith.addf %93, %92 : vector<1x16xf32>
    %95 = arith.divf %93, %94 : vector<1x16xf32>
    %96 = vector.extract_strided_slice %58 {offsets = [0, 32], sizes = [1, 16], strides = [1, 1]} : vector<1x64xf32> to vector<1x16xf32>
    %97 = math.tanh %96 : vector<1x16xf32>
    %98 = vector.extract_strided_slice %58 {offsets = [0, 48], sizes = [1, 16], strides = [1, 1]} : vector<1x64xf32> to vector<1x16xf32>
    %99 = arith.negf %98 : vector<1x16xf32>
    %100 = math.exp %99 : vector<1x16xf32>
    %cst_43 = arith.constant 1.000000e+00 : f32
    %101 = vector.broadcast %cst_43 : f32 to vector<1x16xf32>
    %102 = arith.addf %101, %100 : vector<1x16xf32>
    %103 = arith.divf %101, %102 : vector<1x16xf32>
    %104 = arith.mulf %95, %47 : vector<1x16xf32>
    %105 = arith.mulf %89, %97 : vector<1x16xf32>
    %106 = arith.addf %104, %105 : vector<1x16xf32>
    %107 = math.tanh %106 : vector<1x16xf32>
    %108 = arith.mulf %103, %107 : vector<1x16xf32>
    %109 = arith.addf %47, %83 : vector<1x16xf32>
    %110 = arith.addf %47, %108 : vector<1x16xf32>
    %c1_i32 = arith.constant 1 : i32
    %c15_i32_44 = arith.constant 15 : i32
    %111 = arith.subi %c15_i32_44, %c1_i32 : i32
    %112 = arith.index_cast %c1_i32 : i32 to index
    %c0_45 = arith.constant 0 : index
    %113 = vector.load %arg20[%112, %c0_45] : memref<16x128xf32, #tpu.memory_space<vmem>>, vector<1x128xf32>
    %114 = arith.index_cast %111 : i32 to index
    %c0_46 = arith.constant 0 : index
    %115 = vector.load %arg20[%114, %c0_46] : memref<16x128xf32, #tpu.memory_space<vmem>>, vector<1x128xf32>
    %116 = vector.extract_strided_slice %113 {offsets = [0, 0], sizes = [1, 64], strides = [1, 1]} : vector<1x128xf32> to vector<1x64xf32>
    %cst_47 = arith.constant dense<0.000000e+00> : vector<1x64xf32>
    %117 = tpu.matmul %83, %45, %cst_47 {dimension_numbers = #tpu.dot_dimension_numbers<[1], [0], [0], [1], [0, 0, 1, 1], [], []>} : vector<1x16xf32>, vector<16x64xf32>, vector<1x64xf32> -> vector<1x64xf32>
    %118 = arith.addf %116, %117 : vector<1x64xf32>
    %119 = vector.extract_strided_slice %115 {offsets = [0, 64], sizes = [1, 64], strides = [1, 1]} : vector<1x128xf32> to vector<1x64xf32>
    %cst_48 = arith.constant dense<0.000000e+00> : vector<1x64xf32>
    %120 = tpu.matmul %108, %46, %cst_48 {dimension_numbers = #tpu.dot_dimension_numbers<[1], [0], [0], [1], [0, 0, 1, 1], [], []>} : vector<1x16xf32>, vector<16x64xf32>, vector<1x64xf32> -> vector<1x64xf32>
    %121 = arith.addf %119, %120 : vector<1x64xf32>
    %122 = vector.extract_strided_slice %118 {offsets = [0, 0], sizes = [1, 16], strides = [1, 1]} : vector<1x64xf32> to vector<1x16xf32>
    %123 = arith.negf %122 : vector<1x16xf32>
    %124 = math.exp %123 : vector<1x16xf32>
    %cst_49 = arith.constant 1.000000e+00 : f32
    %125 = vector.broadcast %cst_49 : f32 to vector<1x16xf32>
    %126 = arith.addf %125, %124 : vector<1x16xf32>
    %127 = arith.divf %125, %126 : vector<1x16xf32>
    %128 = vector.extract_strided_slice %118 {offsets = [0, 16], sizes = [1, 16], strides = [1, 1]} : vector<1x64xf32> to vector<1x16xf32>
    %129 = arith.negf %128 : vector<1x16xf32>
    %130 = math.exp %129 : vector<1x16xf32>
    %cst_50 = arith.constant 1.000000e+00 : f32
    %131 = vector.broadcast %cst_50 : f32 to vector<1x16xf32>
    %132 = arith.addf %131, %130 : vector<1x16xf32>
    %133 = arith.divf %131, %132 : vector<1x16xf32>
    %134 = vector.extract_strided_slice %118 {offsets = [0, 32], sizes = [1, 16], strides = [1, 1]} : vector<1x64xf32> to vector<1x16xf32>
    %135 = math.tanh %134 : vector<1x16xf32>
    %136 = vector.extract_strided_slice %118 {offsets = [0, 48], sizes = [1, 16], strides = [1, 1]} : vector<1x64xf32> to vector<1x16xf32>
    %137 = arith.negf %136 : vector<1x16xf32>
    %138 = math.exp %137 : vector<1x16xf32>
    %cst_51 = arith.constant 1.000000e+00 : f32
    %139 = vector.broadcast %cst_51 : f32 to vector<1x16xf32>
    %140 = arith.addf %139, %138 : vector<1x16xf32>
    %141 = arith.divf %139, %140 : vector<1x16xf32>
    %142 = arith.mulf %133, %81 : vector<1x16xf32>
    %143 = arith.mulf %127, %135 : vector<1x16xf32>
    %144 = arith.addf %142, %143 : vector<1x16xf32>
    %145 = math.tanh %144 : vector<1x16xf32>
    %146 = arith.mulf %141, %145 : vector<1x16xf32>
    %147 = vector.extract_strided_slice %121 {offsets = [0, 0], sizes = [1, 16], strides = [1, 1]} : vector<1x64xf32> to vector<1x16xf32>
    %148 = arith.negf %147 : vector<1x16xf32>
    %149 = math.exp %148 : vector<1x16xf32>
    %cst_52 = arith.constant 1.000000e+00 : f32
    %150 = vector.broadcast %cst_52 : f32 to vector<1x16xf32>
    %151 = arith.addf %150, %149 : vector<1x16xf32>
    %152 = arith.divf %150, %151 : vector<1x16xf32>
    %153 = vector.extract_strided_slice %121 {offsets = [0, 16], sizes = [1, 16], strides = [1, 1]} : vector<1x64xf32> to vector<1x16xf32>
    %154 = arith.negf %153 : vector<1x16xf32>
    %155 = math.exp %154 : vector<1x16xf32>
    %cst_53 = arith.constant 1.000000e+00 : f32
    %156 = vector.broadcast %cst_53 : f32 to vector<1x16xf32>
    %157 = arith.addf %156, %155 : vector<1x16xf32>
    %158 = arith.divf %156, %157 : vector<1x16xf32>
    %159 = vector.extract_strided_slice %121 {offsets = [0, 32], sizes = [1, 16], strides = [1, 1]} : vector<1x64xf32> to vector<1x16xf32>
    %160 = math.tanh %159 : vector<1x16xf32>
    %161 = vector.extract_strided_slice %121 {offsets = [0, 48], sizes = [1, 16], strides = [1, 1]} : vector<1x64xf32> to vector<1x16xf32>
    %162 = arith.negf %161 : vector<1x16xf32>
    %163 = math.exp %162 : vector<1x16xf32>
    %cst_54 = arith.constant 1.000000e+00 : f32
    %164 = vector.broadcast %cst_54 : f32 to vector<1x16xf32>
    %165 = arith.addf %164, %163 : vector<1x16xf32>
    %166 = arith.divf %164, %165 : vector<1x16xf32>
    %167 = arith.mulf %158, %106 : vector<1x16xf32>
    %168 = arith.mulf %152, %160 : vector<1x16xf32>
    %169 = arith.addf %167, %168 : vector<1x16xf32>
    %170 = math.tanh %169 : vector<1x16xf32>
    %171 = arith.mulf %166, %170 : vector<1x16xf32>
    %172 = arith.addf %109, %146 : vector<1x16xf32>
    %173 = arith.addf %110, %171 : vector<1x16xf32>
    %c2_i32 = arith.constant 2 : i32
    %c15_i32_55 = arith.constant 15 : i32
    %174 = arith.subi %c15_i32_55, %c2_i32 : i32
    %175 = arith.index_cast %c2_i32 : i32 to index
    %c0_56 = arith.constant 0 : index
    %176 = vector.load %arg20[%175, %c0_56] : memref<16x128xf32, #tpu.memory_space<vmem>>, vector<1x128xf32>
    %177 = arith.index_cast %174 : i32 to index
    %c0_57 = arith.constant 0 : index
    %178 = vector.load %arg20[%177, %c0_57] : memref<16x128xf32, #tpu.memory_space<vmem>>, vector<1x128xf32>
    %179 = vector.extract_strided_slice %176 {offsets = [0, 0], sizes = [1, 64], strides = [1, 1]} : vector<1x128xf32> to vector<1x64xf32>
    %cst_58 = arith.constant dense<0.000000e+00> : vector<1x64xf32>
    %180 = tpu.matmul %146, %45, %cst_58 {dimension_numbers = #tpu.dot_dimension_numbers<[1], [0], [0], [1], [0, 0, 1, 1], [], []>} : vector<1x16xf32>, vector<16x64xf32>, vector<1x64xf32> -> vector<1x64xf32>
    %181 = arith.addf %179, %180 : vector<1x64xf32>
    %182 = vector.extract_strided_slice %178 {offsets = [0, 64], sizes = [1, 64], strides = [1, 1]} : vector<1x128xf32> to vector<1x64xf32>
    %cst_59 = arith.constant dense<0.000000e+00> : vector<1x64xf32>
    %183 = tpu.matmul %171, %46, %cst_59 {dimension_numbers = #tpu.dot_dimension_numbers<[1], [0], [0], [1], [0, 0, 1, 1], [], []>} : vector<1x16xf32>, vector<16x64xf32>, vector<1x64xf32> -> vector<1x64xf32>
    %184 = arith.addf %182, %183 : vector<1x64xf32>
    %185 = vector.extract_strided_slice %181 {offsets = [0, 0], sizes = [1, 16], strides = [1, 1]} : vector<1x64xf32> to vector<1x16xf32>
    %186 = arith.negf %185 : vector<1x16xf32>
    %187 = math.exp %186 : vector<1x16xf32>
    %cst_60 = arith.constant 1.000000e+00 : f32
    %188 = vector.broadcast %cst_60 : f32 to vector<1x16xf32>
    %189 = arith.addf %188, %187 : vector<1x16xf32>
    %190 = arith.divf %188, %189 : vector<1x16xf32>
    %191 = vector.extract_strided_slice %181 {offsets = [0, 16], sizes = [1, 16], strides = [1, 1]} : vector<1x64xf32> to vector<1x16xf32>
    %192 = arith.negf %191 : vector<1x16xf32>
    %193 = math.exp %192 : vector<1x16xf32>
    %cst_61 = arith.constant 1.000000e+00 : f32
    %194 = vector.broadcast %cst_61 : f32 to vector<1x16xf32>
    %195 = arith.addf %194, %193 : vector<1x16xf32>
    %196 = arith.divf %194, %195 : vector<1x16xf32>
    %197 = vector.extract_strided_slice %181 {offsets = [0, 32], sizes = [1, 16], strides = [1, 1]} : vector<1x64xf32> to vector<1x16xf32>
    %198 = math.tanh %197 : vector<1x16xf32>
    %199 = vector.extract_strided_slice %181 {offsets = [0, 48], sizes = [1, 16], strides = [1, 1]} : vector<1x64xf32> to vector<1x16xf32>
    %200 = arith.negf %199 : vector<1x16xf32>
    %201 = math.exp %200 : vector<1x16xf32>
    %cst_62 = arith.constant 1.000000e+00 : f32
    %202 = vector.broadcast %cst_62 : f32 to vector<1x16xf32>
    %203 = arith.addf %202, %201 : vector<1x16xf32>
    %204 = arith.divf %202, %203 : vector<1x16xf32>
    %205 = arith.mulf %196, %144 : vector<1x16xf32>
    %206 = arith.mulf %190, %198 : vector<1x16xf32>
    %207 = arith.addf %205, %206 : vector<1x16xf32>
    %208 = math.tanh %207 : vector<1x16xf32>
    %209 = arith.mulf %204, %208 : vector<1x16xf32>
    %210 = vector.extract_strided_slice %184 {offsets = [0, 0], sizes = [1, 16], strides = [1, 1]} : vector<1x64xf32> to vector<1x16xf32>
    %211 = arith.negf %210 : vector<1x16xf32>
    %212 = math.exp %211 : vector<1x16xf32>
    %cst_63 = arith.constant 1.000000e+00 : f32
    %213 = vector.broadcast %cst_63 : f32 to vector<1x16xf32>
    %214 = arith.addf %213, %212 : vector<1x16xf32>
    %215 = arith.divf %213, %214 : vector<1x16xf32>
    %216 = vector.extract_strided_slice %184 {offsets = [0, 16], sizes = [1, 16], strides = [1, 1]} : vector<1x64xf32> to vector<1x16xf32>
    %217 = arith.negf %216 : vector<1x16xf32>
    %218 = math.exp %217 : vector<1x16xf32>
    %cst_64 = arith.constant 1.000000e+00 : f32
    %219 = vector.broadcast %cst_64 : f32 to vector<1x16xf32>
    %220 = arith.addf %219, %218 : vector<1x16xf32>
    %221 = arith.divf %219, %220 : vector<1x16xf32>
    %222 = vector.extract_strided_slice %184 {offsets = [0, 32], sizes = [1, 16], strides = [1, 1]} : vector<1x64xf32> to vector<1x16xf32>
    %223 = math.tanh %222 : vector<1x16xf32>
    %224 = vector.extract_strided_slice %184 {offsets = [0, 48], sizes = [1, 16], strides = [1, 1]} : vector<1x64xf32> to vector<1x16xf32>
    %225 = arith.negf %224 : vector<1x16xf32>
    %226 = math.exp %225 : vector<1x16xf32>
    %cst_65 = arith.constant 1.000000e+00 : f32
    %227 = vector.broadcast %cst_65 : f32 to vector<1x16xf32>
    %228 = arith.addf %227, %226 : vector<1x16xf32>
    %229 = arith.divf %227, %228 : vector<1x16xf32>
    %230 = arith.mulf %221, %169 : vector<1x16xf32>
    %231 = arith.mulf %215, %223 : vector<1x16xf32>
    %232 = arith.addf %230, %231 : vector<1x16xf32>
    %233 = math.tanh %232 : vector<1x16xf32>
    %234 = arith.mulf %229, %233 : vector<1x16xf32>
    %235 = arith.addf %172, %209 : vector<1x16xf32>
    %236 = arith.addf %173, %234 : vector<1x16xf32>
    %c3_i32 = arith.constant 3 : i32
    %c15_i32_66 = arith.constant 15 : i32
    %237 = arith.subi %c15_i32_66, %c3_i32 : i32
    %238 = arith.index_cast %c3_i32 : i32 to index
    %c0_67 = arith.constant 0 : index
    %239 = vector.load %arg20[%238, %c0_67] : memref<16x128xf32, #tpu.memory_space<vmem>>, vector<1x128xf32>
    %240 = arith.index_cast %237 : i32 to index
    %c0_68 = arith.constant 0 : index
    %241 = vector.load %arg20[%240, %c0_68] : memref<16x128xf32, #tpu.memory_space<vmem>>, vector<1x128xf32>
    %242 = vector.extract_strided_slice %239 {offsets = [0, 0], sizes = [1, 64], strides = [1, 1]} : vector<1x128xf32> to vector<1x64xf32>
    %cst_69 = arith.constant dense<0.000000e+00> : vector<1x64xf32>
    %243 = tpu.matmul %209, %45, %cst_69 {dimension_numbers = #tpu.dot_dimension_numbers<[1], [0], [0], [1], [0, 0, 1, 1], [], []>} : vector<1x16xf32>, vector<16x64xf32>, vector<1x64xf32> -> vector<1x64xf32>
    %244 = arith.addf %242, %243 : vector<1x64xf32>
    %245 = vector.extract_strided_slice %241 {offsets = [0, 64], sizes = [1, 64], strides = [1, 1]} : vector<1x128xf32> to vector<1x64xf32>
    %cst_70 = arith.constant dense<0.000000e+00> : vector<1x64xf32>
    %246 = tpu.matmul %234, %46, %cst_70 {dimension_numbers = #tpu.dot_dimension_numbers<[1], [0], [0], [1], [0, 0, 1, 1], [], []>} : vector<1x16xf32>, vector<16x64xf32>, vector<1x64xf32> -> vector<1x64xf32>
    %247 = arith.addf %245, %246 : vector<1x64xf32>
    %248 = vector.extract_strided_slice %244 {offsets = [0, 0], sizes = [1, 16], strides = [1, 1]} : vector<1x64xf32> to vector<1x16xf32>
    %249 = arith.negf %248 : vector<1x16xf32>
    %250 = math.exp %249 : vector<1x16xf32>
    %cst_71 = arith.constant 1.000000e+00 : f32
    %251 = vector.broadcast %cst_71 : f32 to vector<1x16xf32>
    %252 = arith.addf %251, %250 : vector<1x16xf32>
    %253 = arith.divf %251, %252 : vector<1x16xf32>
    %254 = vector.extract_strided_slice %244 {offsets = [0, 16], sizes = [1, 16], strides = [1, 1]} : vector<1x64xf32> to vector<1x16xf32>
    %255 = arith.negf %254 : vector<1x16xf32>
    %256 = math.exp %255 : vector<1x16xf32>
    %cst_72 = arith.constant 1.000000e+00 : f32
    %257 = vector.broadcast %cst_72 : f32 to vector<1x16xf32>
    %258 = arith.addf %257, %256 : vector<1x16xf32>
    %259 = arith.divf %257, %258 : vector<1x16xf32>
    %260 = vector.extract_strided_slice %244 {offsets = [0, 32], sizes = [1, 16], strides = [1, 1]} : vector<1x64xf32> to vector<1x16xf32>
    %261 = math.tanh %260 : vector<1x16xf32>
    %262 = vector.extract_strided_slice %244 {offsets = [0, 48], sizes = [1, 16], strides = [1, 1]} : vector<1x64xf32> to vector<1x16xf32>
    %263 = arith.negf %262 : vector<1x16xf32>
    %264 = math.exp %263 : vector<1x16xf32>
    %cst_73 = arith.constant 1.000000e+00 : f32
    %265 = vector.broadcast %cst_73 : f32 to vector<1x16xf32>
    %266 = arith.addf %265, %264 : vector<1x16xf32>
    %267 = arith.divf %265, %266 : vector<1x16xf32>
    %268 = arith.mulf %259, %207 : vector<1x16xf32>
    %269 = arith.mulf %253, %261 : vector<1x16xf32>
    %270 = arith.addf %268, %269 : vector<1x16xf32>
    %271 = math.tanh %270 : vector<1x16xf32>
    %272 = arith.mulf %267, %271 : vector<1x16xf32>
    %273 = vector.extract_strided_slice %247 {offsets = [0, 0], sizes = [1, 16], strides = [1, 1]} : vector<1x64xf32> to vector<1x16xf32>
    %274 = arith.negf %273 : vector<1x16xf32>
    %275 = math.exp %274 : vector<1x16xf32>
    %cst_74 = arith.constant 1.000000e+00 : f32
    %276 = vector.broadcast %cst_74 : f32 to vector<1x16xf32>
    %277 = arith.addf %276, %275 : vector<1x16xf32>
    %278 = arith.divf %276, %277 : vector<1x16xf32>
    %279 = vector.extract_strided_slice %247 {offsets = [0, 16], sizes = [1, 16], strides = [1, 1]} : vector<1x64xf32> to vector<1x16xf32>
    %280 = arith.negf %279 : vector<1x16xf32>
    %281 = math.exp %280 : vector<1x16xf32>
    %cst_75 = arith.constant 1.000000e+00 : f32
    %282 = vector.broadcast %cst_75 : f32 to vector<1x16xf32>
    %283 = arith.addf %282, %281 : vector<1x16xf32>
    %284 = arith.divf %282, %283 : vector<1x16xf32>
    %285 = vector.extract_strided_slice %247 {offsets = [0, 32], sizes = [1, 16], strides = [1, 1]} : vector<1x64xf32> to vector<1x16xf32>
    %286 = math.tanh %285 : vector<1x16xf32>
    %287 = vector.extract_strided_slice %247 {offsets = [0, 48], sizes = [1, 16], strides = [1, 1]} : vector<1x64xf32> to vector<1x16xf32>
    %288 = arith.negf %287 : vector<1x16xf32>
    %289 = math.exp %288 : vector<1x16xf32>
    %cst_76 = arith.constant 1.000000e+00 : f32
    %290 = vector.broadcast %cst_76 : f32 to vector<1x16xf32>
    %291 = arith.addf %290, %289 : vector<1x16xf32>
    %292 = arith.divf %290, %291 : vector<1x16xf32>
    %293 = arith.mulf %284, %232 : vector<1x16xf32>
    %294 = arith.mulf %278, %286 : vector<1x16xf32>
    %295 = arith.addf %293, %294 : vector<1x16xf32>
    %296 = math.tanh %295 : vector<1x16xf32>
    %297 = arith.mulf %292, %296 : vector<1x16xf32>
    %298 = arith.addf %235, %272 : vector<1x16xf32>
    %299 = arith.addf %236, %297 : vector<1x16xf32>
    %c4_i32 = arith.constant 4 : i32
    %c15_i32_77 = arith.constant 15 : i32
    %300 = arith.subi %c15_i32_77, %c4_i32 : i32
    %301 = arith.index_cast %c4_i32 : i32 to index
    %c0_78 = arith.constant 0 : index
    %302 = vector.load %arg20[%301, %c0_78] : memref<16x128xf32, #tpu.memory_space<vmem>>, vector<1x128xf32>
    %303 = arith.index_cast %300 : i32 to index
    %c0_79 = arith.constant 0 : index
    %304 = vector.load %arg20[%303, %c0_79] : memref<16x128xf32, #tpu.memory_space<vmem>>, vector<1x128xf32>
    %305 = vector.extract_strided_slice %302 {offsets = [0, 0], sizes = [1, 64], strides = [1, 1]} : vector<1x128xf32> to vector<1x64xf32>
    %cst_80 = arith.constant dense<0.000000e+00> : vector<1x64xf32>
    %306 = tpu.matmul %272, %45, %cst_80 {dimension_numbers = #tpu.dot_dimension_numbers<[1], [0], [0], [1], [0, 0, 1, 1], [], []>} : vector<1x16xf32>, vector<16x64xf32>, vector<1x64xf32> -> vector<1x64xf32>
    %307 = arith.addf %305, %306 : vector<1x64xf32>
    %308 = vector.extract_strided_slice %304 {offsets = [0, 64], sizes = [1, 64], strides = [1, 1]} : vector<1x128xf32> to vector<1x64xf32>
    %cst_81 = arith.constant dense<0.000000e+00> : vector<1x64xf32>
    %309 = tpu.matmul %297, %46, %cst_81 {dimension_numbers = #tpu.dot_dimension_numbers<[1], [0], [0], [1], [0, 0, 1, 1], [], []>} : vector<1x16xf32>, vector<16x64xf32>, vector<1x64xf32> -> vector<1x64xf32>
    %310 = arith.addf %308, %309 : vector<1x64xf32>
    %311 = vector.extract_strided_slice %307 {offsets = [0, 0], sizes = [1, 16], strides = [1, 1]} : vector<1x64xf32> to vector<1x16xf32>
    %312 = arith.negf %311 : vector<1x16xf32>
    %313 = math.exp %312 : vector<1x16xf32>
    %cst_82 = arith.constant 1.000000e+00 : f32
    %314 = vector.broadcast %cst_82 : f32 to vector<1x16xf32>
    %315 = arith.addf %314, %313 : vector<1x16xf32>
    %316 = arith.divf %314, %315 : vector<1x16xf32>
    %317 = vector.extract_strided_slice %307 {offsets = [0, 16], sizes = [1, 16], strides = [1, 1]} : vector<1x64xf32> to vector<1x16xf32>
    %318 = arith.negf %317 : vector<1x16xf32>
    %319 = math.exp %318 : vector<1x16xf32>
    %cst_83 = arith.constant 1.000000e+00 : f32
    %320 = vector.broadcast %cst_83 : f32 to vector<1x16xf32>
    %321 = arith.addf %320, %319 : vector<1x16xf32>
    %322 = arith.divf %320, %321 : vector<1x16xf32>
    %323 = vector.extract_strided_slice %307 {offsets = [0, 32], sizes = [1, 16], strides = [1, 1]} : vector<1x64xf32> to vector<1x16xf32>
    %324 = math.tanh %323 : vector<1x16xf32>
    %325 = vector.extract_strided_slice %307 {offsets = [0, 48], sizes = [1, 16], strides = [1, 1]} : vector<1x64xf32> to vector<1x16xf32>
    %326 = arith.negf %325 : vector<1x16xf32>
    %327 = math.exp %326 : vector<1x16xf32>
    %cst_84 = arith.constant 1.000000e+00 : f32
    %328 = vector.broadcast %cst_84 : f32 to vector<1x16xf32>
    %329 = arith.addf %328, %327 : vector<1x16xf32>
    %330 = arith.divf %328, %329 : vector<1x16xf32>
    %331 = arith.mulf %322, %270 : vector<1x16xf32>
    %332 = arith.mulf %316, %324 : vector<1x16xf32>
    %333 = arith.addf %331, %332 : vector<1x16xf32>
    %334 = math.tanh %333 : vector<1x16xf32>
    %335 = arith.mulf %330, %334 : vector<1x16xf32>
    %336 = vector.extract_strided_slice %310 {offsets = [0, 0], sizes = [1, 16], strides = [1, 1]} : vector<1x64xf32> to vector<1x16xf32>
    %337 = arith.negf %336 : vector<1x16xf32>
    %338 = math.exp %337 : vector<1x16xf32>
    %cst_85 = arith.constant 1.000000e+00 : f32
    %339 = vector.broadcast %cst_85 : f32 to vector<1x16xf32>
    %340 = arith.addf %339, %338 : vector<1x16xf32>
    %341 = arith.divf %339, %340 : vector<1x16xf32>
    %342 = vector.extract_strided_slice %310 {offsets = [0, 16], sizes = [1, 16], strides = [1, 1]} : vector<1x64xf32> to vector<1x16xf32>
    %343 = arith.negf %342 : vector<1x16xf32>
    %344 = math.exp %343 : vector<1x16xf32>
    %cst_86 = arith.constant 1.000000e+00 : f32
    %345 = vector.broadcast %cst_86 : f32 to vector<1x16xf32>
    %346 = arith.addf %345, %344 : vector<1x16xf32>
    %347 = arith.divf %345, %346 : vector<1x16xf32>
    %348 = vector.extract_strided_slice %310 {offsets = [0, 32], sizes = [1, 16], strides = [1, 1]} : vector<1x64xf32> to vector<1x16xf32>
    %349 = math.tanh %348 : vector<1x16xf32>
    %350 = vector.extract_strided_slice %310 {offsets = [0, 48], sizes = [1, 16], strides = [1, 1]} : vector<1x64xf32> to vector<1x16xf32>
    %351 = arith.negf %350 : vector<1x16xf32>
    %352 = math.exp %351 : vector<1x16xf32>
    %cst_87 = arith.constant 1.000000e+00 : f32
    %353 = vector.broadcast %cst_87 : f32 to vector<1x16xf32>
    %354 = arith.addf %353, %352 : vector<1x16xf32>
    %355 = arith.divf %353, %354 : vector<1x16xf32>
    %356 = arith.mulf %347, %295 : vector<1x16xf32>
    %357 = arith.mulf %341, %349 : vector<1x16xf32>
    %358 = arith.addf %356, %357 : vector<1x16xf32>
    %359 = math.tanh %358 : vector<1x16xf32>
    %360 = arith.mulf %355, %359 : vector<1x16xf32>
    %361 = arith.addf %298, %335 : vector<1x16xf32>
    %362 = arith.addf %299, %360 : vector<1x16xf32>
    %c5_i32 = arith.constant 5 : i32
    %c15_i32_88 = arith.constant 15 : i32
    %363 = arith.subi %c15_i32_88, %c5_i32 : i32
    %364 = arith.index_cast %c5_i32 : i32 to index
    %c0_89 = arith.constant 0 : index
    %365 = vector.load %arg20[%364, %c0_89] : memref<16x128xf32, #tpu.memory_space<vmem>>, vector<1x128xf32>
    %366 = arith.index_cast %363 : i32 to index
    %c0_90 = arith.constant 0 : index
    %367 = vector.load %arg20[%366, %c0_90] : memref<16x128xf32, #tpu.memory_space<vmem>>, vector<1x128xf32>
    %368 = vector.extract_strided_slice %365 {offsets = [0, 0], sizes = [1, 64], strides = [1, 1]} : vector<1x128xf32> to vector<1x64xf32>
    %cst_91 = arith.constant dense<0.000000e+00> : vector<1x64xf32>
    %369 = tpu.matmul %335, %45, %cst_91 {dimension_numbers = #tpu.dot_dimension_numbers<[1], [0], [0], [1], [0, 0, 1, 1], [], []>} : vector<1x16xf32>, vector<16x64xf32>, vector<1x64xf32> -> vector<1x64xf32>
    %370 = arith.addf %368, %369 : vector<1x64xf32>
    %371 = vector.extract_strided_slice %367 {offsets = [0, 64], sizes = [1, 64], strides = [1, 1]} : vector<1x128xf32> to vector<1x64xf32>
    %cst_92 = arith.constant dense<0.000000e+00> : vector<1x64xf32>
    %372 = tpu.matmul %360, %46, %cst_92 {dimension_numbers = #tpu.dot_dimension_numbers<[1], [0], [0], [1], [0, 0, 1, 1], [], []>} : vector<1x16xf32>, vector<16x64xf32>, vector<1x64xf32> -> vector<1x64xf32>
    %373 = arith.addf %371, %372 : vector<1x64xf32>
    %374 = vector.extract_strided_slice %370 {offsets = [0, 0], sizes = [1, 16], strides = [1, 1]} : vector<1x64xf32> to vector<1x16xf32>
    %375 = arith.negf %374 : vector<1x16xf32>
    %376 = math.exp %375 : vector<1x16xf32>
    %cst_93 = arith.constant 1.000000e+00 : f32
    %377 = vector.broadcast %cst_93 : f32 to vector<1x16xf32>
    %378 = arith.addf %377, %376 : vector<1x16xf32>
    %379 = arith.divf %377, %378 : vector<1x16xf32>
    %380 = vector.extract_strided_slice %370 {offsets = [0, 16], sizes = [1, 16], strides = [1, 1]} : vector<1x64xf32> to vector<1x16xf32>
    %381 = arith.negf %380 : vector<1x16xf32>
    %382 = math.exp %381 : vector<1x16xf32>
    %cst_94 = arith.constant 1.000000e+00 : f32
    %383 = vector.broadcast %cst_94 : f32 to vector<1x16xf32>
    %384 = arith.addf %383, %382 : vector<1x16xf32>
    %385 = arith.divf %383, %384 : vector<1x16xf32>
    %386 = vector.extract_strided_slice %370 {offsets = [0, 32], sizes = [1, 16], strides = [1, 1]} : vector<1x64xf32> to vector<1x16xf32>
    %387 = math.tanh %386 : vector<1x16xf32>
    %388 = vector.extract_strided_slice %370 {offsets = [0, 48], sizes = [1, 16], strides = [1, 1]} : vector<1x64xf32> to vector<1x16xf32>
    %389 = arith.negf %388 : vector<1x16xf32>
    %390 = math.exp %389 : vector<1x16xf32>
    %cst_95 = arith.constant 1.000000e+00 : f32
    %391 = vector.broadcast %cst_95 : f32 to vector<1x16xf32>
    %392 = arith.addf %391, %390 : vector<1x16xf32>
    %393 = arith.divf %391, %392 : vector<1x16xf32>
    %394 = arith.mulf %385, %333 : vector<1x16xf32>
    %395 = arith.mulf %379, %387 : vector<1x16xf32>
    %396 = arith.addf %394, %395 : vector<1x16xf32>
    %397 = math.tanh %396 : vector<1x16xf32>
    %398 = arith.mulf %393, %397 : vector<1x16xf32>
    %399 = vector.extract_strided_slice %373 {offsets = [0, 0], sizes = [1, 16], strides = [1, 1]} : vector<1x64xf32> to vector<1x16xf32>
    %400 = arith.negf %399 : vector<1x16xf32>
    %401 = math.exp %400 : vector<1x16xf32>
    %cst_96 = arith.constant 1.000000e+00 : f32
    %402 = vector.broadcast %cst_96 : f32 to vector<1x16xf32>
    %403 = arith.addf %402, %401 : vector<1x16xf32>
    %404 = arith.divf %402, %403 : vector<1x16xf32>
    %405 = vector.extract_strided_slice %373 {offsets = [0, 16], sizes = [1, 16], strides = [1, 1]} : vector<1x64xf32> to vector<1x16xf32>
    %406 = arith.negf %405 : vector<1x16xf32>
    %407 = math.exp %406 : vector<1x16xf32>
    %cst_97 = arith.constant 1.000000e+00 : f32
    %408 = vector.broadcast %cst_97 : f32 to vector<1x16xf32>
    %409 = arith.addf %408, %407 : vector<1x16xf32>
    %410 = arith.divf %408, %409 : vector<1x16xf32>
    %411 = vector.extract_strided_slice %373 {offsets = [0, 32], sizes = [1, 16], strides = [1, 1]} : vector<1x64xf32> to vector<1x16xf32>
    %412 = math.tanh %411 : vector<1x16xf32>
    %413 = vector.extract_strided_slice %373 {offsets = [0, 48], sizes = [1, 16], strides = [1, 1]} : vector<1x64xf32> to vector<1x16xf32>
    %414 = arith.negf %413 : vector<1x16xf32>
    %415 = math.exp %414 : vector<1x16xf32>
    %cst_98 = arith.constant 1.000000e+00 : f32
    %416 = vector.broadcast %cst_98 : f32 to vector<1x16xf32>
    %417 = arith.addf %416, %415 : vector<1x16xf32>
    %418 = arith.divf %416, %417 : vector<1x16xf32>
    %419 = arith.mulf %410, %358 : vector<1x16xf32>
    %420 = arith.mulf %404, %412 : vector<1x16xf32>
    %421 = arith.addf %419, %420 : vector<1x16xf32>
    %422 = math.tanh %421 : vector<1x16xf32>
    %423 = arith.mulf %418, %422 : vector<1x16xf32>
    %424 = arith.addf %361, %398 : vector<1x16xf32>
    %425 = arith.addf %362, %423 : vector<1x16xf32>
    %c6_i32 = arith.constant 6 : i32
    %c15_i32_99 = arith.constant 15 : i32
    %426 = arith.subi %c15_i32_99, %c6_i32 : i32
    %427 = arith.index_cast %c6_i32 : i32 to index
    %c0_100 = arith.constant 0 : index
    %428 = vector.load %arg20[%427, %c0_100] : memref<16x128xf32, #tpu.memory_space<vmem>>, vector<1x128xf32>
    %429 = arith.index_cast %426 : i32 to index
    %c0_101 = arith.constant 0 : index
    %430 = vector.load %arg20[%429, %c0_101] : memref<16x128xf32, #tpu.memory_space<vmem>>, vector<1x128xf32>
    %431 = vector.extract_strided_slice %428 {offsets = [0, 0], sizes = [1, 64], strides = [1, 1]} : vector<1x128xf32> to vector<1x64xf32>
    %cst_102 = arith.constant dense<0.000000e+00> : vector<1x64xf32>
    %432 = tpu.matmul %398, %45, %cst_102 {dimension_numbers = #tpu.dot_dimension_numbers<[1], [0], [0], [1], [0, 0, 1, 1], [], []>} : vector<1x16xf32>, vector<16x64xf32>, vector<1x64xf32> -> vector<1x64xf32>
    %433 = arith.addf %431, %432 : vector<1x64xf32>
    %434 = vector.extract_strided_slice %430 {offsets = [0, 64], sizes = [1, 64], strides = [1, 1]} : vector<1x128xf32> to vector<1x64xf32>
    %cst_103 = arith.constant dense<0.000000e+00> : vector<1x64xf32>
    %435 = tpu.matmul %423, %46, %cst_103 {dimension_numbers = #tpu.dot_dimension_numbers<[1], [0], [0], [1], [0, 0, 1, 1], [], []>} : vector<1x16xf32>, vector<16x64xf32>, vector<1x64xf32> -> vector<1x64xf32>
    %436 = arith.addf %434, %435 : vector<1x64xf32>
    %437 = vector.extract_strided_slice %433 {offsets = [0, 0], sizes = [1, 16], strides = [1, 1]} : vector<1x64xf32> to vector<1x16xf32>
    %438 = arith.negf %437 : vector<1x16xf32>
    %439 = math.exp %438 : vector<1x16xf32>
    %cst_104 = arith.constant 1.000000e+00 : f32
    %440 = vector.broadcast %cst_104 : f32 to vector<1x16xf32>
    %441 = arith.addf %440, %439 : vector<1x16xf32>
    %442 = arith.divf %440, %441 : vector<1x16xf32>
    %443 = vector.extract_strided_slice %433 {offsets = [0, 16], sizes = [1, 16], strides = [1, 1]} : vector<1x64xf32> to vector<1x16xf32>
    %444 = arith.negf %443 : vector<1x16xf32>
    %445 = math.exp %444 : vector<1x16xf32>
    %cst_105 = arith.constant 1.000000e+00 : f32
    %446 = vector.broadcast %cst_105 : f32 to vector<1x16xf32>
    %447 = arith.addf %446, %445 : vector<1x16xf32>
    %448 = arith.divf %446, %447 : vector<1x16xf32>
    %449 = vector.extract_strided_slice %433 {offsets = [0, 32], sizes = [1, 16], strides = [1, 1]} : vector<1x64xf32> to vector<1x16xf32>
    %450 = math.tanh %449 : vector<1x16xf32>
    %451 = vector.extract_strided_slice %433 {offsets = [0, 48], sizes = [1, 16], strides = [1, 1]} : vector<1x64xf32> to vector<1x16xf32>
    %452 = arith.negf %451 : vector<1x16xf32>
    %453 = math.exp %452 : vector<1x16xf32>
    %cst_106 = arith.constant 1.000000e+00 : f32
    %454 = vector.broadcast %cst_106 : f32 to vector<1x16xf32>
    %455 = arith.addf %454, %453 : vector<1x16xf32>
    %456 = arith.divf %454, %455 : vector<1x16xf32>
    %457 = arith.mulf %448, %396 : vector<1x16xf32>
    %458 = arith.mulf %442, %450 : vector<1x16xf32>
    %459 = arith.addf %457, %458 : vector<1x16xf32>
    %460 = math.tanh %459 : vector<1x16xf32>
    %461 = arith.mulf %456, %460 : vector<1x16xf32>
    %462 = vector.extract_strided_slice %436 {offsets = [0, 0], sizes = [1, 16], strides = [1, 1]} : vector<1x64xf32> to vector<1x16xf32>
    %463 = arith.negf %462 : vector<1x16xf32>
    %464 = math.exp %463 : vector<1x16xf32>
    %cst_107 = arith.constant 1.000000e+00 : f32
    %465 = vector.broadcast %cst_107 : f32 to vector<1x16xf32>
    %466 = arith.addf %465, %464 : vector<1x16xf32>
    %467 = arith.divf %465, %466 : vector<1x16xf32>
    %468 = vector.extract_strided_slice %436 {offsets = [0, 16], sizes = [1, 16], strides = [1, 1]} : vector<1x64xf32> to vector<1x16xf32>
    %469 = arith.negf %468 : vector<1x16xf32>
    %470 = math.exp %469 : vector<1x16xf32>
    %cst_108 = arith.constant 1.000000e+00 : f32
    %471 = vector.broadcast %cst_108 : f32 to vector<1x16xf32>
    %472 = arith.addf %471, %470 : vector<1x16xf32>
    %473 = arith.divf %471, %472 : vector<1x16xf32>
    %474 = vector.extract_strided_slice %436 {offsets = [0, 32], sizes = [1, 16], strides = [1, 1]} : vector<1x64xf32> to vector<1x16xf32>
    %475 = math.tanh %474 : vector<1x16xf32>
    %476 = vector.extract_strided_slice %436 {offsets = [0, 48], sizes = [1, 16], strides = [1, 1]} : vector<1x64xf32> to vector<1x16xf32>
    %477 = arith.negf %476 : vector<1x16xf32>
    %478 = math.exp %477 : vector<1x16xf32>
    %cst_109 = arith.constant 1.000000e+00 : f32
    %479 = vector.broadcast %cst_109 : f32 to vector<1x16xf32>
    %480 = arith.addf %479, %478 : vector<1x16xf32>
    %481 = arith.divf %479, %480 : vector<1x16xf32>
    %482 = arith.mulf %473, %421 : vector<1x16xf32>
    %483 = arith.mulf %467, %475 : vector<1x16xf32>
    %484 = arith.addf %482, %483 : vector<1x16xf32>
    %485 = math.tanh %484 : vector<1x16xf32>
    %486 = arith.mulf %481, %485 : vector<1x16xf32>
    %487 = arith.addf %424, %461 : vector<1x16xf32>
    %488 = arith.addf %425, %486 : vector<1x16xf32>
    %c7_i32 = arith.constant 7 : i32
    %c15_i32_110 = arith.constant 15 : i32
    %489 = arith.subi %c15_i32_110, %c7_i32 : i32
    %490 = arith.index_cast %c7_i32 : i32 to index
    %c0_111 = arith.constant 0 : index
    %491 = vector.load %arg20[%490, %c0_111] : memref<16x128xf32, #tpu.memory_space<vmem>>, vector<1x128xf32>
    %492 = arith.index_cast %489 : i32 to index
    %c0_112 = arith.constant 0 : index
    %493 = vector.load %arg20[%492, %c0_112] : memref<16x128xf32, #tpu.memory_space<vmem>>, vector<1x128xf32>
    %494 = vector.extract_strided_slice %491 {offsets = [0, 0], sizes = [1, 64], strides = [1, 1]} : vector<1x128xf32> to vector<1x64xf32>
    %cst_113 = arith.constant dense<0.000000e+00> : vector<1x64xf32>
    %495 = tpu.matmul %461, %45, %cst_113 {dimension_numbers = #tpu.dot_dimension_numbers<[1], [0], [0], [1], [0, 0, 1, 1], [], []>} : vector<1x16xf32>, vector<16x64xf32>, vector<1x64xf32> -> vector<1x64xf32>
    %496 = arith.addf %494, %495 : vector<1x64xf32>
    %497 = vector.extract_strided_slice %493 {offsets = [0, 64], sizes = [1, 64], strides = [1, 1]} : vector<1x128xf32> to vector<1x64xf32>
    %cst_114 = arith.constant dense<0.000000e+00> : vector<1x64xf32>
    %498 = tpu.matmul %486, %46, %cst_114 {dimension_numbers = #tpu.dot_dimension_numbers<[1], [0], [0], [1], [0, 0, 1, 1], [], []>} : vector<1x16xf32>, vector<16x64xf32>, vector<1x64xf32> -> vector<1x64xf32>
    %499 = arith.addf %497, %498 : vector<1x64xf32>
    %500 = vector.extract_strided_slice %496 {offsets = [0, 0], sizes = [1, 16], strides = [1, 1]} : vector<1x64xf32> to vector<1x16xf32>
    %501 = arith.negf %500 : vector<1x16xf32>
    %502 = math.exp %501 : vector<1x16xf32>
    %cst_115 = arith.constant 1.000000e+00 : f32
    %503 = vector.broadcast %cst_115 : f32 to vector<1x16xf32>
    %504 = arith.addf %503, %502 : vector<1x16xf32>
    %505 = arith.divf %503, %504 : vector<1x16xf32>
    %506 = vector.extract_strided_slice %496 {offsets = [0, 16], sizes = [1, 16], strides = [1, 1]} : vector<1x64xf32> to vector<1x16xf32>
    %507 = arith.negf %506 : vector<1x16xf32>
    %508 = math.exp %507 : vector<1x16xf32>
    %cst_116 = arith.constant 1.000000e+00 : f32
    %509 = vector.broadcast %cst_116 : f32 to vector<1x16xf32>
    %510 = arith.addf %509, %508 : vector<1x16xf32>
    %511 = arith.divf %509, %510 : vector<1x16xf32>
    %512 = vector.extract_strided_slice %496 {offsets = [0, 32], sizes = [1, 16], strides = [1, 1]} : vector<1x64xf32> to vector<1x16xf32>
    %513 = math.tanh %512 : vector<1x16xf32>
    %514 = vector.extract_strided_slice %496 {offsets = [0, 48], sizes = [1, 16], strides = [1, 1]} : vector<1x64xf32> to vector<1x16xf32>
    %515 = arith.negf %514 : vector<1x16xf32>
    %516 = math.exp %515 : vector<1x16xf32>
    %cst_117 = arith.constant 1.000000e+00 : f32
    %517 = vector.broadcast %cst_117 : f32 to vector<1x16xf32>
    %518 = arith.addf %517, %516 : vector<1x16xf32>
    %519 = arith.divf %517, %518 : vector<1x16xf32>
    %520 = arith.mulf %511, %459 : vector<1x16xf32>
    %521 = arith.mulf %505, %513 : vector<1x16xf32>
    %522 = arith.addf %520, %521 : vector<1x16xf32>
    %523 = math.tanh %522 : vector<1x16xf32>
    %524 = arith.mulf %519, %523 : vector<1x16xf32>
    %525 = vector.extract_strided_slice %499 {offsets = [0, 0], sizes = [1, 16], strides = [1, 1]} : vector<1x64xf32> to vector<1x16xf32>
    %526 = arith.negf %525 : vector<1x16xf32>
    %527 = math.exp %526 : vector<1x16xf32>
    %cst_118 = arith.constant 1.000000e+00 : f32
    %528 = vector.broadcast %cst_118 : f32 to vector<1x16xf32>
    %529 = arith.addf %528, %527 : vector<1x16xf32>
    %530 = arith.divf %528, %529 : vector<1x16xf32>
    %531 = vector.extract_strided_slice %499 {offsets = [0, 16], sizes = [1, 16], strides = [1, 1]} : vector<1x64xf32> to vector<1x16xf32>
    %532 = arith.negf %531 : vector<1x16xf32>
    %533 = math.exp %532 : vector<1x16xf32>
    %cst_119 = arith.constant 1.000000e+00 : f32
    %534 = vector.broadcast %cst_119 : f32 to vector<1x16xf32>
    %535 = arith.addf %534, %533 : vector<1x16xf32>
    %536 = arith.divf %534, %535 : vector<1x16xf32>
    %537 = vector.extract_strided_slice %499 {offsets = [0, 32], sizes = [1, 16], strides = [1, 1]} : vector<1x64xf32> to vector<1x16xf32>
    %538 = math.tanh %537 : vector<1x16xf32>
    %539 = vector.extract_strided_slice %499 {offsets = [0, 48], sizes = [1, 16], strides = [1, 1]} : vector<1x64xf32> to vector<1x16xf32>
    %540 = arith.negf %539 : vector<1x16xf32>
    %541 = math.exp %540 : vector<1x16xf32>
    %cst_120 = arith.constant 1.000000e+00 : f32
    %542 = vector.broadcast %cst_120 : f32 to vector<1x16xf32>
    %543 = arith.addf %542, %541 : vector<1x16xf32>
    %544 = arith.divf %542, %543 : vector<1x16xf32>
    %545 = arith.mulf %536, %484 : vector<1x16xf32>
    %546 = arith.mulf %530, %538 : vector<1x16xf32>
    %547 = arith.addf %545, %546 : vector<1x16xf32>
    %548 = math.tanh %547 : vector<1x16xf32>
    %549 = arith.mulf %544, %548 : vector<1x16xf32>
    %550 = arith.addf %487, %524 : vector<1x16xf32>
    %551 = arith.addf %488, %549 : vector<1x16xf32>
    %c8_i32 = arith.constant 8 : i32
    %c15_i32_121 = arith.constant 15 : i32
    %552 = arith.subi %c15_i32_121, %c8_i32 : i32
    %553 = arith.index_cast %c8_i32 : i32 to index
    %c0_122 = arith.constant 0 : index
    %554 = vector.load %arg20[%553, %c0_122] : memref<16x128xf32, #tpu.memory_space<vmem>>, vector<1x128xf32>
    %555 = arith.index_cast %552 : i32 to index
    %c0_123 = arith.constant 0 : index
    %556 = vector.load %arg20[%555, %c0_123] : memref<16x128xf32, #tpu.memory_space<vmem>>, vector<1x128xf32>
    %557 = vector.extract_strided_slice %554 {offsets = [0, 0], sizes = [1, 64], strides = [1, 1]} : vector<1x128xf32> to vector<1x64xf32>
    %cst_124 = arith.constant dense<0.000000e+00> : vector<1x64xf32>
    %558 = tpu.matmul %524, %45, %cst_124 {dimension_numbers = #tpu.dot_dimension_numbers<[1], [0], [0], [1], [0, 0, 1, 1], [], []>} : vector<1x16xf32>, vector<16x64xf32>, vector<1x64xf32> -> vector<1x64xf32>
    %559 = arith.addf %557, %558 : vector<1x64xf32>
    %560 = vector.extract_strided_slice %556 {offsets = [0, 64], sizes = [1, 64], strides = [1, 1]} : vector<1x128xf32> to vector<1x64xf32>
    %cst_125 = arith.constant dense<0.000000e+00> : vector<1x64xf32>
    %561 = tpu.matmul %549, %46, %cst_125 {dimension_numbers = #tpu.dot_dimension_numbers<[1], [0], [0], [1], [0, 0, 1, 1], [], []>} : vector<1x16xf32>, vector<16x64xf32>, vector<1x64xf32> -> vector<1x64xf32>
    %562 = arith.addf %560, %561 : vector<1x64xf32>
    %563 = vector.extract_strided_slice %559 {offsets = [0, 0], sizes = [1, 16], strides = [1, 1]} : vector<1x64xf32> to vector<1x16xf32>
    %564 = arith.negf %563 : vector<1x16xf32>
    %565 = math.exp %564 : vector<1x16xf32>
    %cst_126 = arith.constant 1.000000e+00 : f32
    %566 = vector.broadcast %cst_126 : f32 to vector<1x16xf32>
    %567 = arith.addf %566, %565 : vector<1x16xf32>
    %568 = arith.divf %566, %567 : vector<1x16xf32>
    %569 = vector.extract_strided_slice %559 {offsets = [0, 16], sizes = [1, 16], strides = [1, 1]} : vector<1x64xf32> to vector<1x16xf32>
    %570 = arith.negf %569 : vector<1x16xf32>
    %571 = math.exp %570 : vector<1x16xf32>
    %cst_127 = arith.constant 1.000000e+00 : f32
    %572 = vector.broadcast %cst_127 : f32 to vector<1x16xf32>
    %573 = arith.addf %572, %571 : vector<1x16xf32>
    %574 = arith.divf %572, %573 : vector<1x16xf32>
    %575 = vector.extract_strided_slice %559 {offsets = [0, 32], sizes = [1, 16], strides = [1, 1]} : vector<1x64xf32> to vector<1x16xf32>
    %576 = math.tanh %575 : vector<1x16xf32>
    %577 = vector.extract_strided_slice %559 {offsets = [0, 48], sizes = [1, 16], strides = [1, 1]} : vector<1x64xf32> to vector<1x16xf32>
    %578 = arith.negf %577 : vector<1x16xf32>
    %579 = math.exp %578 : vector<1x16xf32>
    %cst_128 = arith.constant 1.000000e+00 : f32
    %580 = vector.broadcast %cst_128 : f32 to vector<1x16xf32>
    %581 = arith.addf %580, %579 : vector<1x16xf32>
    %582 = arith.divf %580, %581 : vector<1x16xf32>
    %583 = arith.mulf %574, %522 : vector<1x16xf32>
    %584 = arith.mulf %568, %576 : vector<1x16xf32>
    %585 = arith.addf %583, %584 : vector<1x16xf32>
    %586 = math.tanh %585 : vector<1x16xf32>
    %587 = arith.mulf %582, %586 : vector<1x16xf32>
    %588 = vector.extract_strided_slice %562 {offsets = [0, 0], sizes = [1, 16], strides = [1, 1]} : vector<1x64xf32> to vector<1x16xf32>
    %589 = arith.negf %588 : vector<1x16xf32>
    %590 = math.exp %589 : vector<1x16xf32>
    %cst_129 = arith.constant 1.000000e+00 : f32
    %591 = vector.broadcast %cst_129 : f32 to vector<1x16xf32>
    %592 = arith.addf %591, %590 : vector<1x16xf32>
    %593 = arith.divf %591, %592 : vector<1x16xf32>
    %594 = vector.extract_strided_slice %562 {offsets = [0, 16], sizes = [1, 16], strides = [1, 1]} : vector<1x64xf32> to vector<1x16xf32>
    %595 = arith.negf %594 : vector<1x16xf32>
    %596 = math.exp %595 : vector<1x16xf32>
    %cst_130 = arith.constant 1.000000e+00 : f32
    %597 = vector.broadcast %cst_130 : f32 to vector<1x16xf32>
    %598 = arith.addf %597, %596 : vector<1x16xf32>
    %599 = arith.divf %597, %598 : vector<1x16xf32>
    %600 = vector.extract_strided_slice %562 {offsets = [0, 32], sizes = [1, 16], strides = [1, 1]} : vector<1x64xf32> to vector<1x16xf32>
    %601 = math.tanh %600 : vector<1x16xf32>
    %602 = vector.extract_strided_slice %562 {offsets = [0, 48], sizes = [1, 16], strides = [1, 1]} : vector<1x64xf32> to vector<1x16xf32>
    %603 = arith.negf %602 : vector<1x16xf32>
    %604 = math.exp %603 : vector<1x16xf32>
    %cst_131 = arith.constant 1.000000e+00 : f32
    %605 = vector.broadcast %cst_131 : f32 to vector<1x16xf32>
    %606 = arith.addf %605, %604 : vector<1x16xf32>
    %607 = arith.divf %605, %606 : vector<1x16xf32>
    %608 = arith.mulf %599, %547 : vector<1x16xf32>
    %609 = arith.mulf %593, %601 : vector<1x16xf32>
    %610 = arith.addf %608, %609 : vector<1x16xf32>
    %611 = math.tanh %610 : vector<1x16xf32>
    %612 = arith.mulf %607, %611 : vector<1x16xf32>
    %613 = arith.addf %550, %587 : vector<1x16xf32>
    %614 = arith.addf %551, %612 : vector<1x16xf32>
    %c9_i32 = arith.constant 9 : i32
    %c15_i32_132 = arith.constant 15 : i32
    %615 = arith.subi %c15_i32_132, %c9_i32 : i32
    %616 = arith.index_cast %c9_i32 : i32 to index
    %c0_133 = arith.constant 0 : index
    %617 = vector.load %arg20[%616, %c0_133] : memref<16x128xf32, #tpu.memory_space<vmem>>, vector<1x128xf32>
    %618 = arith.index_cast %615 : i32 to index
    %c0_134 = arith.constant 0 : index
    %619 = vector.load %arg20[%618, %c0_134] : memref<16x128xf32, #tpu.memory_space<vmem>>, vector<1x128xf32>
    %620 = vector.extract_strided_slice %617 {offsets = [0, 0], sizes = [1, 64], strides = [1, 1]} : vector<1x128xf32> to vector<1x64xf32>
    %cst_135 = arith.constant dense<0.000000e+00> : vector<1x64xf32>
    %621 = tpu.matmul %587, %45, %cst_135 {dimension_numbers = #tpu.dot_dimension_numbers<[1], [0], [0], [1], [0, 0, 1, 1], [], []>} : vector<1x16xf32>, vector<16x64xf32>, vector<1x64xf32> -> vector<1x64xf32>
    %622 = arith.addf %620, %621 : vector<1x64xf32>
    %623 = vector.extract_strided_slice %619 {offsets = [0, 64], sizes = [1, 64], strides = [1, 1]} : vector<1x128xf32> to vector<1x64xf32>
    %cst_136 = arith.constant dense<0.000000e+00> : vector<1x64xf32>
    %624 = tpu.matmul %612, %46, %cst_136 {dimension_numbers = #tpu.dot_dimension_numbers<[1], [0], [0], [1], [0, 0, 1, 1], [], []>} : vector<1x16xf32>, vector<16x64xf32>, vector<1x64xf32> -> vector<1x64xf32>
    %625 = arith.addf %623, %624 : vector<1x64xf32>
    %626 = vector.extract_strided_slice %622 {offsets = [0, 0], sizes = [1, 16], strides = [1, 1]} : vector<1x64xf32> to vector<1x16xf32>
    %627 = arith.negf %626 : vector<1x16xf32>
    %628 = math.exp %627 : vector<1x16xf32>
    %cst_137 = arith.constant 1.000000e+00 : f32
    %629 = vector.broadcast %cst_137 : f32 to vector<1x16xf32>
    %630 = arith.addf %629, %628 : vector<1x16xf32>
    %631 = arith.divf %629, %630 : vector<1x16xf32>
    %632 = vector.extract_strided_slice %622 {offsets = [0, 16], sizes = [1, 16], strides = [1, 1]} : vector<1x64xf32> to vector<1x16xf32>
    %633 = arith.negf %632 : vector<1x16xf32>
    %634 = math.exp %633 : vector<1x16xf32>
    %cst_138 = arith.constant 1.000000e+00 : f32
    %635 = vector.broadcast %cst_138 : f32 to vector<1x16xf32>
    %636 = arith.addf %635, %634 : vector<1x16xf32>
    %637 = arith.divf %635, %636 : vector<1x16xf32>
    %638 = vector.extract_strided_slice %622 {offsets = [0, 32], sizes = [1, 16], strides = [1, 1]} : vector<1x64xf32> to vector<1x16xf32>
    %639 = math.tanh %638 : vector<1x16xf32>
    %640 = vector.extract_strided_slice %622 {offsets = [0, 48], sizes = [1, 16], strides = [1, 1]} : vector<1x64xf32> to vector<1x16xf32>
    %641 = arith.negf %640 : vector<1x16xf32>
    %642 = math.exp %641 : vector<1x16xf32>
    %cst_139 = arith.constant 1.000000e+00 : f32
    %643 = vector.broadcast %cst_139 : f32 to vector<1x16xf32>
    %644 = arith.addf %643, %642 : vector<1x16xf32>
    %645 = arith.divf %643, %644 : vector<1x16xf32>
    %646 = arith.mulf %637, %585 : vector<1x16xf32>
    %647 = arith.mulf %631, %639 : vector<1x16xf32>
    %648 = arith.addf %646, %647 : vector<1x16xf32>
    %649 = math.tanh %648 : vector<1x16xf32>
    %650 = arith.mulf %645, %649 : vector<1x16xf32>
    %651 = vector.extract_strided_slice %625 {offsets = [0, 0], sizes = [1, 16], strides = [1, 1]} : vector<1x64xf32> to vector<1x16xf32>
    %652 = arith.negf %651 : vector<1x16xf32>
    %653 = math.exp %652 : vector<1x16xf32>
    %cst_140 = arith.constant 1.000000e+00 : f32
    %654 = vector.broadcast %cst_140 : f32 to vector<1x16xf32>
    %655 = arith.addf %654, %653 : vector<1x16xf32>
    %656 = arith.divf %654, %655 : vector<1x16xf32>
    %657 = vector.extract_strided_slice %625 {offsets = [0, 16], sizes = [1, 16], strides = [1, 1]} : vector<1x64xf32> to vector<1x16xf32>
    %658 = arith.negf %657 : vector<1x16xf32>
    %659 = math.exp %658 : vector<1x16xf32>
    %cst_141 = arith.constant 1.000000e+00 : f32
    %660 = vector.broadcast %cst_141 : f32 to vector<1x16xf32>
    %661 = arith.addf %660, %659 : vector<1x16xf32>
    %662 = arith.divf %660, %661 : vector<1x16xf32>
    %663 = vector.extract_strided_slice %625 {offsets = [0, 32], sizes = [1, 16], strides = [1, 1]} : vector<1x64xf32> to vector<1x16xf32>
    %664 = math.tanh %663 : vector<1x16xf32>
    %665 = vector.extract_strided_slice %625 {offsets = [0, 48], sizes = [1, 16], strides = [1, 1]} : vector<1x64xf32> to vector<1x16xf32>
    %666 = arith.negf %665 : vector<1x16xf32>
    %667 = math.exp %666 : vector<1x16xf32>
    %cst_142 = arith.constant 1.000000e+00 : f32
    %668 = vector.broadcast %cst_142 : f32 to vector<1x16xf32>
    %669 = arith.addf %668, %667 : vector<1x16xf32>
    %670 = arith.divf %668, %669 : vector<1x16xf32>
    %671 = arith.mulf %662, %610 : vector<1x16xf32>
    %672 = arith.mulf %656, %664 : vector<1x16xf32>
    %673 = arith.addf %671, %672 : vector<1x16xf32>
    %674 = math.tanh %673 : vector<1x16xf32>
    %675 = arith.mulf %670, %674 : vector<1x16xf32>
    %676 = arith.addf %613, %650 : vector<1x16xf32>
    %677 = arith.addf %614, %675 : vector<1x16xf32>
    %c10_i32 = arith.constant 10 : i32
    %c15_i32_143 = arith.constant 15 : i32
    %678 = arith.subi %c15_i32_143, %c10_i32 : i32
    %679 = arith.index_cast %c10_i32 : i32 to index
    %c0_144 = arith.constant 0 : index
    %680 = vector.load %arg20[%679, %c0_144] : memref<16x128xf32, #tpu.memory_space<vmem>>, vector<1x128xf32>
    %681 = arith.index_cast %678 : i32 to index
    %c0_145 = arith.constant 0 : index
    %682 = vector.load %arg20[%681, %c0_145] : memref<16x128xf32, #tpu.memory_space<vmem>>, vector<1x128xf32>
    %683 = vector.extract_strided_slice %680 {offsets = [0, 0], sizes = [1, 64], strides = [1, 1]} : vector<1x128xf32> to vector<1x64xf32>
    %cst_146 = arith.constant dense<0.000000e+00> : vector<1x64xf32>
    %684 = tpu.matmul %650, %45, %cst_146 {dimension_numbers = #tpu.dot_dimension_numbers<[1], [0], [0], [1], [0, 0, 1, 1], [], []>} : vector<1x16xf32>, vector<16x64xf32>, vector<1x64xf32> -> vector<1x64xf32>
    %685 = arith.addf %683, %684 : vector<1x64xf32>
    %686 = vector.extract_strided_slice %682 {offsets = [0, 64], sizes = [1, 64], strides = [1, 1]} : vector<1x128xf32> to vector<1x64xf32>
    %cst_147 = arith.constant dense<0.000000e+00> : vector<1x64xf32>
    %687 = tpu.matmul %675, %46, %cst_147 {dimension_numbers = #tpu.dot_dimension_numbers<[1], [0], [0], [1], [0, 0, 1, 1], [], []>} : vector<1x16xf32>, vector<16x64xf32>, vector<1x64xf32> -> vector<1x64xf32>
    %688 = arith.addf %686, %687 : vector<1x64xf32>
    %689 = vector.extract_strided_slice %685 {offsets = [0, 0], sizes = [1, 16], strides = [1, 1]} : vector<1x64xf32> to vector<1x16xf32>
    %690 = arith.negf %689 : vector<1x16xf32>
    %691 = math.exp %690 : vector<1x16xf32>
    %cst_148 = arith.constant 1.000000e+00 : f32
    %692 = vector.broadcast %cst_148 : f32 to vector<1x16xf32>
    %693 = arith.addf %692, %691 : vector<1x16xf32>
    %694 = arith.divf %692, %693 : vector<1x16xf32>
    %695 = vector.extract_strided_slice %685 {offsets = [0, 16], sizes = [1, 16], strides = [1, 1]} : vector<1x64xf32> to vector<1x16xf32>
    %696 = arith.negf %695 : vector<1x16xf32>
    %697 = math.exp %696 : vector<1x16xf32>
    %cst_149 = arith.constant 1.000000e+00 : f32
    %698 = vector.broadcast %cst_149 : f32 to vector<1x16xf32>
    %699 = arith.addf %698, %697 : vector<1x16xf32>
    %700 = arith.divf %698, %699 : vector<1x16xf32>
    %701 = vector.extract_strided_slice %685 {offsets = [0, 32], sizes = [1, 16], strides = [1, 1]} : vector<1x64xf32> to vector<1x16xf32>
    %702 = math.tanh %701 : vector<1x16xf32>
    %703 = vector.extract_strided_slice %685 {offsets = [0, 48], sizes = [1, 16], strides = [1, 1]} : vector<1x64xf32> to vector<1x16xf32>
    %704 = arith.negf %703 : vector<1x16xf32>
    %705 = math.exp %704 : vector<1x16xf32>
    %cst_150 = arith.constant 1.000000e+00 : f32
    %706 = vector.broadcast %cst_150 : f32 to vector<1x16xf32>
    %707 = arith.addf %706, %705 : vector<1x16xf32>
    %708 = arith.divf %706, %707 : vector<1x16xf32>
    %709 = arith.mulf %700, %648 : vector<1x16xf32>
    %710 = arith.mulf %694, %702 : vector<1x16xf32>
    %711 = arith.addf %709, %710 : vector<1x16xf32>
    %712 = math.tanh %711 : vector<1x16xf32>
    %713 = arith.mulf %708, %712 : vector<1x16xf32>
    %714 = vector.extract_strided_slice %688 {offsets = [0, 0], sizes = [1, 16], strides = [1, 1]} : vector<1x64xf32> to vector<1x16xf32>
    %715 = arith.negf %714 : vector<1x16xf32>
    %716 = math.exp %715 : vector<1x16xf32>
    %cst_151 = arith.constant 1.000000e+00 : f32
    %717 = vector.broadcast %cst_151 : f32 to vector<1x16xf32>
    %718 = arith.addf %717, %716 : vector<1x16xf32>
    %719 = arith.divf %717, %718 : vector<1x16xf32>
    %720 = vector.extract_strided_slice %688 {offsets = [0, 16], sizes = [1, 16], strides = [1, 1]} : vector<1x64xf32> to vector<1x16xf32>
    %721 = arith.negf %720 : vector<1x16xf32>
    %722 = math.exp %721 : vector<1x16xf32>
    %cst_152 = arith.constant 1.000000e+00 : f32
    %723 = vector.broadcast %cst_152 : f32 to vector<1x16xf32>
    %724 = arith.addf %723, %722 : vector<1x16xf32>
    %725 = arith.divf %723, %724 : vector<1x16xf32>
    %726 = vector.extract_strided_slice %688 {offsets = [0, 32], sizes = [1, 16], strides = [1, 1]} : vector<1x64xf32> to vector<1x16xf32>
    %727 = math.tanh %726 : vector<1x16xf32>
    %728 = vector.extract_strided_slice %688 {offsets = [0, 48], sizes = [1, 16], strides = [1, 1]} : vector<1x64xf32> to vector<1x16xf32>
    %729 = arith.negf %728 : vector<1x16xf32>
    %730 = math.exp %729 : vector<1x16xf32>
    %cst_153 = arith.constant 1.000000e+00 : f32
    %731 = vector.broadcast %cst_153 : f32 to vector<1x16xf32>
    %732 = arith.addf %731, %730 : vector<1x16xf32>
    %733 = arith.divf %731, %732 : vector<1x16xf32>
    %734 = arith.mulf %725, %673 : vector<1x16xf32>
    %735 = arith.mulf %719, %727 : vector<1x16xf32>
    %736 = arith.addf %734, %735 : vector<1x16xf32>
    %737 = math.tanh %736 : vector<1x16xf32>
    %738 = arith.mulf %733, %737 : vector<1x16xf32>
    %739 = arith.addf %676, %713 : vector<1x16xf32>
    %740 = arith.addf %677, %738 : vector<1x16xf32>
    %c11_i32 = arith.constant 11 : i32
    %c15_i32_154 = arith.constant 15 : i32
    %741 = arith.subi %c15_i32_154, %c11_i32 : i32
    %742 = arith.index_cast %c11_i32 : i32 to index
    %c0_155 = arith.constant 0 : index
    %743 = vector.load %arg20[%742, %c0_155] : memref<16x128xf32, #tpu.memory_space<vmem>>, vector<1x128xf32>
    %744 = arith.index_cast %741 : i32 to index
    %c0_156 = arith.constant 0 : index
    %745 = vector.load %arg20[%744, %c0_156] : memref<16x128xf32, #tpu.memory_space<vmem>>, vector<1x128xf32>
    %746 = vector.extract_strided_slice %743 {offsets = [0, 0], sizes = [1, 64], strides = [1, 1]} : vector<1x128xf32> to vector<1x64xf32>
    %cst_157 = arith.constant dense<0.000000e+00> : vector<1x64xf32>
    %747 = tpu.matmul %713, %45, %cst_157 {dimension_numbers = #tpu.dot_dimension_numbers<[1], [0], [0], [1], [0, 0, 1, 1], [], []>} : vector<1x16xf32>, vector<16x64xf32>, vector<1x64xf32> -> vector<1x64xf32>
    %748 = arith.addf %746, %747 : vector<1x64xf32>
    %749 = vector.extract_strided_slice %745 {offsets = [0, 64], sizes = [1, 64], strides = [1, 1]} : vector<1x128xf32> to vector<1x64xf32>
    %cst_158 = arith.constant dense<0.000000e+00> : vector<1x64xf32>
    %750 = tpu.matmul %738, %46, %cst_158 {dimension_numbers = #tpu.dot_dimension_numbers<[1], [0], [0], [1], [0, 0, 1, 1], [], []>} : vector<1x16xf32>, vector<16x64xf32>, vector<1x64xf32> -> vector<1x64xf32>
    %751 = arith.addf %749, %750 : vector<1x64xf32>
    %752 = vector.extract_strided_slice %748 {offsets = [0, 0], sizes = [1, 16], strides = [1, 1]} : vector<1x64xf32> to vector<1x16xf32>
    %753 = arith.negf %752 : vector<1x16xf32>
    %754 = math.exp %753 : vector<1x16xf32>
    %cst_159 = arith.constant 1.000000e+00 : f32
    %755 = vector.broadcast %cst_159 : f32 to vector<1x16xf32>
    %756 = arith.addf %755, %754 : vector<1x16xf32>
    %757 = arith.divf %755, %756 : vector<1x16xf32>
    %758 = vector.extract_strided_slice %748 {offsets = [0, 16], sizes = [1, 16], strides = [1, 1]} : vector<1x64xf32> to vector<1x16xf32>
    %759 = arith.negf %758 : vector<1x16xf32>
    %760 = math.exp %759 : vector<1x16xf32>
    %cst_160 = arith.constant 1.000000e+00 : f32
    %761 = vector.broadcast %cst_160 : f32 to vector<1x16xf32>
    %762 = arith.addf %761, %760 : vector<1x16xf32>
    %763 = arith.divf %761, %762 : vector<1x16xf32>
    %764 = vector.extract_strided_slice %748 {offsets = [0, 32], sizes = [1, 16], strides = [1, 1]} : vector<1x64xf32> to vector<1x16xf32>
    %765 = math.tanh %764 : vector<1x16xf32>
    %766 = vector.extract_strided_slice %748 {offsets = [0, 48], sizes = [1, 16], strides = [1, 1]} : vector<1x64xf32> to vector<1x16xf32>
    %767 = arith.negf %766 : vector<1x16xf32>
    %768 = math.exp %767 : vector<1x16xf32>
    %cst_161 = arith.constant 1.000000e+00 : f32
    %769 = vector.broadcast %cst_161 : f32 to vector<1x16xf32>
    %770 = arith.addf %769, %768 : vector<1x16xf32>
    %771 = arith.divf %769, %770 : vector<1x16xf32>
    %772 = arith.mulf %763, %711 : vector<1x16xf32>
    %773 = arith.mulf %757, %765 : vector<1x16xf32>
    %774 = arith.addf %772, %773 : vector<1x16xf32>
    %775 = math.tanh %774 : vector<1x16xf32>
    %776 = arith.mulf %771, %775 : vector<1x16xf32>
    %777 = vector.extract_strided_slice %751 {offsets = [0, 0], sizes = [1, 16], strides = [1, 1]} : vector<1x64xf32> to vector<1x16xf32>
    %778 = arith.negf %777 : vector<1x16xf32>
    %779 = math.exp %778 : vector<1x16xf32>
    %cst_162 = arith.constant 1.000000e+00 : f32
    %780 = vector.broadcast %cst_162 : f32 to vector<1x16xf32>
    %781 = arith.addf %780, %779 : vector<1x16xf32>
    %782 = arith.divf %780, %781 : vector<1x16xf32>
    %783 = vector.extract_strided_slice %751 {offsets = [0, 16], sizes = [1, 16], strides = [1, 1]} : vector<1x64xf32> to vector<1x16xf32>
    %784 = arith.negf %783 : vector<1x16xf32>
    %785 = math.exp %784 : vector<1x16xf32>
    %cst_163 = arith.constant 1.000000e+00 : f32
    %786 = vector.broadcast %cst_163 : f32 to vector<1x16xf32>
    %787 = arith.addf %786, %785 : vector<1x16xf32>
    %788 = arith.divf %786, %787 : vector<1x16xf32>
    %789 = vector.extract_strided_slice %751 {offsets = [0, 32], sizes = [1, 16], strides = [1, 1]} : vector<1x64xf32> to vector<1x16xf32>
    %790 = math.tanh %789 : vector<1x16xf32>
    %791 = vector.extract_strided_slice %751 {offsets = [0, 48], sizes = [1, 16], strides = [1, 1]} : vector<1x64xf32> to vector<1x16xf32>
    %792 = arith.negf %791 : vector<1x16xf32>
    %793 = math.exp %792 : vector<1x16xf32>
    %cst_164 = arith.constant 1.000000e+00 : f32
    %794 = vector.broadcast %cst_164 : f32 to vector<1x16xf32>
    %795 = arith.addf %794, %793 : vector<1x16xf32>
    %796 = arith.divf %794, %795 : vector<1x16xf32>
    %797 = arith.mulf %788, %736 : vector<1x16xf32>
    %798 = arith.mulf %782, %790 : vector<1x16xf32>
    %799 = arith.addf %797, %798 : vector<1x16xf32>
    %800 = math.tanh %799 : vector<1x16xf32>
    %801 = arith.mulf %796, %800 : vector<1x16xf32>
    %802 = arith.addf %739, %776 : vector<1x16xf32>
    %803 = arith.addf %740, %801 : vector<1x16xf32>
    %c12_i32 = arith.constant 12 : i32
    %c15_i32_165 = arith.constant 15 : i32
    %804 = arith.subi %c15_i32_165, %c12_i32 : i32
    %805 = arith.index_cast %c12_i32 : i32 to index
    %c0_166 = arith.constant 0 : index
    %806 = vector.load %arg20[%805, %c0_166] : memref<16x128xf32, #tpu.memory_space<vmem>>, vector<1x128xf32>
    %807 = arith.index_cast %804 : i32 to index
    %c0_167 = arith.constant 0 : index
    %808 = vector.load %arg20[%807, %c0_167] : memref<16x128xf32, #tpu.memory_space<vmem>>, vector<1x128xf32>
    %809 = vector.extract_strided_slice %806 {offsets = [0, 0], sizes = [1, 64], strides = [1, 1]} : vector<1x128xf32> to vector<1x64xf32>
    %cst_168 = arith.constant dense<0.000000e+00> : vector<1x64xf32>
    %810 = tpu.matmul %776, %45, %cst_168 {dimension_numbers = #tpu.dot_dimension_numbers<[1], [0], [0], [1], [0, 0, 1, 1], [], []>} : vector<1x16xf32>, vector<16x64xf32>, vector<1x64xf32> -> vector<1x64xf32>
    %811 = arith.addf %809, %810 : vector<1x64xf32>
    %812 = vector.extract_strided_slice %808 {offsets = [0, 64], sizes = [1, 64], strides = [1, 1]} : vector<1x128xf32> to vector<1x64xf32>
    %cst_169 = arith.constant dense<0.000000e+00> : vector<1x64xf32>
    %813 = tpu.matmul %801, %46, %cst_169 {dimension_numbers = #tpu.dot_dimension_numbers<[1], [0], [0], [1], [0, 0, 1, 1], [], []>} : vector<1x16xf32>, vector<16x64xf32>, vector<1x64xf32> -> vector<1x64xf32>
    %814 = arith.addf %812, %813 : vector<1x64xf32>
    %815 = vector.extract_strided_slice %811 {offsets = [0, 0], sizes = [1, 16], strides = [1, 1]} : vector<1x64xf32> to vector<1x16xf32>
    %816 = arith.negf %815 : vector<1x16xf32>
    %817 = math.exp %816 : vector<1x16xf32>
    %cst_170 = arith.constant 1.000000e+00 : f32
    %818 = vector.broadcast %cst_170 : f32 to vector<1x16xf32>
    %819 = arith.addf %818, %817 : vector<1x16xf32>
    %820 = arith.divf %818, %819 : vector<1x16xf32>
    %821 = vector.extract_strided_slice %811 {offsets = [0, 16], sizes = [1, 16], strides = [1, 1]} : vector<1x64xf32> to vector<1x16xf32>
    %822 = arith.negf %821 : vector<1x16xf32>
    %823 = math.exp %822 : vector<1x16xf32>
    %cst_171 = arith.constant 1.000000e+00 : f32
    %824 = vector.broadcast %cst_171 : f32 to vector<1x16xf32>
    %825 = arith.addf %824, %823 : vector<1x16xf32>
    %826 = arith.divf %824, %825 : vector<1x16xf32>
    %827 = vector.extract_strided_slice %811 {offsets = [0, 32], sizes = [1, 16], strides = [1, 1]} : vector<1x64xf32> to vector<1x16xf32>
    %828 = math.tanh %827 : vector<1x16xf32>
    %829 = vector.extract_strided_slice %811 {offsets = [0, 48], sizes = [1, 16], strides = [1, 1]} : vector<1x64xf32> to vector<1x16xf32>
    %830 = arith.negf %829 : vector<1x16xf32>
    %831 = math.exp %830 : vector<1x16xf32>
    %cst_172 = arith.constant 1.000000e+00 : f32
    %832 = vector.broadcast %cst_172 : f32 to vector<1x16xf32>
    %833 = arith.addf %832, %831 : vector<1x16xf32>
    %834 = arith.divf %832, %833 : vector<1x16xf32>
    %835 = arith.mulf %826, %774 : vector<1x16xf32>
    %836 = arith.mulf %820, %828 : vector<1x16xf32>
    %837 = arith.addf %835, %836 : vector<1x16xf32>
    %838 = math.tanh %837 : vector<1x16xf32>
    %839 = arith.mulf %834, %838 : vector<1x16xf32>
    %840 = vector.extract_strided_slice %814 {offsets = [0, 0], sizes = [1, 16], strides = [1, 1]} : vector<1x64xf32> to vector<1x16xf32>
    %841 = arith.negf %840 : vector<1x16xf32>
    %842 = math.exp %841 : vector<1x16xf32>
    %cst_173 = arith.constant 1.000000e+00 : f32
    %843 = vector.broadcast %cst_173 : f32 to vector<1x16xf32>
    %844 = arith.addf %843, %842 : vector<1x16xf32>
    %845 = arith.divf %843, %844 : vector<1x16xf32>
    %846 = vector.extract_strided_slice %814 {offsets = [0, 16], sizes = [1, 16], strides = [1, 1]} : vector<1x64xf32> to vector<1x16xf32>
    %847 = arith.negf %846 : vector<1x16xf32>
    %848 = math.exp %847 : vector<1x16xf32>
    %cst_174 = arith.constant 1.000000e+00 : f32
    %849 = vector.broadcast %cst_174 : f32 to vector<1x16xf32>
    %850 = arith.addf %849, %848 : vector<1x16xf32>
    %851 = arith.divf %849, %850 : vector<1x16xf32>
    %852 = vector.extract_strided_slice %814 {offsets = [0, 32], sizes = [1, 16], strides = [1, 1]} : vector<1x64xf32> to vector<1x16xf32>
    %853 = math.tanh %852 : vector<1x16xf32>
    %854 = vector.extract_strided_slice %814 {offsets = [0, 48], sizes = [1, 16], strides = [1, 1]} : vector<1x64xf32> to vector<1x16xf32>
    %855 = arith.negf %854 : vector<1x16xf32>
    %856 = math.exp %855 : vector<1x16xf32>
    %cst_175 = arith.constant 1.000000e+00 : f32
    %857 = vector.broadcast %cst_175 : f32 to vector<1x16xf32>
    %858 = arith.addf %857, %856 : vector<1x16xf32>
    %859 = arith.divf %857, %858 : vector<1x16xf32>
    %860 = arith.mulf %851, %799 : vector<1x16xf32>
    %861 = arith.mulf %845, %853 : vector<1x16xf32>
    %862 = arith.addf %860, %861 : vector<1x16xf32>
    %863 = math.tanh %862 : vector<1x16xf32>
    %864 = arith.mulf %859, %863 : vector<1x16xf32>
    %865 = arith.addf %802, %839 : vector<1x16xf32>
    %866 = arith.addf %803, %864 : vector<1x16xf32>
    %c13_i32 = arith.constant 13 : i32
    %c15_i32_176 = arith.constant 15 : i32
    %867 = arith.subi %c15_i32_176, %c13_i32 : i32
    %868 = arith.index_cast %c13_i32 : i32 to index
    %c0_177 = arith.constant 0 : index
    %869 = vector.load %arg20[%868, %c0_177] : memref<16x128xf32, #tpu.memory_space<vmem>>, vector<1x128xf32>
    %870 = arith.index_cast %867 : i32 to index
    %c0_178 = arith.constant 0 : index
    %871 = vector.load %arg20[%870, %c0_178] : memref<16x128xf32, #tpu.memory_space<vmem>>, vector<1x128xf32>
    %872 = vector.extract_strided_slice %869 {offsets = [0, 0], sizes = [1, 64], strides = [1, 1]} : vector<1x128xf32> to vector<1x64xf32>
    %cst_179 = arith.constant dense<0.000000e+00> : vector<1x64xf32>
    %873 = tpu.matmul %839, %45, %cst_179 {dimension_numbers = #tpu.dot_dimension_numbers<[1], [0], [0], [1], [0, 0, 1, 1], [], []>} : vector<1x16xf32>, vector<16x64xf32>, vector<1x64xf32> -> vector<1x64xf32>
    %874 = arith.addf %872, %873 : vector<1x64xf32>
    %875 = vector.extract_strided_slice %871 {offsets = [0, 64], sizes = [1, 64], strides = [1, 1]} : vector<1x128xf32> to vector<1x64xf32>
    %cst_180 = arith.constant dense<0.000000e+00> : vector<1x64xf32>
    %876 = tpu.matmul %864, %46, %cst_180 {dimension_numbers = #tpu.dot_dimension_numbers<[1], [0], [0], [1], [0, 0, 1, 1], [], []>} : vector<1x16xf32>, vector<16x64xf32>, vector<1x64xf32> -> vector<1x64xf32>
    %877 = arith.addf %875, %876 : vector<1x64xf32>
    %878 = vector.extract_strided_slice %874 {offsets = [0, 0], sizes = [1, 16], strides = [1, 1]} : vector<1x64xf32> to vector<1x16xf32>
    %879 = arith.negf %878 : vector<1x16xf32>
    %880 = math.exp %879 : vector<1x16xf32>
    %cst_181 = arith.constant 1.000000e+00 : f32
    %881 = vector.broadcast %cst_181 : f32 to vector<1x16xf32>
    %882 = arith.addf %881, %880 : vector<1x16xf32>
    %883 = arith.divf %881, %882 : vector<1x16xf32>
    %884 = vector.extract_strided_slice %874 {offsets = [0, 16], sizes = [1, 16], strides = [1, 1]} : vector<1x64xf32> to vector<1x16xf32>
    %885 = arith.negf %884 : vector<1x16xf32>
    %886 = math.exp %885 : vector<1x16xf32>
    %cst_182 = arith.constant 1.000000e+00 : f32
    %887 = vector.broadcast %cst_182 : f32 to vector<1x16xf32>
    %888 = arith.addf %887, %886 : vector<1x16xf32>
    %889 = arith.divf %887, %888 : vector<1x16xf32>
    %890 = vector.extract_strided_slice %874 {offsets = [0, 32], sizes = [1, 16], strides = [1, 1]} : vector<1x64xf32> to vector<1x16xf32>
    %891 = math.tanh %890 : vector<1x16xf32>
    %892 = vector.extract_strided_slice %874 {offsets = [0, 48], sizes = [1, 16], strides = [1, 1]} : vector<1x64xf32> to vector<1x16xf32>
    %893 = arith.negf %892 : vector<1x16xf32>
    %894 = math.exp %893 : vector<1x16xf32>
    %cst_183 = arith.constant 1.000000e+00 : f32
    %895 = vector.broadcast %cst_183 : f32 to vector<1x16xf32>
    %896 = arith.addf %895, %894 : vector<1x16xf32>
    %897 = arith.divf %895, %896 : vector<1x16xf32>
    %898 = arith.mulf %889, %837 : vector<1x16xf32>
    %899 = arith.mulf %883, %891 : vector<1x16xf32>
    %900 = arith.addf %898, %899 : vector<1x16xf32>
    %901 = math.tanh %900 : vector<1x16xf32>
    %902 = arith.mulf %897, %901 : vector<1x16xf32>
    %903 = vector.extract_strided_slice %877 {offsets = [0, 0], sizes = [1, 16], strides = [1, 1]} : vector<1x64xf32> to vector<1x16xf32>
    %904 = arith.negf %903 : vector<1x16xf32>
    %905 = math.exp %904 : vector<1x16xf32>
    %cst_184 = arith.constant 1.000000e+00 : f32
    %906 = vector.broadcast %cst_184 : f32 to vector<1x16xf32>
    %907 = arith.addf %906, %905 : vector<1x16xf32>
    %908 = arith.divf %906, %907 : vector<1x16xf32>
    %909 = vector.extract_strided_slice %877 {offsets = [0, 16], sizes = [1, 16], strides = [1, 1]} : vector<1x64xf32> to vector<1x16xf32>
    %910 = arith.negf %909 : vector<1x16xf32>
    %911 = math.exp %910 : vector<1x16xf32>
    %cst_185 = arith.constant 1.000000e+00 : f32
    %912 = vector.broadcast %cst_185 : f32 to vector<1x16xf32>
    %913 = arith.addf %912, %911 : vector<1x16xf32>
    %914 = arith.divf %912, %913 : vector<1x16xf32>
    %915 = vector.extract_strided_slice %877 {offsets = [0, 32], sizes = [1, 16], strides = [1, 1]} : vector<1x64xf32> to vector<1x16xf32>
    %916 = math.tanh %915 : vector<1x16xf32>
    %917 = vector.extract_strided_slice %877 {offsets = [0, 48], sizes = [1, 16], strides = [1, 1]} : vector<1x64xf32> to vector<1x16xf32>
    %918 = arith.negf %917 : vector<1x16xf32>
    %919 = math.exp %918 : vector<1x16xf32>
    %cst_186 = arith.constant 1.000000e+00 : f32
    %920 = vector.broadcast %cst_186 : f32 to vector<1x16xf32>
    %921 = arith.addf %920, %919 : vector<1x16xf32>
    %922 = arith.divf %920, %921 : vector<1x16xf32>
    %923 = arith.mulf %914, %862 : vector<1x16xf32>
    %924 = arith.mulf %908, %916 : vector<1x16xf32>
    %925 = arith.addf %923, %924 : vector<1x16xf32>
    %926 = math.tanh %925 : vector<1x16xf32>
    %927 = arith.mulf %922, %926 : vector<1x16xf32>
    %928 = arith.addf %865, %902 : vector<1x16xf32>
    %929 = arith.addf %866, %927 : vector<1x16xf32>
    %c14_i32 = arith.constant 14 : i32
    %c15_i32_187 = arith.constant 15 : i32
    %930 = arith.subi %c15_i32_187, %c14_i32 : i32
    %931 = arith.index_cast %c14_i32 : i32 to index
    %c0_188 = arith.constant 0 : index
    %932 = vector.load %arg20[%931, %c0_188] : memref<16x128xf32, #tpu.memory_space<vmem>>, vector<1x128xf32>
    %933 = arith.index_cast %930 : i32 to index
    %c0_189 = arith.constant 0 : index
    %934 = vector.load %arg20[%933, %c0_189] : memref<16x128xf32, #tpu.memory_space<vmem>>, vector<1x128xf32>
    %935 = vector.extract_strided_slice %932 {offsets = [0, 0], sizes = [1, 64], strides = [1, 1]} : vector<1x128xf32> to vector<1x64xf32>
    %cst_190 = arith.constant dense<0.000000e+00> : vector<1x64xf32>
    %936 = tpu.matmul %902, %45, %cst_190 {dimension_numbers = #tpu.dot_dimension_numbers<[1], [0], [0], [1], [0, 0, 1, 1], [], []>} : vector<1x16xf32>, vector<16x64xf32>, vector<1x64xf32> -> vector<1x64xf32>
    %937 = arith.addf %935, %936 : vector<1x64xf32>
    %938 = vector.extract_strided_slice %934 {offsets = [0, 64], sizes = [1, 64], strides = [1, 1]} : vector<1x128xf32> to vector<1x64xf32>
    %cst_191 = arith.constant dense<0.000000e+00> : vector<1x64xf32>
    %939 = tpu.matmul %927, %46, %cst_191 {dimension_numbers = #tpu.dot_dimension_numbers<[1], [0], [0], [1], [0, 0, 1, 1], [], []>} : vector<1x16xf32>, vector<16x64xf32>, vector<1x64xf32> -> vector<1x64xf32>
    %940 = arith.addf %938, %939 : vector<1x64xf32>
    %941 = vector.extract_strided_slice %937 {offsets = [0, 0], sizes = [1, 16], strides = [1, 1]} : vector<1x64xf32> to vector<1x16xf32>
    %942 = arith.negf %941 : vector<1x16xf32>
    %943 = math.exp %942 : vector<1x16xf32>
    %cst_192 = arith.constant 1.000000e+00 : f32
    %944 = vector.broadcast %cst_192 : f32 to vector<1x16xf32>
    %945 = arith.addf %944, %943 : vector<1x16xf32>
    %946 = arith.divf %944, %945 : vector<1x16xf32>
    %947 = vector.extract_strided_slice %937 {offsets = [0, 16], sizes = [1, 16], strides = [1, 1]} : vector<1x64xf32> to vector<1x16xf32>
    %948 = arith.negf %947 : vector<1x16xf32>
    %949 = math.exp %948 : vector<1x16xf32>
    %cst_193 = arith.constant 1.000000e+00 : f32
    %950 = vector.broadcast %cst_193 : f32 to vector<1x16xf32>
    %951 = arith.addf %950, %949 : vector<1x16xf32>
    %952 = arith.divf %950, %951 : vector<1x16xf32>
    %953 = vector.extract_strided_slice %937 {offsets = [0, 32], sizes = [1, 16], strides = [1, 1]} : vector<1x64xf32> to vector<1x16xf32>
    %954 = math.tanh %953 : vector<1x16xf32>
    %955 = vector.extract_strided_slice %937 {offsets = [0, 48], sizes = [1, 16], strides = [1, 1]} : vector<1x64xf32> to vector<1x16xf32>
    %956 = arith.negf %955 : vector<1x16xf32>
    %957 = math.exp %956 : vector<1x16xf32>
    %cst_194 = arith.constant 1.000000e+00 : f32
    %958 = vector.broadcast %cst_194 : f32 to vector<1x16xf32>
    %959 = arith.addf %958, %957 : vector<1x16xf32>
    %960 = arith.divf %958, %959 : vector<1x16xf32>
    %961 = arith.mulf %952, %900 : vector<1x16xf32>
    %962 = arith.mulf %946, %954 : vector<1x16xf32>
    %963 = arith.addf %961, %962 : vector<1x16xf32>
    %964 = math.tanh %963 : vector<1x16xf32>
    %965 = arith.mulf %960, %964 : vector<1x16xf32>
    %966 = vector.extract_strided_slice %940 {offsets = [0, 0], sizes = [1, 16], strides = [1, 1]} : vector<1x64xf32> to vector<1x16xf32>
    %967 = arith.negf %966 : vector<1x16xf32>
    %968 = math.exp %967 : vector<1x16xf32>
    %cst_195 = arith.constant 1.000000e+00 : f32
    %969 = vector.broadcast %cst_195 : f32 to vector<1x16xf32>
    %970 = arith.addf %969, %968 : vector<1x16xf32>
    %971 = arith.divf %969, %970 : vector<1x16xf32>
    %972 = vector.extract_strided_slice %940 {offsets = [0, 16], sizes = [1, 16], strides = [1, 1]} : vector<1x64xf32> to vector<1x16xf32>
    %973 = arith.negf %972 : vector<1x16xf32>
    %974 = math.exp %973 : vector<1x16xf32>
    %cst_196 = arith.constant 1.000000e+00 : f32
    %975 = vector.broadcast %cst_196 : f32 to vector<1x16xf32>
    %976 = arith.addf %975, %974 : vector<1x16xf32>
    %977 = arith.divf %975, %976 : vector<1x16xf32>
    %978 = vector.extract_strided_slice %940 {offsets = [0, 32], sizes = [1, 16], strides = [1, 1]} : vector<1x64xf32> to vector<1x16xf32>
    %979 = math.tanh %978 : vector<1x16xf32>
    %980 = vector.extract_strided_slice %940 {offsets = [0, 48], sizes = [1, 16], strides = [1, 1]} : vector<1x64xf32> to vector<1x16xf32>
    %981 = arith.negf %980 : vector<1x16xf32>
    %982 = math.exp %981 : vector<1x16xf32>
    %cst_197 = arith.constant 1.000000e+00 : f32
    %983 = vector.broadcast %cst_197 : f32 to vector<1x16xf32>
    %984 = arith.addf %983, %982 : vector<1x16xf32>
    %985 = arith.divf %983, %984 : vector<1x16xf32>
    %986 = arith.mulf %977, %925 : vector<1x16xf32>
    %987 = arith.mulf %971, %979 : vector<1x16xf32>
    %988 = arith.addf %986, %987 : vector<1x16xf32>
    %989 = math.tanh %988 : vector<1x16xf32>
    %990 = arith.mulf %985, %989 : vector<1x16xf32>
    %991 = arith.addf %928, %965 : vector<1x16xf32>
    %992 = arith.addf %929, %990 : vector<1x16xf32>
    %c15_i32_198 = arith.constant 15 : i32
    %c15_i32_199 = arith.constant 15 : i32
    %993 = arith.subi %c15_i32_199, %c15_i32_198 : i32
    %994 = arith.index_cast %c15_i32_198 : i32 to index
    %c0_200 = arith.constant 0 : index
    %995 = vector.load %arg20[%994, %c0_200] : memref<16x128xf32, #tpu.memory_space<vmem>>, vector<1x128xf32>
    %996 = arith.index_cast %993 : i32 to index
    %c0_201 = arith.constant 0 : index
    %997 = vector.load %arg20[%996, %c0_201] : memref<16x128xf32, #tpu.memory_space<vmem>>, vector<1x128xf32>
    %998 = vector.extract_strided_slice %995 {offsets = [0, 0], sizes = [1, 64], strides = [1, 1]} : vector<1x128xf32> to vector<1x64xf32>
    %cst_202 = arith.constant dense<0.000000e+00> : vector<1x64xf32>
    %999 = tpu.matmul %965, %45, %cst_202 {dimension_numbers = #tpu.dot_dimension_numbers<[1], [0], [0], [1], [0, 0, 1, 1], [], []>} : vector<1x16xf32>, vector<16x64xf32>, vector<1x64xf32> -> vector<1x64xf32>
    %1000 = arith.addf %998, %999 : vector<1x64xf32>
    %1001 = vector.extract_strided_slice %997 {offsets = [0, 64], sizes = [1, 64], strides = [1, 1]} : vector<1x128xf32> to vector<1x64xf32>
    %cst_203 = arith.constant dense<0.000000e+00> : vector<1x64xf32>
    %1002 = tpu.matmul %990, %46, %cst_203 {dimension_numbers = #tpu.dot_dimension_numbers<[1], [0], [0], [1], [0, 0, 1, 1], [], []>} : vector<1x16xf32>, vector<16x64xf32>, vector<1x64xf32> -> vector<1x64xf32>
    %1003 = arith.addf %1001, %1002 : vector<1x64xf32>
    %1004 = vector.extract_strided_slice %1000 {offsets = [0, 0], sizes = [1, 16], strides = [1, 1]} : vector<1x64xf32> to vector<1x16xf32>
    %1005 = arith.negf %1004 : vector<1x16xf32>
    %1006 = math.exp %1005 : vector<1x16xf32>
    %cst_204 = arith.constant 1.000000e+00 : f32
    %1007 = vector.broadcast %cst_204 : f32 to vector<1x16xf32>
    %1008 = arith.addf %1007, %1006 : vector<1x16xf32>
    %1009 = arith.divf %1007, %1008 : vector<1x16xf32>
    %1010 = vector.extract_strided_slice %1000 {offsets = [0, 16], sizes = [1, 16], strides = [1, 1]} : vector<1x64xf32> to vector<1x16xf32>
    %1011 = arith.negf %1010 : vector<1x16xf32>
    %1012 = math.exp %1011 : vector<1x16xf32>
    %cst_205 = arith.constant 1.000000e+00 : f32
    %1013 = vector.broadcast %cst_205 : f32 to vector<1x16xf32>
    %1014 = arith.addf %1013, %1012 : vector<1x16xf32>
    %1015 = arith.divf %1013, %1014 : vector<1x16xf32>
    %1016 = vector.extract_strided_slice %1000 {offsets = [0, 32], sizes = [1, 16], strides = [1, 1]} : vector<1x64xf32> to vector<1x16xf32>
    %1017 = math.tanh %1016 : vector<1x16xf32>
    %1018 = vector.extract_strided_slice %1000 {offsets = [0, 48], sizes = [1, 16], strides = [1, 1]} : vector<1x64xf32> to vector<1x16xf32>
    %1019 = arith.negf %1018 : vector<1x16xf32>
    %1020 = math.exp %1019 : vector<1x16xf32>
    %cst_206 = arith.constant 1.000000e+00 : f32
    %1021 = vector.broadcast %cst_206 : f32 to vector<1x16xf32>
    %1022 = arith.addf %1021, %1020 : vector<1x16xf32>
    %1023 = arith.divf %1021, %1022 : vector<1x16xf32>
    %1024 = arith.mulf %1015, %963 : vector<1x16xf32>
    %1025 = arith.mulf %1009, %1017 : vector<1x16xf32>
    %1026 = arith.addf %1024, %1025 : vector<1x16xf32>
    %1027 = math.tanh %1026 : vector<1x16xf32>
    %1028 = arith.mulf %1023, %1027 : vector<1x16xf32>
    %1029 = vector.extract_strided_slice %1003 {offsets = [0, 0], sizes = [1, 16], strides = [1, 1]} : vector<1x64xf32> to vector<1x16xf32>
    %1030 = arith.negf %1029 : vector<1x16xf32>
    %1031 = math.exp %1030 : vector<1x16xf32>
    %cst_207 = arith.constant 1.000000e+00 : f32
    %1032 = vector.broadcast %cst_207 : f32 to vector<1x16xf32>
    %1033 = arith.addf %1032, %1031 : vector<1x16xf32>
    %1034 = arith.divf %1032, %1033 : vector<1x16xf32>
    %1035 = vector.extract_strided_slice %1003 {offsets = [0, 16], sizes = [1, 16], strides = [1, 1]} : vector<1x64xf32> to vector<1x16xf32>
    %1036 = arith.negf %1035 : vector<1x16xf32>
    %1037 = math.exp %1036 : vector<1x16xf32>
    %cst_208 = arith.constant 1.000000e+00 : f32
    %1038 = vector.broadcast %cst_208 : f32 to vector<1x16xf32>
    %1039 = arith.addf %1038, %1037 : vector<1x16xf32>
    %1040 = arith.divf %1038, %1039 : vector<1x16xf32>
    %1041 = vector.extract_strided_slice %1003 {offsets = [0, 32], sizes = [1, 16], strides = [1, 1]} : vector<1x64xf32> to vector<1x16xf32>
    %1042 = math.tanh %1041 : vector<1x16xf32>
    %1043 = vector.extract_strided_slice %1003 {offsets = [0, 48], sizes = [1, 16], strides = [1, 1]} : vector<1x64xf32> to vector<1x16xf32>
    %1044 = arith.negf %1043 : vector<1x16xf32>
    %1045 = math.exp %1044 : vector<1x16xf32>
    %cst_209 = arith.constant 1.000000e+00 : f32
    %1046 = vector.broadcast %cst_209 : f32 to vector<1x16xf32>
    %1047 = arith.addf %1046, %1045 : vector<1x16xf32>
    %1048 = arith.divf %1046, %1047 : vector<1x16xf32>
    %1049 = arith.mulf %1040, %988 : vector<1x16xf32>
    %1050 = arith.mulf %1034, %1042 : vector<1x16xf32>
    %1051 = arith.addf %1049, %1050 : vector<1x16xf32>
    %1052 = math.tanh %1051 : vector<1x16xf32>
    %1053 = arith.mulf %1048, %1052 : vector<1x16xf32>
    %1054 = arith.addf %991, %1028 : vector<1x16xf32>
    %1055 = arith.addf %992, %1053 : vector<1x16xf32>
    %c16_i32 = arith.constant 16 : i32
    %1056 = tpu.concatenate %1054, %1055 in 1 : vector<1x16xf32>, vector<1x16xf32> -> vector<1x32xf32>
    %cst_210 = arith.constant 6.250000e-02 : f32
    %1057 = vector.broadcast %cst_210 : f32 to vector<1x32xf32>
    %1058 = arith.mulf %1056, %1057 : vector<1x32xf32>
    %c0_211 = arith.constant 0 : index
    %c0_212 = arith.constant 0 : index
    %1059 = vector.load %arg13[%c0_211, %c0_212] : memref<32x16xf32, #tpu.memory_space<vmem>>, vector<32x16xf32>
    %cst_213 = arith.constant dense<0.000000e+00> : vector<1x16xf32>
    %1060 = tpu.matmul %1058, %1059, %cst_213 {dimension_numbers = #tpu.dot_dimension_numbers<[1], [0], [0], [1], [0, 0, 1, 1], [], []>} : vector<1x32xf32>, vector<32x16xf32>, vector<1x16xf32> -> vector<1x16xf32>
    %c0_214 = arith.constant 0 : index
    %c0_215 = arith.constant 0 : index
    %1061 = vector.load %arg14[%c0_214, %c0_215] : memref<1x16xf32, #tpu.memory_space<vmem>>, vector<1x16xf32>
    %1062 = arith.addf %1060, %1061 : vector<1x16xf32>
    %c0_216 = arith.constant 0 : index
    %c0_217 = arith.constant 0 : index
    %1063 = vector.load %arg15[%c0_216, %c0_217] : memref<32x16xf32, #tpu.memory_space<vmem>>, vector<32x16xf32>
    %cst_218 = arith.constant dense<0.000000e+00> : vector<1x16xf32>
    %1064 = tpu.matmul %1058, %1063, %cst_218 {dimension_numbers = #tpu.dot_dimension_numbers<[1], [0], [0], [1], [0, 0, 1, 1], [], []>} : vector<1x32xf32>, vector<32x16xf32>, vector<1x16xf32> -> vector<1x16xf32>
    %c0_219 = arith.constant 0 : index
    %c0_220 = arith.constant 0 : index
    %1065 = vector.load %arg16[%c0_219, %c0_220] : memref<1x16xf32, #tpu.memory_space<vmem>>, vector<1x16xf32>
    %1066 = arith.addf %1064, %1065 : vector<1x16xf32>
    %c0_221 = arith.constant 0 : index
    %c0_222 = arith.constant 0 : index
    %c0_223 = arith.constant 0 : index
    %1067 = vector.load %arg3[%c0_221, %c0_222, %c0_223] : memref<1x1x16xf32, #tpu.memory_space<vmem>>, vector<1x1x16xf32>
    %1068 = vector.shape_cast %1067 : vector<1x1x16xf32> to vector<1x16xf32>
    %cst_224 = arith.constant 5.000000e-01 : f32
    %1069 = vector.broadcast %cst_224 : f32 to vector<1x16xf32>
    %1070 = arith.mulf %1069, %1066 : vector<1x16xf32>
    %1071 = math.exp %1070 : vector<1x16xf32>
    %1072 = arith.mulf %1068, %1071 : vector<1x16xf32>
    %1073 = arith.addf %1062, %1072 : vector<1x16xf32>
    %c0_225 = arith.constant 0 : index
    %c0_226 = arith.constant 0 : index
    %c0_227 = arith.constant 0 : index
    %1074 = vector.load %arg17[%c0_225, %c0_226, %c0_227] : memref<1x1x16xf32, #tpu.memory_space<vmem>>, vector<1x1x16xf32>
    %1075 = vector.shape_cast %1074 : vector<1x1x16xf32> to vector<1x16xf32>
    %1076 = vector.shape_cast %1073 : vector<1x16xf32> to vector<1x1x16xf32>
    tpu.vector_store %arg17[%c0_225, %c0_226, %c0_227], %1076 {strides = array<i32>} : memref<1x1x16xf32, #tpu.memory_space<vmem>>, vector<1x1x16xf32>,
    %c0_228 = arith.constant 0 : index
    %c0_229 = arith.constant 0 : index
    %c0_230 = arith.constant 0 : index
    %1077 = vector.load %arg18[%c0_228, %c0_229, %c0_230] : memref<1x1x16xf32, #tpu.memory_space<vmem>>, vector<1x1x16xf32>
    %1078 = vector.shape_cast %1077 : vector<1x1x16xf32> to vector<1x16xf32>
    %1079 = vector.shape_cast %1062 : vector<1x16xf32> to vector<1x1x16xf32>
    tpu.vector_store %arg18[%c0_228, %c0_229, %c0_230], %1079 {strides = array<i32>} : memref<1x1x16xf32, #tpu.memory_space<vmem>>, vector<1x1x16xf32>,
    %c0_231 = arith.constant 0 : index
    %c0_232 = arith.constant 0 : index
    %c0_233 = arith.constant 0 : index
    %1080 = vector.load %arg19[%c0_231, %c0_232, %c0_233] : memref<1x1x16xf32, #tpu.memory_space<vmem>>, vector<1x1x16xf32>
    %1081 = vector.shape_cast %1080 : vector<1x1x16xf32> to vector<1x16xf32>
    %1082 = vector.shape_cast %1066 : vector<1x16xf32> to vector<1x1x16xf32>
    tpu.vector_store %arg19[%c0_231, %c0_232, %c0_233], %1082 {strides = array<i32>} : memref<1x1x16xf32, #tpu.memory_space<vmem>>, vector<1x1x16xf32>,
    return
  }
  func.func @transform_0(%arg0: i32) -> (i32, i32, i32) {
    %c0_i32 = arith.constant 0 : i32
    %c0_i32_0 = arith.constant 0 : i32
    %c0_i32_1 = arith.constant 0 : i32
    return %arg0, %c0_i32, %c0_i32_0 : i32, i32, i32
  }
  func.func @transform_1(%arg0: i32) -> (i32, i32, i32) {
    %c0_i32 = arith.constant 0 : i32
    %c0_i32_0 = arith.constant 0 : i32
    %c0_i32_1 = arith.constant 0 : i32
    return %arg0, %c0_i32, %c0_i32_0 : i32, i32, i32
  }
  func.func @transform_2(%arg0: i32) -> (i32, i32, i32) {
    %c0_i32 = arith.constant 0 : i32
    %c0_i32_0 = arith.constant 0 : i32
    %c0_i32_1 = arith.constant 0 : i32
    return %arg0, %c0_i32, %c0_i32_0 : i32, i32, i32
  }
  func.func @transform_3(%arg0: i32) -> (i32, i32) {
    %c0_i32 = arith.constant 0 : i32
    %c0_i32_0 = arith.constant 0 : i32
    %c0_i32_1 = arith.constant 0 : i32
    return %c0_i32, %c0_i32_0 : i32, i32
  }
  func.func @transform_4(%arg0: i32) -> (i32, i32) {
    %c0_i32 = arith.constant 0 : i32
    %c0_i32_0 = arith.constant 0 : i32
    %c0_i32_1 = arith.constant 0 : i32
    return %c0_i32, %c0_i32_0 : i32, i32
  }
  func.func @transform_5(%arg0: i32) -> (i32, i32) {
    %c0_i32 = arith.constant 0 : i32
    %c0_i32_0 = arith.constant 0 : i32
    %c0_i32_1 = arith.constant 0 : i32
    return %c0_i32, %c0_i32_0 : i32, i32
  }
  func.func @transform_6(%arg0: i32) -> (i32, i32) {
    %c0_i32 = arith.constant 0 : i32
    %c0_i32_0 = arith.constant 0 : i32
    %c0_i32_1 = arith.constant 0 : i32
    return %c0_i32, %c0_i32_0 : i32, i32
  }
  func.func @transform_7(%arg0: i32) -> (i32, i32) {
    %c0_i32 = arith.constant 0 : i32
    %c0_i32_0 = arith.constant 0 : i32
    %c0_i32_1 = arith.constant 0 : i32
    return %c0_i32, %c0_i32_0 : i32, i32
  }
  func.func @transform_8(%arg0: i32) -> (i32, i32) {
    %c0_i32 = arith.constant 0 : i32
    %c0_i32_0 = arith.constant 0 : i32
    %c0_i32_1 = arith.constant 0 : i32
    return %c0_i32, %c0_i32_0 : i32, i32
  }
  func.func @transform_9(%arg0: i32) -> (i32, i32) {
    %c0_i32 = arith.constant 0 : i32
    %c0_i32_0 = arith.constant 0 : i32
    %c0_i32_1 = arith.constant 0 : i32
    return %c0_i32, %c0_i32_0 : i32, i32
  }
  func.func @transform_10(%arg0: i32) -> (i32, i32) {
    %c0_i32 = arith.constant 0 : i32
    %c0_i32_0 = arith.constant 0 : i32
    %c0_i32_1 = arith.constant 0 : i32
    return %c0_i32, %c0_i32_0 : i32, i32
  }
  func.func @transform_11(%arg0: i32) -> (i32, i32) {
    %c0_i32 = arith.constant 0 : i32
    %c0_i32_0 = arith.constant 0 : i32
    %c0_i32_1 = arith.constant 0 : i32
    return %c0_i32, %c0_i32_0 : i32, i32
  }
  func.func @transform_12(%arg0: i32) -> (i32, i32) {
    %c0_i32 = arith.constant 0 : i32
    %c0_i32_0 = arith.constant 0 : i32
    %c0_i32_1 = arith.constant 0 : i32
    return %c0_i32, %c0_i32_0 : i32, i32
  }
  func.func @transform_13(%arg0: i32) -> (i32, i32) {
    %c0_i32 = arith.constant 0 : i32
    %c0_i32_0 = arith.constant 0 : i32
    %c0_i32_1 = arith.constant 0 : i32
    return %c0_i32, %c0_i32_0 : i32, i32
  }
  func.func @transform_14(%arg0: i32) -> (i32, i32) {
    %c0_i32 = arith.constant 0 : i32
    %c0_i32_0 = arith.constant 0 : i32
    %c0_i32_1 = arith.constant 0 : i32
    return %c0_i32, %c0_i32_0 : i32, i32
  }
  func.func @transform_15(%arg0: i32) -> (i32, i32) {
    %c0_i32 = arith.constant 0 : i32
    %c0_i32_0 = arith.constant 0 : i32
    %c0_i32_1 = arith.constant 0 : i32
    return %c0_i32, %c0_i32_0 : i32, i32
  }
  func.func @transform_16(%arg0: i32) -> (i32, i32, i32) {
    %c0_i32 = arith.constant 0 : i32
    %c0_i32_0 = arith.constant 0 : i32
    %c0_i32_1 = arith.constant 0 : i32
    return %arg0, %c0_i32, %c0_i32_0 : i32, i32, i32
  }
  func.func @transform_17(%arg0: i32) -> (i32, i32, i32) {
    %c0_i32 = arith.constant 0 : i32
    %c0_i32_0 = arith.constant 0 : i32
    %c0_i32_1 = arith.constant 0 : i32
    return %arg0, %c0_i32, %c0_i32_0 : i32, i32, i32
  }
  func.func @transform_18(%arg0: i32) -> (i32, i32, i32) {
    %c0_i32 = arith.constant 0 : i32
    %c0_i32_0 = arith.constant 0 : i32
    %c0_i32_1 = arith.constant 0 : i32
    return %arg0, %c0_i32, %c0_i32_0 : i32, i32, i32
  }
}

</mosaic_0001>

<bundles_post_ra>
// kernel: tpu_custom_call.1
= control target key start
LH: loop header
LB: loop body
LE: loop exit
PB: predicated region body
PF: predicated region fallthrough
CT: control target
= control target key end

     0   :  { %s6565_s0 = inlined_call_operand.vmem [shape: f32[2,16,8], index: 0, kind: input, shape index: {}]   ;;  %s6566_s1 = inlined_call_operand.vmem [shape: f32[2,16,16], index: 1, kind: input, shape index: {}]   ;;  %s6567_s2 = inlined_call_operand.vmem [shape: f32[2,1,16], index: 2, kind: input, shape index: {}]   ;;  %s6568_s3 = inlined_call_operand.vmem [shape: f32[8,16], index: 3, kind: input, shape index: {}]   ;;  %s6569_s4 = inlined_call_operand.vmem [shape: f32[1,16], index: 4, kind: input, shape index: {}]   ;;  %s6570_s5 = inlined_call_operand.vmem [shape: f32[16,16], index: 5, kind: input, shape index: {}]   ;;  %s6571_s6 = inlined_call_operand.vmem [shape: f32[16,16], index: 6, kind: input, shape index: {}]   ;;  %s6572_s7 = inlined_call_operand.vmem [shape: f32[1,16], index: 7, kind: input, shape index: {}]   ;;  %s6573_s8 = inlined_call_operand.vmem [shape: f32[16,128], index: 8, kind: input, shape index: {}]   ;;  %s6574_s9 = inlined_call_operand.vmem [shape: f32[1,128], index: 9, kind: input, shape index: {}]   ;;  %s6575_s10 = inlined_call_operand.vmem [shape: f32[16,64], index: 10, kind: input, shape index: {}]   ;;  %s6576_s11 = inlined_call_operand.vmem [shape: f32[16,64], index: 11, kind: input, shape index: {}]   ;;  %s6577_s12 = inlined_call_operand.vmem [shape: f32[32,16], index: 12, kind: input, shape index: {}]   ;;  %s6578_s13 = inlined_call_operand.vmem [shape: f32[1,16], index: 13, kind: input, shape index: {}]   ;;  %s6579_s14 = inlined_call_operand.vmem [shape: f32[32,16], index: 14, kind: input, shape index: {}]   ;;  %s6580_s15 = inlined_call_operand.vmem [shape: f32[1,16], index: 15, kind: input, shape index: {}]   ;;  %s6581_s16 = inlined_call_operand.hbm [shape: f32[2,1,16], index: 16, kind: output, shape index: {0}]   ;;  %s6582_s17 = inlined_call_operand.hbm [shape: f32[2,1,16], index: 17, kind: output, shape index: {1}]   ;;  %s6583_s18 = inlined_call_operand.hbm [shape: f32[2,1,16], index: 18, kind: output, shape index: {2}]  }
   0x1   :  { %6590 = sst [smem:[#allocation15_spill]] %s6565_s0 }
   0x2   :  { %6591 = sst [smem:[#allocation16_spill]] %s6566_s1 }
   0x3   :  { %6592 = sst [smem:[#allocation17_spill]] %s6567_s2 }
   0x4   :  { %6593 = sst [smem:[#allocation18_spill]] %s6568_s3 }
   0x5   :  { %6594 = sst [smem:[#allocation19_spill]] %s6569_s4 }
   0x6   :  { %6595 = sst [smem:[#allocation20_spill]] %s6570_s5 }
   0x7   :  { %6596 = sst [smem:[#allocation21_spill]] %s6571_s6 }
   0x8   :  { %24 = vsyncpa [#allocation4], 0 }
   0x9   :  { %26 = vsyncpa [#allocation4 + $0x1], 0 }
   0xa   :  { %27 = vsyncpa [#allocation6], 0 }
   0xb   :  { %29 = vsyncpa [#allocation6 + $0x1], 0  ;;  %s5848_s27 = smov 0   ;;  %s5850_s28 = smov 0  }
   0xc   :  { %s5852_s29 = smov 0   ;;  %s5854_s30 = smov 0  }
   0xd LB: > { %6597 = sst [smem:[#allocation10_spill]] %s5728_s27  ;;  %s5869_s0 = sadd.s32 4294967295, %s5740_s30   ;;  %s5740_s30 = sphi %s5854_s30, %s6614_s30   ;;  %s5736_s29 = sphi %s5852_s29, %s6616_s29   ;;  %s5732_s28 = sphi %s5850_s28, %s6618_s28   ;;  %s5728_s27 = sphi %s5848_s27, %s6617_s27  }
   0xe   : > { %6598 = sst [smem:[#allocation11_spill]] %s5736_s29  ;;  %s6584_s19 = sadd.s32 4294967294, %s5740_s30  }
   0xf   : > { %s5873_s1 = sadd.s32 1, %s5740_s30   ;;  %s393_s20 = sadd.s32 1, %s5736_s29 }
  0x10   : > { %6599 = sst [smem:[#allocation12_spill]] %s5873_s1  ;;  %s390_s21 = ssub.s32 %s5740_s30, %s5873_s1 }
  0x11   : > { %p403_p0 = scmp.ne.s32.totalorder %s5736_s29, %s5732_s28  ;;  %p391_p1 = scmp.eq.s32.totalorder %s390_s21, 0 }
  0x12   : > { %p404_p2 = scmp.eq.s32.totalorder %s5869_s0, 1  ;;  %p409_p3 = scmp.ne.s32.totalorder %s5732_s28, %s5728_s27 }
  0x13   : > { %p410_p4 = scmp.eq.s32.totalorder %s6584_s19, 1  ;;  %p4689_p7 = scmp.ge.s32.totalorder %s5740_s30, 1 }
  0x14   : > { %s5886_s22 = scalar_select %p391_p1, %s5736_s29, %s393_s20  }
  0x15   : > { %p5888_p5 = por %p404_p2, %p403_p0  ;;  %p5892_p6 = por %p410_p4, %p409_p3 }
  0x16   : > { %6600 = sst [smem:[#allocation13_spill]] %s5886_s22  ;;  %p541_p8 = scmp.lt.s32.totalorder %s5740_s30, 3 }
  0x17   : > { %s6602_s23 = scalar_select %p5892_p6, 1, 0 }
  0x18   : > { %p542_p9 = pnand %p4689_p7, %p541_p8 }
  0x19   : > { %6603 = sst [smem:[#allocation14_spill]] %s6602_s23  ;;  %p610_p10 = scmp.lt.s32.totalorder (!%p542_p9), %s5869_s0, 1  ;;  %vm627_vm0 = vcmask (!%p542_p9), 64512   ;;  %vm735_vm1 = vcmask (!%p542_p9), 130048   ;;  %v5742_v24 = vmov (!%p542_p9), 0.0   ;;  %v5743_v34 = vmov (!%p542_p9), 0.0|0.0  }
  0x1a   : > { %545 = sbr.rel (%p542_p9) target bundleno = 13733 (0x35a5), region = 84  ;;  %s6604_s3 = sld [smem:[#allocation18_spill]] (!%p542_p9)  ;;  %v1029_v35 = vld [vmem:[%s6576_s11] sm:$0xff] (!%p542_p9)  ;;  %v1030_v36 = vld [vmem:[%s6576_s11 + $0x8] sm:$0xff] (!%p542_p9)  ;;  %vm5744_vm4 = vmmov (!%p542_p9), 0   ;;  %vm4351_vm7 = vcmask (!%p542_p9), 261120  }
  0x1b   : > { %s6605_s22 = sld [smem:[#allocation15_spill]] (!%p542_p9)  ;;  %s6607_s6 = sld [smem:[#allocation21_spill]] (!%p542_p9)  ;;  %v5943_v38 = vpack.c.bf16 (!%p542_p9), %v1030_v36, %v1029_v35  ;;  %v935_v39 = vld [vmem:[%s6573_s8] sm:$0xff] (!%p542_p9)  ;;  %v936_v40 = vld [vmem:[%s6573_s8 + $0x8] sm:$0xff] (!%p542_p9)  ;;  %vm4506_vm8 = vcmask (!%p542_p9), 122880  }
  0x1c   : > { %s6608_s5 = sld [smem:[#allocation20_spill]] (!%p542_p9)  ;;  %s6609_s4 = sld [smem:[#allocation19_spill]] (!%p542_p9)  ;;  %v5181_v41 = vpack.c.bf16 (!%p542_p9), %v936_v40, %v935_v39  ;;  %v4705_v48 = vld [vmem:[%s6572_s7] ss:$0 sm:$0xff] (!%p542_p9)  ;;  %v1028_v53 = vld [vmem:[%s6575_s10 + $0x8] sm:$0xff] (!%p542_p9) }
  0x1d   : > { %v1027_v52 = vld [vmem:[%s6575_s10] sm:$0xff] (!%p542_p9)  ;;  %s5745_s19 = smov (!%p542_p9), 64   ;;  %s5746_s21 = smov (!%p542_p9), 96  }
  0x1e   : > { %v5973_v58 = vpack.c.bf16 (!%p542_p9), %v1028_v53, %v1027_v52  ;;  %v4706_v62 = vld [vmem:[%s6574_s9] ss:$0 sm:$0xff] (!%p542_p9)  ;;  %s5748_s27 = smov (!%p542_p9), 32   ;;  %s5749_s23 = smov (!%p542_p9), 80  }
  0x20   : > { %v640_v0 = vld [vmem:[%s6604_s3] sm:$0xff] (!%p542_p9)  ;;  %s6606_s3 = sld [smem:[#allocation16_spill]] (!%p542_p9) }
  0x21   : > { %4901 = vmatprep.subr.mxu0 %v640_v0  ;;  %s5903_s26 = scalar_select %p610_p10, %s5869_s0, 1  ;;  %v760_v7 = vld [vmem:[%s6607_s6] sm:$0xff]  ;;  %v761_v8 = vld [vmem:[%s6607_s6 + $0x8] sm:$0xff] }
  0x22   : > { %4902 = vmatpush3.msra.mxu0 %v640_v0  ;;  %v5173_v9 = vpack.c.bf16 %v761_v8, %v760_v7  ;;  %v758_v13 = vld [vmem:[%s6608_s5] sm:$0xff]  ;;  %v759_v14 = vld [vmem:[%s6608_s5 + $0x8] sm:$0xff] }
  0x23   : > { %s4778_s20 = sshll.u32 %s5903_s26, 4  ;;  %v5177_v15 = vpack.c.bf16 %v759_v14, %v758_v13  ;;  %v4696_v21 = vld [vmem:[%s6609_s4] ss:$0 sm:$0xff]  ;;  %5182 = vmatprep.subr.bf16.mxu0 %v5181_v41 }
  0x24   : > { %s614_s29 = scalar_lea.vmem %s6605_s22, %s4778_s20  ;;  %5174 = vmatprep.subr.bf16.mxu1 %v5173_v9 }
  0x25   : > { %v623_v1 = vld [vmem:[%s614_s29] sm:$0xff]  ;;  %v624_v2 = vld [vmem:[%s614_s29 + $0x8] sm:$0xff]  ;;  %5176 = vmatpush3.bf16.msra.mxu1 %v5173_v9  ;;  %s6428_s29 = sand.u32 1, %s5732_s28  }
  0x26   : > { %v625_v3 = vand.u32 2147483647, %v623_v1  ;;  %4903 = vmatprep.mubr.msk.f32.mxu0 %vm627_vm0, %v623_v1  ;;  %v626_v4 = vand.u32 2147483647, %v624_v2  ;;  %s619_s1 = scalar_lea.vmem %s6606_s3, %s4778_s20  ;;  %5178 = vmatprep.subr.bf16.mxu1 %v5177_v15  ;;  %s5747_s3 = smov 16  }
  0x27   : > { %4904 = vmatmul.mubr.msk.f32.vlgmr.msra.gmra.mrb[0].mxu0 %vm627_vm0, %v624_v2  ;;  %v731_v10 = vld [vmem:[%s619_s1] sm:$0xff]  ;;  %v732_v16 = vld [vmem:[%s619_s1 + $0x8] sm:$0xff]  ;;  %s603_s24 = scalar_lea.vmem [#allocation5], %s6428_s29  ;;  %s5750_s20 = smov [#allocation5]  }
  0x28   : > { %v628_v5 = vsel %vm627_vm0, %v625_v3, -inf  ;;  %v631_v6 = vsel %vm627_vm0, %v626_v4, -inf  ;;  %v733_v11 = vand.u32 2147483647, %v731_v10  ;;  %v734_v17 = vand.u32 2147483647, %v732_v16  ;;  %5184 = vmatpush3.bf16.msra.mxu0 %v5181_v41 }
  0x29   : > { %629 = vmax.xlane.f32.xlu0 %v628_v5  ;;  %5185 = vmatprep.subr.bf16.mxu0 %v5743_v34  ;;  %s4544_s25 = sshll.u32 %s603_s24, 4  ;;  %s5622_s1 = sshll.u32 %s5750_s20, 4  ;;  %s6450_s25 = int_to_ptr.vmem [resolvable:$true] %s4544_s25  ;;  %s5623_s1 = int_to_ptr.vmem [resolvable:$false] %s5622_s1 }
  0x2a   : > { %v736_v12 = vsel %vm735_vm1, %v733_v11, -inf  ;;  %v739_v18 = vsel %vm735_vm1, %v734_v17, -inf  ;;  %s5624_s5 = scalar_lea.vmem %s5623_s1, 32  ;;  %p5625_p0 = scmp.lt.s32.totalorder %s6450_s25, %s5623_s1 }
  0x2b   : > { %737 = vmax.xlane.f32.xlu1 %v736_v12 }
  0x2d   : > { %632 = vmax.xlane.f32.xlu0 %v631_v6 }
  0x31   : > { %740 = vmax.xlane.f32.xlu0 %v739_v18 }
  0xb6   : > { %v630_v19 = vpop.xlane.xlu0 %629 }
  0xb7   : > { %vm634_vm3 = vcmp.gt.f32.partialorder %v630_v19, 0.0 }
  0xb8   : > { %v4694_v28 = vsel %vm634_vm3, 1.0, %v5742_v24  ;;  %v738_v42 = vpop.xlane.xlu1 %737 }
  0xba   : > { %v633_v20 = vpop.xlane.xlu0 %632 }
  0xbb   : > { %vm635_vm2 = vcmp.gt.f32.partialorder %v633_v20, 0.0 }
  0xbc   : > { %v4695_v25 = vsel %vm635_vm2, 1.0, %v5742_v24 }
  0xbe   : > { %v741_v45 = vpop.xlane.xlu0 %740 }
  0xfa   : > { %v4905_v22 = vpop.f32.mrb[0].mxu0 }
  0xfb   : > { %v726_v23 = vadd.f32 %v4905_v22, %v4696_v21  ;;  %v720_v26 = vpop.f32.mrb[1].mxu0 }
  0xfc   : > { %v721_v27 = vadd.f32 %v4696_v21, %v720_v26 }
  0xfd   : > { %v730_v29 = vmul.f32 %v4695_v25, %v726_v23 }
  0xfe   : > { %v729_v30 = vmul.f32 %v4694_v28, %v721_v27 }
  0xff   : > { %v743_v33 = vand.u32 2147483647, %v730_v29 }
 0x100   : > { %4910 = vmatprep.mubr.msk.f32.mxu1 %vm735_vm1, %v729_v30  ;;  %v742_v31 = vand.u32 2147483647, %v729_v30 }
 0x101   : > { %4911 = vmatmul.mubr.msk.f32.vlgmr.msra.gmra.mrb[0].mxu1 %vm735_vm1, %v730_v29  ;;  %v747_v37 = vsel %vm735_vm1, %v743_v33, -inf }
 0x102   : > { %5180 = vmatpush3.bf16.msra.mxu1 %v5177_v15  ;;  %v744_v32 = vsel %vm735_vm1, %v742_v31, -inf  ;;  %4917 = vmatprep.mubr.msk.f32.mxu1 %vm735_vm1, %v731_v10 }
 0x103   : > { %745 = vmax.xlane.f32.xlu1 %v744_v32  ;;  %5188 = vmatprep.subr.bf16.mxu1 %v5743_v34 }
 0x107   : > { %748 = vmax.xlane.f32.xlu1 %v747_v37 }
 0x109   : > { %4918 = vmatmul.mubr.msk.f32.vlgmr.msra.gmra.mrb[0].mxu1 %vm735_vm1, %v732_v16 }
 0x10a   : > { %5190 = vmatpush3.bf16.msra.mxu1 %v5943_v38  ;;  %4938 = vmatprep.mubr.msk.f32.mxu1 %vm5744_vm4, %v5742_v24 }
 0x10b   : > { %5194 = vmatprep.subr.bf16.mxu1 %v5743_v34 }
 0x10d   : > { %4939 = vmatmul.mubr.f32.vlgmr.msra.gmra.mrb[2].mxu1 %v5742_v24 }
 0x10e   : > { %5196 = vmatpush3.bf16.msra.mxu1 %v5943_v38  ;;  %4952 = vmatprep.mubr.msk.f32.mxu1 %vm5744_vm4, %v5742_v24 }
 0x10f   : > { %5200 = vmatprep.subr.bf16.mxu1 %v5743_v34 }
 0x190   : > { %v746_v43 = vpop.xlane.xlu1 %745 }
 0x191   : > { %v750_v46 = vmax.f32 %v738_v42, %v746_v43 }
 0x193   : > { %vm752_vm5 = vcmp.gt.f32.partialorder %v750_v46, 0.0 }
 0x194   : > { %v749_v44 = vpop.xlane.xlu1 %748  ;;  %v4699_v55 = vsel %vm752_vm5, 1.0, %v5742_v24 }
 0x195   : > { %v751_v47 = vmax.f32 %v741_v45, %v749_v44 }
 0x197   : > { %vm753_vm6 = vcmp.gt.f32.partialorder %v751_v47, 0.0 }
 0x198   : > { %v4700_v56 = vsel %vm753_vm6, 1.0, %v5742_v24 }
 0x1dc   : > { %v4919_v49 = vpop.f32.mrb[0].mxu1 }
 0x1dd   : > { %v932_v50 = vadd.f32 %v4919_v49, %v4705_v48  ;;  %v915_v51 = vpop.f32.mrb[1].mxu1 }
 0x1de   : > { %v931_v54 = vadd.f32 %v4705_v48, %v915_v51 }
 0x1df   : > { %v934_v60 = vmul.f32 %v4700_v56, %v932_v50 }
 0x1e0   : > { %v933_v57 = vmul.f32 %v4699_v55, %v931_v54  ;;  %v1173_v59 = vpop.f32.mrb[2].mxu1 }
 0x1e1   : > { %v4940_v61 = vpop.f32.mrb[3].mxu1  ;;  %1178 = vrot.lane.b32.xlu0 %v1173_v59, %s5745_s19 }
 0x1e2   : > { %4924 = vmatprep.mubr.msk.f32.mxu0 %vm735_vm1, %v933_v57 }
 0x1e3   : > { %4925 = vmatmul.mubr.msk.f32.vlgmr.msra.gmra.mrb[2].mxu0 %vm735_vm1, %v934_v60 }
 0x1e4   : > { %5187 = vmatpush3.bf16.msra.mxu0 %v5973_v58  ;;  %4931 = vmatprep.mubr.msk.f32.mxu0 %vm5744_vm4, %v5742_v24 }
 0x1e5   : > { %5191 = vmatprep.subr.bf16.mxu0 %v5743_v34 }
 0x1e7   : > { %4932 = vmatmul.mubr.f32.vlgmr.msra.gmra.mrb[4].mxu0 %v5742_v24 }
 0x1e8   : > { %5193 = vmatpush3.bf16.msra.mxu0 %v5973_v58  ;;  %4945 = vmatprep.mubr.msk.f32.mxu0 %vm5744_vm4, %v5742_v24 }
 0x1e9   : > { %5197 = vmatprep.subr.bf16.mxu0 %v5743_v34 }
 0x253   : > { %v1179_v5 = vpop.permute.xlu0 %1178 }
 0x2b6   : > { %v4926_v63 = vpop.f32.mrb[2].mxu0 }
 0x2b7   : > { %v1022_v0 = vadd.f32 %v4926_v63, %v4706_v62  ;;  %v1016_v1 = vpop.f32.mrb[3].mxu0 }
 0x2b8   : > { %v1017_v2 = vadd.f32 %v4706_v62, %v1016_v1 }
 0x2b9   : > { %1026 = vst [vmem:[#allocation2 + $0x8] sm:$0xff] %v1022_v0 }
 0x2ba   : > { %1025 = vst [vmem:[#allocation2] sm:$0xff] %v1017_v2  ;;  %v1102_v3 = vpop.f32.mrb[4].mxu0 }
 0x2bb   : > { %v4933_v4 = vpop.f32.mrb[5].mxu0 }
 0x2c0   : > { %v1032_v6 = vld [vmem:[#allocation2 + $0xf] sm:$0x1]  ;;  %v1233_v25 = vld [vmem:[#allocation2 + $0xe] sm:$0x1]  ;;  %v1441_v62 = vld [vmem:[#allocation2 + $0xd] sm:$0x1] }
 0x2c1   : > { %v1181_v7 = vadd.f32 %v1179_v5, %v1032_v6  ;;  %v1031_v37 = vld [vmem:[#allocation2] sm:$0x1] }
 0x2c2   : > { %v1106_v41 = vadd.f32 %v1102_v3, %v1031_v37 }
 0x2c3   : > { %5352 = vtanh.f32 %v1181_v7  ;;  %v4710_v9 = vmul.f32 -1.442695, %v1181_v7 }
 0x2c4   : > { %v4709_v44 = vmul.f32 -1.442695, %v1106_v41 }
 0x2c5   : > { %5354 = vpow2.f32 %v4710_v9 }
 0x2cd   : > { %v5353_v8 = vpop.eup %5352 }
 0x2ce   : > { %1215 = vrot.lane.b32.xlu1 %v5353_v8, %s5746_s21 }
 0x2cf   : > { %v5355_v10 = vpop.eup %5354 }
 0x2d0   : > { %v1209_v11 = vadd.f32 1.0, %v5355_v10 }
 0x2d2   : > { %5356 = vrcp.f32 %v1209_v11 }
 0x2dc   : > { %v5357_v12 = vpop.eup %5356 }
 0x2dd   : > { %v1213_v15 = vmul.f32 0.0, %v5357_v12 }
 0x340   : > { %v1216_v13 = vpop.permute.xlu1 %1215 }
 0x341   : > { %v1218_v14 = vmul.f32 %v5357_v12, %v1216_v13 }
 0x343   : > { %1220 = vrot.lane.b32.xlu1 %v1218_v14, %s5747_s3  ;;  %v1232_v14 = vld [vmem:[#allocation2 + $0x1] sm:$0x1] }
 0x3b5   : > { %v1221_v16 = vpop.permute.xlu1 %1220 }
 0x3b6   : > { %v1223_v17 = vadd.f32 %v1221_v16, %v1213_v15 }
 0x3b8   : > { %5358 = vtanh.f32 %v1223_v17 }
 0x3c2   : > { %v5359_v18 = vpop.eup %5358 }
 0x3c3   : > { %1226 = vrot.lane.b32.xlu1 %v5359_v18, %s5748_s27 }
 0x435   : > { %v1227_v19 = vpop.permute.xlu1 %1226 }
 0x436   : > { %v5993_v20 = vmul.f32 %v5357_v12, %v1227_v19 }
 0x438   : > { %1311 = vrot.lane.b32.xlu0 %v5993_v20, %s5747_s3 }
 0x4aa   : > { %v1312_v21 = vpop.permute.xlu0 %1311 }
 0x4ab   : > { %4953 = vmatmul.mubr.msk.f32.vlgmr.msra.gmra.mrb[4].mxu1 %vm735_vm1, %v1312_v21 }
 0x4ac   : > { %5202 = vmatpush3.bf16.msra.mxu1 %v5943_v38  ;;  %4966 = vmatprep.mubr.msk.f32.mxu1 %vm5744_vm4, %v5742_v24 }
 0x4ad   : > { %5206 = vmatprep.subr.bf16.mxu1 %v5743_v34 }
 0x57e   : > { %v1381_v22 = vpop.f32.mrb[4].mxu1 }
 0x57f   : > { %1386 = vrot.lane.b32.xlu1 %v1381_v22, %s5745_s19  ;;  %v4954_v23 = vpop.f32.mrb[5].mxu1 }
 0x5f1   : > { %v1387_v26 = vpop.permute.xlu1 %1386 }
 0x5f2   : > { %v1389_v27 = vadd.f32 %v1387_v26, %v1233_v25 }
 0x5f4   : > { %5360 = vtanh.f32 %v1389_v27  ;;  %v4714_v29 = vmul.f32 -1.442695, %v1389_v27 }
 0x5f6   : > { %5362 = vpow2.f32 %v4714_v29 }
 0x5fe   : > { %v5361_v28 = vpop.eup %5360 }
 0x5ff   : > { %1423 = vrot.lane.b32.xlu0 %v5361_v28, %s5746_s21 }
 0x600   : > { %v5363_v30 = vpop.eup %5362 }
 0x601   : > { %v1417_v31 = vadd.f32 1.0, %v5363_v30 }
 0x603   : > { %5364 = vrcp.f32 %v1417_v31 }
 0x60d   : > { %v5365_v32 = vpop.eup %5364 }
 0x60e   : > { %v1421_v36 = vmul.f32 %v5365_v32, %v1223_v17 }
 0x671   : > { %v1424_v33 = vpop.permute.xlu0 %1423 }
 0x672   : > { %v1426_v35 = vmul.f32 %v5365_v32, %v1424_v33 }
 0x674   : > { %1428 = vrot.lane.b32.xlu1 %v1426_v35, %s5747_s3 }
 0x6e6   : > { %v1429_v39 = vpop.permute.xlu1 %1428 }
 0x6e7   : > { %v1431_v40 = vadd.f32 %v1429_v39, %v1421_v36 }
 0x6e9   : > { %5366 = vtanh.f32 %v1431_v40 }
 0x6ea   : > { %5368 = vtanh.f32 %v1106_v41  ;;  %v1649_v41 = vld [vmem:[#allocation2 + $0xc] sm:$0x1] }
 0x6eb   : > { %5370 = vpow2.f32 %v4709_v44 }
 0x6f3   : > { %v5367_v42 = vpop.eup %5366 }
 0x6f4   : > { %1434 = vrot.lane.b32.xlu0 %v5367_v42, %s5748_s27  ;;  %v5369_v43 = vpop.eup %5368 }
 0x6f5   : > { %v5371_v45 = vpop.eup %5370 }
 0x6f6   : > { %v1185_v46 = vadd.f32 1.0, %v5371_v45 }
 0x6f8   : > { %1191 = vrot.lane.b32.xlu0 %v5369_v43, %s5746_s21  ;;  %5372 = vrcp.f32 %v1185_v46 }
 0x702   : > { %v5373_v49 = vpop.eup %5372 }
 0x703   : > { %v1189_v53 = vmul.f32 0.0, %v5373_v49 }
 0x766   : > { %v1435_v47 = vpop.permute.xlu0 %1434 }
 0x767   : > { %v6007_v48 = vmul.f32 %v5365_v32, %v1435_v47 }
 0x769   : > { %1519 = vrot.lane.b32.xlu1 %v6007_v48, %s5747_s3  ;;  %v1439_v23 = vadd.f32 %v6007_v48, %v5993_v20 }
 0x76a   : > { %v1192_v50 = vpop.permute.xlu0 %1191 }
 0x76b   : > { %v1194_v51 = vmul.f32 %v5373_v49, %v1192_v50 }
 0x76d   : > { %1196 = vrot.lane.b32.xlu1 %v1194_v51, %s5747_s3 }
 0x7db   : > { %v1520_v52 = vpop.permute.xlu1 %1519 }
 0x7dc   : > { %4967 = vmatmul.mubr.msk.f32.vlgmr.msra.gmra.mrb[6].mxu1 %vm735_vm1, %v1520_v52 }
 0x7dd   : > { %5208 = vmatpush3.bf16.msra.mxu1 %v5943_v38  ;;  %4980 = vmatprep.mubr.msk.f32.mxu1 %vm5744_vm4, %v5742_v24 }
 0x7de   : > { %5212 = vmatprep.subr.bf16.mxu1 %v5743_v34 }
 0x7df   : > { %v1197_v54 = vpop.permute.xlu1 %1196 }
 0x7e0   : > { %v1199_v55 = vadd.f32 %v1197_v54, %v1189_v53 }
 0x7e2   : > { %5374 = vtanh.f32 %v1199_v55 }
 0x7ec   : > { %v5375_v56 = vpop.eup %5374 }
 0x7ed   : > { %1202 = vrot.lane.b32.xlu1 %v5375_v56, %s5748_s27  ;;  %v1440_v56 = vld [vmem:[#allocation2 + $0x2] sm:$0x1] }
 0x85f   : > { %v1203_v57 = vpop.permute.xlu1 %1202 }
 0x860   : > { %v6019_v61 = vmul.f32 %v5373_v49, %v1203_v57 }
 0x8af   : > { %v1589_v59 = vpop.f32.mrb[6].mxu1 }
 0x8b0   : > { %1594 = vrot.lane.b32.xlu0 %v1589_v59, %s5745_s19  ;;  %v4968_v60 = vpop.f32.mrb[7].mxu1 }
 0x8b4   : > { %1235 = vrot.lane.b32.xlu0 %v6019_v61, %s5749_s23 }
 0x922   : > { %v1595_v63 = vpop.permute.xlu0 %1594 }
 0x923   : > { %v1597_v0 = vadd.f32 %v1595_v63, %v1441_v62 }
 0x925   : > { %5376 = vtanh.f32 %v1597_v0  ;;  %v4718_v3 = vmul.f32 -1.442695, %v1597_v0 }
 0x926   : > { %v1236_v1 = vpop.permute.xlu0 %1235 }
 0x927   : > { %4946 = vmatmul.mubr.msk.f32.vlgmr.msra.gmra.mrb[6].mxu0 %vm735_vm1, %v1236_v1  ;;  %5378 = vpow2.f32 %v4718_v3 }
 0x928   : > { %5199 = vmatpush3.bf16.msra.mxu0 %v5973_v58  ;;  %4959 = vmatprep.mubr.msk.f32.mxu0 %vm5744_vm4, %v5742_v24 }
 0x929   : > { %5203 = vmatprep.subr.bf16.mxu0 %v5743_v34 }
 0x92f   : > { %v5377_v2 = vpop.eup %5376 }
 0x930   : > { %1631 = vrot.lane.b32.xlu1 %v5377_v2, %s5746_s21 }
 0x931   : > { %v5379_v4 = vpop.eup %5378 }
 0x932   : > { %v1625_v5 = vadd.f32 1.0, %v5379_v4 }
 0x934   : > { %5380 = vrcp.f32 %v1625_v5 }
 0x93e   : > { %v5381_v6 = vpop.eup %5380 }
 0x93f   : > { %v1629_v11 = vmul.f32 %v5381_v6, %v1431_v40 }
 0x9a2   : > { %v1632_v7 = vpop.permute.xlu1 %1631 }
 0x9a3   : > { %v1634_v8 = vmul.f32 %v5381_v6, %v1632_v7 }
 0x9a5   : > { %1636 = vrot.lane.b32.xlu0 %v1634_v8, %s5747_s3 }
 0x9fa   : > { %v1305_v9 = vpop.f32.mrb[6].mxu0 }
 0x9fb   : > { %v4947_v10 = vpop.f32.mrb[7].mxu0  ;;  %v1309_v15 = vadd.f32 %v1305_v9, %v1232_v14 }
 0x9fd   : > { %v4713_v18 = vmul.f32 -1.442695, %v1309_v15 }
 0xa17   : > { %v1637_v12 = vpop.permute.xlu0 %1636 }
 0xa18   : > { %v1639_v13 = vadd.f32 %v1637_v12, %v1629_v11 }
 0xa1a   : > { %5382 = vtanh.f32 %v1639_v13 }
 0xa1b   : > { %5384 = vtanh.f32 %v1309_v15 }
 0xa1c   : > { %5386 = vpow2.f32 %v4713_v18 }
 0xa24   : > { %v5383_v16 = vpop.eup %5382 }
 0xa25   : > { %1642 = vrot.lane.b32.xlu1 %v5383_v16, %s5748_s27  ;;  %v5385_v17 = vpop.eup %5384 }
 0xa26   : > { %v5387_v19 = vpop.eup %5386 }
 0xa27   : > { %v1393_v21 = vadd.f32 1.0, %v5387_v19 }
 0xa29   : > { %1399 = vrot.lane.b32.xlu1 %v5385_v17, %s5746_s21  ;;  %5388 = vrcp.f32 %v1393_v21 }
 0xa33   : > { %v5389_v27 = vpop.eup %5388 }
 0xa34   : > { %v1397_v31 = vmul.f32 %v5389_v27, %v1199_v55 }
 0xa97   : > { %v1643_v22 = vpop.permute.xlu1 %1642 }
 0xa98   : > { %v1645_v25 = vmul.f32 %v5381_v6, %v1643_v22 }
 0xa9a   : > { %v6034_v26 = vadd.f32 %v1645_v25, %v1439_v23  ;;  %1727 = vrot.lane.b32.xlu0 %v1645_v25, %s5747_s3 }
 0xa9b   : > { %v1400_v28 = vpop.permute.xlu1 %1399 }
 0xa9c   : > { %v1402_v29 = vmul.f32 %v5389_v27, %v1400_v28 }
 0xa9e   : > { %1404 = vrot.lane.b32.xlu0 %v1402_v29, %s5747_s3 }
 0xb0c   : > { %v1728_v30 = vpop.permute.xlu0 %1727 }
 0xb0d   : > { %4981 = vmatmul.mubr.msk.f32.vlgmr.msra.gmra.mrb[8].mxu1 %vm735_vm1, %v1728_v30  ;;  %v1648_v30 = vld [vmem:[#allocation2 + $0x3] sm:$0x1] }
 0xb0e   : > { %5214 = vmatpush3.bf16.msra.mxu1 %v5943_v38  ;;  %4994 = vmatprep.mubr.msk.f32.mxu1 %vm5744_vm4, %v5742_v24 }
 0xb0f   : > { %5218 = vmatprep.subr.bf16.mxu1 %v5743_v34 }
 0xb10   : > { %v1405_v20 = vpop.permute.xlu0 %1404 }
 0xb11   : > { %v1407_v32 = vadd.f32 %v1405_v20, %v1397_v31 }
 0xb13   : > { %5390 = vtanh.f32 %v1407_v32 }
 0xb1d   : > { %v5391_v33 = vpop.eup %5390 }
 0xb1e   : > { %1410 = vrot.lane.b32.xlu1 %v5391_v33, %s5748_s27 }
 0xb90   : > { %v1411_v35 = vpop.permute.xlu1 %1410 }
 0xb91   : > { %v6044_v36 = vmul.f32 %v5389_v27, %v1411_v35 }
 0xb93   : > { %1443 = vrot.lane.b32.xlu1 %v6044_v36, %s5749_s23 }
 0xbe0   : > { %v1797_v37 = vpop.f32.mrb[8].mxu1 }
 0xbe1   : > { %1802 = vrot.lane.b32.xlu0 %v1797_v37, %s5745_s19  ;;  %v4982_v39 = vpop.f32.mrb[9].mxu1 }
 0xc05   : > { %v1444_v40 = vpop.permute.xlu1 %1443 }
 0xc06   : > { %4960 = vmatmul.mubr.msk.f32.vlgmr.msra.gmra.mrb[8].mxu0 %vm735_vm1, %v1444_v40 }
 0xc07   : > { %5205 = vmatpush3.bf16.msra.mxu0 %v5973_v58  ;;  %4973 = vmatprep.mubr.msk.f32.mxu0 %vm5744_vm4, %v5742_v24 }
 0xc08   : > { %5209 = vmatprep.subr.bf16.mxu0 %v5743_v34 }
 0xc53   : > { %v1803_v42 = vpop.permute.xlu0 %1802 }
 0xc54   : > { %v1805_v43 = vadd.f32 %v1803_v42, %v1649_v41 }
 0xc56   : > { %5392 = vtanh.f32 %v1805_v43  ;;  %v4722_v45 = vmul.f32 -1.442695, %v1805_v43 }
 0xc58   : > { %5394 = vpow2.f32 %v4722_v45 }
 0xc60   : > { %v5393_v44 = vpop.eup %5392 }
 0xc61   : > { %1839 = vrot.lane.b32.xlu0 %v5393_v44, %s5746_s21 }
 0xc62   : > { %v5395_v46 = vpop.eup %5394 }
 0xc63   : > { %v1833_v47 = vadd.f32 1.0, %v5395_v46 }
 0xc65   : > { %5396 = vrcp.f32 %v1833_v47 }
 0xc6f   : > { %v5397_v48 = vpop.eup %5396 }
 0xc70   : > { %v1837_v53 = vmul.f32 %v5397_v48, %v1639_v13  ;;  %v1438_v13 = vadd.f32 %v6044_v36, %v6019_v61  ;;  %v6083_v61 = vld [vmem:[#allocation2 + $0xb] sm:$0x1] }
 0xcd3   : > { %v1840_v49 = vpop.permute.xlu0 %1839 }
 0xcd4   : > { %v1842_v50 = vmul.f32 %v5397_v48, %v1840_v49 }
 0xcd6   : > { %1844 = vrot.lane.b32.xlu1 %v1842_v50, %s5747_s3 }
 0xcd9   : > { %v1513_v51 = vpop.f32.mrb[8].mxu0 }
 0xcda   : > { %v4961_v52 = vpop.f32.mrb[9].mxu0  ;;  %v1517_v57 = vadd.f32 %v1513_v51, %v1440_v56 }
 0xcdc   : > { %v4717_v62 = vmul.f32 -1.442695, %v1517_v57 }
 0xd48   : > { %v1845_v54 = vpop.permute.xlu1 %1844 }
 0xd49   : > { %v6056_v55 = vadd.f32 %v1845_v54, %v1837_v53 }
 0xd4b   : > { %5398 = vtanh.f32 %v6056_v55 }
 0xd4c   : > { %5400 = vtanh.f32 %v1517_v57 }
 0xd4d   : > { %5402 = vpow2.f32 %v4717_v62  ;;  %v6113_v62 = vld [vmem:[#allocation2 + $0xa] sm:$0x1] }
 0xd55   : > { %v5399_v59 = vpop.eup %5398 }
 0xd56   : > { %1850 = vrot.lane.b32.xlu0 %v5399_v59, %s5748_s27  ;;  %v5401_v60 = vpop.eup %5400 }
 0xd57   : > { %v5403_v63 = vpop.eup %5402 }
 0xd58   : > { %v1601_v0 = vadd.f32 1.0, %v5403_v63 }
 0xd5a   : > { %1607 = vrot.lane.b32.xlu0 %v5401_v60, %s5746_s21  ;;  %5404 = vrcp.f32 %v1601_v0 }
 0xd64   : > { %v5405_v4 = vpop.eup %5404 }
 0xd65   : > { %v1605_v8 = vmul.f32 %v5405_v4, %v1407_v32 }
 0xdc8   : > { %v1851_v1 = vpop.permute.xlu0 %1850 }
 0xdc9   : > { %v1853_v2 = vmul.f32 %v5397_v48, %v1851_v1 }
 0xdcb   : > { %v6062_v3 = vadd.f32 %v1853_v2, %v6034_v26  ;;  %1935 = vrot.lane.b32.xlu1 %v1853_v2, %s5747_s3  ;;  %v6117_v2 = vld [vmem:[#allocation2 + $0x4] sm:$0x1] }
 0xdcc   : > { %v1608_v5 = vpop.permute.xlu0 %1607 }
 0xdcd   : > { %v1610_v6 = vmul.f32 %v5405_v4, %v1608_v5 }
 0xdcf   : > { %1612 = vrot.lane.b32.xlu1 %v1610_v6, %s5747_s3 }
 0xe3d   : > { %v1936_v7 = vpop.permute.xlu1 %1935 }
 0xe3e   : > { %4995 = vmatmul.mubr.msk.f32.vlgmr.msra.gmra.mrb[10].mxu1 %vm735_vm1, %v1936_v7 }
 0xe3f   : > { %5220 = vmatpush3.bf16.msra.mxu1 %v5943_v38  ;;  %5008 = vmatprep.mubr.msk.f32.mxu1 %vm5744_vm4, %v5742_v24 }
 0xe40   : > { %5224 = vmatprep.subr.bf16.mxu1 %v5743_v34 }
 0xe41   : > { %v1613_v9 = vpop.permute.xlu1 %1612 }
 0xe42   : > { %v1615_v10 = vadd.f32 %v1613_v9, %v1605_v8 }
 0xe44   : > { %5406 = vtanh.f32 %v1615_v10 }
 0xe4e   : > { %v5407_v11 = vpop.eup %5406 }
 0xe4f   : > { %1618 = vrot.lane.b32.xlu0 %v5407_v11, %s5748_s27 }
 0xec1   : > { %v1619_v12 = vpop.permute.xlu0 %1618 }
 0xec2   : > { %v1621_v14 = vmul.f32 %v5405_v4, %v1619_v12 }
 0xec4   : > { %v6074_v15 = vadd.f32 %v1621_v14, %v1438_v13  ;;  %1651 = vrot.lane.b32.xlu1 %v1621_v14, %s5749_s23 }
 0xf11   : > { %v2005_v16 = vpop.f32.mrb[10].mxu1 }
 0xf12   : > { %2010 = vrot.lane.b32.xlu0 %v2005_v16, %s5745_s19  ;;  %v4996_v17 = vpop.f32.mrb[11].mxu1 }
 0xf36   : > { %v1652_v18 = vpop.permute.xlu1 %1651 }
 0xf37   : > { %4974 = vmatmul.mubr.msk.f32.vlgmr.msra.gmra.mrb[10].mxu0 %vm735_vm1, %v1652_v18 }
 0xf38   : > { %5211 = vmatpush3.bf16.msra.mxu0 %v5973_v58  ;;  %4987 = vmatprep.mubr.msk.f32.mxu0 %vm5744_vm4, %v5742_v24 }
 0xf39   : > { %5215 = vmatprep.subr.bf16.mxu0 %v5743_v34 }
 0xf84   : > { %v2011_v19 = vpop.permute.xlu0 %2010 }
 0xf85   : > { %v2013_v21 = vadd.f32 %v2011_v19, %v6083_v61 }
 0xf87   : > { %5408 = vtanh.f32 %v2013_v21  ;;  %v4726_v23 = vmul.f32 -1.442695, %v2013_v21 }
 0xf89   : > { %5410 = vpow2.f32 %v4726_v23 }
 0xf91   : > { %v5409_v22 = vpop.eup %5408 }
 0xf92   : > { %2047 = vrot.lane.b32.xlu1 %v5409_v22, %s5746_s21 }
 0xf93   : > { %v5411_v25 = vpop.eup %5410 }
 0xf94   : > { %v2041_v26 = vadd.f32 1.0, %v5411_v25 }
 0xf96   : > { %5412 = vrcp.f32 %v2041_v26 }
 0xfa0   : > { %v5413_v27 = vpop.eup %5412 }
 0xfa1   : > { %v2045_v36 = vmul.f32 %v5413_v27, %v6056_v55 }
0x1004   : > { %v2048_v28 = vpop.permute.xlu1 %2047 }
0x1005   : > { %v2050_v29 = vmul.f32 %v5413_v27, %v2048_v28 }
0x1007   : > { %2052 = vrot.lane.b32.xlu0 %v2050_v29, %s5747_s3 }
0x100a   : > { %v1721_v31 = vpop.f32.mrb[10].mxu0 }
0x100b   : > { %v1725_v20 = vadd.f32 %v1721_v31, %v1648_v30  ;;  %v4975_v32 = vpop.f32.mrb[11].mxu0 }
0x100d   : > { %5414 = vtanh.f32 %v1725_v20  ;;  %v4721_v35 = vmul.f32 -1.442695, %v1725_v20 }
0x100f   : > { %5416 = vpow2.f32 %v4721_v35 }
0x1017   : > { %v5415_v33 = vpop.eup %5414 }
0x1018   : > { %1815 = vrot.lane.b32.xlu0 %v5415_v33, %s5746_s21 }
0x1019   : > { %v5417_v37 = vpop.eup %5416 }
0x101a   : > { %v1809_v41 = vadd.f32 1.0, %v5417_v37 }
0x1079   : > { %v2053_v39 = vpop.permute.xlu0 %2052 }
0x107a   : > { %v6090_v40 = vadd.f32 %v2053_v39, %v2045_v36 }
0x107c   : > { %5418 = vtanh.f32 %v6090_v40 }
0x107d   : > { %5420 = vrcp.f32 %v1809_v41 }
0x1086   : > { %v5419_v42 = vpop.eup %5418 }
0x1087   : > { %2058 = vrot.lane.b32.xlu1 %v5419_v42, %s5748_s27  ;;  %v5421_v43 = vpop.eup %5420 }
0x1088   : > { %v1813_v49 = vmul.f32 %v5421_v43, %v1615_v10 }
0x108a   : > { %v1816_v44 = vpop.permute.xlu0 %1815 }
0x108b   : > { %v1818_v45 = vmul.f32 %v5421_v43, %v1816_v44 }
0x108d   : > { %1820 = vrot.lane.b32.xlu0 %v1818_v45, %s5747_s3  ;;  %v6149_v45 = vld [vmem:[#allocation2 + $0x9] sm:$0x1] }
0x10f9   : > { %v2059_v46 = vpop.permute.xlu1 %2058 }
0x10fa   : > { %v2061_v47 = vmul.f32 %v5413_v27, %v2059_v46 }
0x10fc   : > { %v6096_v48 = vadd.f32 %v2061_v47, %v6062_v3  ;;  %2143 = vrot.lane.b32.xlu1 %v2061_v47, %s5747_s3 }
0x10ff   : > { %v1821_v50 = vpop.permute.xlu0 %1820 }
0x1100   : > { %v1823_v51 = vadd.f32 %v1821_v50, %v1813_v49 }
0x1102   : > { %5422 = vtanh.f32 %v1823_v51 }
0x110c   : > { %v5423_v52 = vpop.eup %5422 }
0x110d   : > { %1826 = vrot.lane.b32.xlu1 %v5423_v52, %s5748_s27 }
0x116e   : > { %v2144_v53 = vpop.permute.xlu1 %2143 }
0x116f   : > { %5009 = vmatmul.mubr.msk.f32.vlgmr.msra.gmra.mrb[12].mxu1 %vm735_vm1, %v2144_v53 }
0x1170   : > { %5226 = vmatpush3.bf16.msra.mxu1 %v5943_v38  ;;  %5022 = vmatprep.mubr.msk.f32.mxu1 %vm5744_vm4, %v5742_v24 }
0x1171   : > { %5230 = vmatprep.subr.bf16.mxu1 %v5743_v34 }
0x117f   : > { %v1827_v54 = vpop.permute.xlu1 %1826 }
0x1180   : > { %v1829_v55 = vmul.f32 %v5421_v43, %v1827_v54 }
0x1182   : > { %v1854_v56 = vadd.f32 %v1829_v55, %v6074_v15  ;;  %1859 = vrot.lane.b32.xlu0 %v1829_v55, %s5749_s23 }
0x11f4   : > { %v1860_v57 = vpop.permute.xlu0 %1859 }
0x11f5   : > { %4988 = vmatmul.mubr.msk.f32.vlgmr.msra.gmra.mrb[12].mxu0 %vm735_vm1, %v1860_v57 }
0x11f6   : > { %5217 = vmatpush3.bf16.msra.mxu0 %v5973_v58  ;;  %5001 = vmatprep.mubr.msk.f32.mxu0 %vm5744_vm4, %v5742_v24 }
0x11f7   : > { %5221 = vmatprep.subr.bf16.mxu0 %v5743_v34 }
0x1242   : > { %v2213_v59 = vpop.f32.mrb[12].mxu1 }
0x1243   : > { %2218 = vrot.lane.b32.xlu1 %v2213_v59, %s5745_s19  ;;  %v5010_v60 = vpop.f32.mrb[13].mxu1 }
0x12b5   : > { %v2219_v63 = vpop.permute.xlu1 %2218 }
0x12b6   : > { %v2221_v0 = vadd.f32 %v2219_v63, %v6113_v62 }
0x12b8   : > { %5424 = vtanh.f32 %v2221_v0  ;;  %v4730_v7 = vmul.f32 -1.442695, %v2221_v0 }
0x12c2   : > { %v5425_v1 = vpop.eup %5424 }
0x12c3   : > { %2255 = vrot.lane.b32.xlu0 %v5425_v1, %s5746_s21 }
0x12c8   : > { %v1929_v3 = vpop.f32.mrb[12].mxu0 }
0x12c9   : > { %v1933_v4 = vadd.f32 %v1929_v3, %v6117_v2  ;;  %v4989_v5 = vpop.f32.mrb[13].mxu0 }
0x12cb   : > { %5426 = vtanh.f32 %v1933_v4  ;;  %v4725_v10 = vmul.f32 -1.442695, %v1933_v4 }
0x12cc   : > { %5428 = vpow2.f32 %v4730_v7 }
0x12d5   : > { %v5427_v6 = vpop.eup %5426 }
0x12d6   : > { %2023 = vrot.lane.b32.xlu0 %v5427_v6, %s5746_s21  ;;  %v5429_v8 = vpop.eup %5428 }
0x12d7   : > { %v2249_v9 = vadd.f32 1.0, %v5429_v8 }
0x12d9   : > { %5430 = vrcp.f32 %v2249_v9 }
0x12da   : > { %5432 = vpow2.f32 %v4725_v10 }
0x12e3   : > { %v5431_v11 = vpop.eup %5430 }
0x12e4   : > { %v5433_v14 = vpop.eup %5432  ;;  %v2253_v19 = vmul.f32 %v5431_v11, %v6090_v40  ;;  %v6145_v40 = vld [vmem:[#allocation2 + $0x5] sm:$0x1] }
0x12e5   : > { %v2017_v15 = vadd.f32 1.0, %v5433_v14 }
0x12e7   : > { %5434 = vrcp.f32 %v2017_v15 }
0x12f1   : > { %v5435_v16 = vpop.eup %5434 }
0x12f2   : > { %v2021_v25 = vmul.f32 %v5435_v16, %v1823_v51 }
0x1335   : > { %v2256_v12 = vpop.permute.xlu0 %2255 }
0x1336   : > { %v2258_v13 = vmul.f32 %v5431_v11, %v2256_v12 }
0x1338   : > { %2260 = vrot.lane.b32.xlu1 %v2258_v13, %s5747_s3 }
0x1348   : > { %v2024_v17 = vpop.permute.xlu0 %2023 }
0x1349   : > { %v2026_v18 = vmul.f32 %v5435_v16, %v2024_v17  ;;  %v6176_v17 = vld [vmem:[#allocation2 + $0x6] sm:$0x1] }
0x134b   : > { %2028 = vrot.lane.b32.xlu0 %v2026_v18, %s5747_s3 }
0x13aa   : > { %v2261_v21 = vpop.permute.xlu1 %2260 }
0x13ab   : > { %v6124_v22 = vadd.f32 %v2261_v21, %v2253_v19 }
0x13ad   : > { %5436 = vtanh.f32 %v6124_v22 }
0x13b7   : > { %v5437_v23 = vpop.eup %5436 }
0x13b8   : > { %2266 = vrot.lane.b32.xlu1 %v5437_v23, %s5748_s27 }
0x13bd   : > { %v2029_v26 = vpop.permute.xlu0 %2028 }
0x13be   : > { %v2031_v27 = vadd.f32 %v2029_v26, %v2021_v25 }
0x13c0   : > { %5438 = vtanh.f32 %v2031_v27 }
0x13ca   : > { %v5439_v28 = vpop.eup %5438 }
0x13cb   : > { %2034 = vrot.lane.b32.xlu0 %v5439_v28, %s5748_s27 }
0x142a   : > { %v2267_v29 = vpop.permute.xlu1 %2266 }
0x142b   : > { %v2269_v30 = vmul.f32 %v5431_v11, %v2267_v29 }
0x142d   : > { %v6130_v31 = vadd.f32 %v2269_v30, %v6096_v48  ;;  %2351 = vrot.lane.b32.xlu1 %v2269_v30, %s5747_s3 }
0x143d   : > { %v2035_v20 = vpop.permute.xlu0 %2034 }
0x143e   : > { %v2037_v32 = vmul.f32 %v5435_v16, %v2035_v20  ;;  %v6182_v20 = vld [vmem:[#allocation2 + $0x8] sm:$0x1] }
0x1440   : > { %v2062_v33 = vadd.f32 %v2037_v32, %v1854_v56  ;;  %2067 = vrot.lane.b32.xlu1 %v2037_v32, %s5749_s23 }
0x149f   : > { %v2352_v35 = vpop.permute.xlu1 %2351 }
0x14a0   : > { %5023 = vmatmul.mubr.msk.f32.vlgmr.msra.gmra.mrb[14].mxu1 %vm735_vm1, %v2352_v35 }
0x14a1   : > { %5232 = vmatpush3.bf16.msra.mxu1 %v5943_v38  ;;  %5036 = vmatprep.mubr.msk.f32.mxu1 %vm5744_vm4, %v5742_v24 }
0x14a2   : > { %5236 = vmatprep.subr.bf16.mxu1 %v5743_v34 }
0x14b2   : > { %v2068_v36 = vpop.permute.xlu1 %2067 }
0x14b3   : > { %5002 = vmatmul.mubr.msk.f32.vlgmr.msra.gmra.mrb[14].mxu0 %vm735_vm1, %v2068_v36 }
0x14b4   : > { %5223 = vmatpush3.bf16.msra.mxu0 %v5973_v58  ;;  %5015 = vmatprep.mubr.msk.f32.mxu0 %vm5744_vm4, %v5742_v24 }
0x14b5   : > { %5227 = vmatprep.subr.bf16.mxu0 %v5743_v34 }
0x1573   : > { %v2421_v37 = vpop.f32.mrb[14].mxu1 }
0x1574   : > { %2426 = vrot.lane.b32.xlu0 %v2421_v37, %s5745_s19  ;;  %v5024_v39 = vpop.f32.mrb[15].mxu1 }
0x1586   : > { %v2137_v41 = vpop.f32.mrb[14].mxu0 }
0x1587   : > { %v2141_v42 = vadd.f32 %v2137_v41, %v6145_v40  ;;  %v5003_v43 = vpop.f32.mrb[15].mxu0 }
0x1589   : > { %5440 = vtanh.f32 %v2141_v42  ;;  %v4729_v47 = vmul.f32 -1.442695, %v2141_v42 }
0x1593   : > { %v5441_v44 = vpop.eup %5440 }
0x1594   : > { %2231 = vrot.lane.b32.xlu0 %v5441_v44, %s5746_s21 }
0x15e6   : > { %v2427_v46 = vpop.permute.xlu0 %2426 }
0x15e7   : > { %v2429_v48 = vadd.f32 %v2427_v46, %v6149_v45 }
0x15e9   : > { %5442 = vtanh.f32 %v2429_v48  ;;  %v4734_v55 = vmul.f32 -1.442695, %v2429_v48 }
0x15ea   : > { %5444 = vpow2.f32 %v4729_v47 }
0x15f3   : > { %v5443_v49 = vpop.eup %5442 }
0x15f4   : > { %2463 = vrot.lane.b32.xlu1 %v5443_v49, %s5746_s21  ;;  %v5445_v50 = vpop.eup %5444 }
0x15f5   : > { %v2225_v51 = vadd.f32 1.0, %v5445_v50 }
0x15f7   : > { %5446 = vrcp.f32 %v2225_v51 }
0x15f8   : > { %5448 = vpow2.f32 %v4734_v55 }
0x1601   : > { %v5447_v52 = vpop.eup %5446 }
0x1602   : > { %v5449_v56 = vpop.eup %5448  ;;  %v2229_v0 = vmul.f32 %v5447_v52, %v2031_v27 }
0x1603   : > { %v2457_v57 = vadd.f32 1.0, %v5449_v56 }
0x1605   : > { %5450 = vrcp.f32 %v2457_v57 }
0x1606   : > { %v2232_v53 = vpop.permute.xlu0 %2231 }
0x1607   : > { %v2234_v54 = vmul.f32 %v5447_v52, %v2232_v53 }
0x1609   : > { %2236 = vrot.lane.b32.xlu0 %v2234_v54, %s5747_s3 }
0x160f   : > { %v5451_v59 = vpop.eup %5450 }
0x1610   : > { %v2461_v5 = vmul.f32 %v5451_v59, %v6124_v22 }
0x1666   : > { %v2464_v60 = vpop.permute.xlu1 %2463 }
0x1667   : > { %v2466_v63 = vmul.f32 %v5451_v59, %v2464_v60 }
0x1669   : > { %2468 = vrot.lane.b32.xlu1 %v2466_v63, %s5747_s3 }
0x167b   : > { %v2237_v1 = vpop.permute.xlu0 %2236 }
0x167c   : > { %v2239_v3 = vadd.f32 %v2237_v1, %v2229_v0  ;;  %v2480_v0 = vld [vmem:[#allocation2 + $0x7] sm:$0x1] }
0x167e   : > { %5452 = vtanh.f32 %v2239_v3 }
0x1688   : > { %v5453_v4 = vpop.eup %5452 }
0x1689   : > { %2242 = vrot.lane.b32.xlu0 %v5453_v4, %s5748_s27 }
0x16db   : > { %v2469_v6 = vpop.permute.xlu1 %2468 }
0x16dc   : > { %v6157_v7 = vadd.f32 %v2469_v6, %v2461_v5 }
0x16de   : > { %5454 = vtanh.f32 %v6157_v7 }
0x16e8   : > { %v5455_v8 = vpop.eup %5454 }
0x16e9   : > { %2474 = vrot.lane.b32.xlu1 %v5455_v8, %s5748_s27 }
0x16fb   : > { %v2243_v9 = vpop.permute.xlu0 %2242 }
0x16fc   : > { %v2245_v10 = vmul.f32 %v5447_v52, %v2243_v9 }
0x16fe   : > { %v2270_v11 = vadd.f32 %v2245_v10, %v2062_v33  ;;  %2275 = vrot.lane.b32.xlu0 %v2245_v10, %s5749_s23 }
0x175b   : > { %v2475_v12 = vpop.permute.xlu1 %2474 }
0x175c   : > { %v2477_v13 = vmul.f32 %v5451_v59, %v2475_v12 }
0x175e   : > { %v6163_v14 = vadd.f32 %v2477_v13, %v6130_v31  ;;  %2559 = vrot.lane.b32.xlu1 %v2477_v13, %s5747_s3 }
0x1770   : > { %v2276_v15 = vpop.permute.xlu0 %2275 }
0x1771   : > { %5016 = vmatmul.mubr.msk.f32.vlgmr.msra.gmra.mrb[16].mxu0 %vm735_vm1, %v2276_v15 }
0x1772   : > { %5229 = vmatpush3.bf16.msra.mxu0 %v5973_v58  ;;  %5029 = vmatprep.mubr.msk.f32.mxu0 %vm5744_vm4, %v5742_v24 }
0x1773   : > { %5233 = vmatprep.subr.bf16.mxu0 %v5743_v34 }
0x17d0   : > { %v2560_v16 = vpop.permute.xlu1 %2559 }
0x17d1   : > { %5037 = vmatmul.mubr.msk.f32.vlgmr.msra.gmra.mrb[16].mxu1 %vm735_vm1, %v2560_v16 }
0x17d2   : > { %5238 = vmatpush3.bf16.msra.mxu1 %v5943_v38  ;;  %5050 = vmatprep.mubr.msk.f32.mxu1 %vm5744_vm4, %v5742_v24 }
0x17d3   : > { %5242 = vmatprep.subr.bf16.mxu1 %v5743_v34 }
0x1844   : > { %v2345_v18 = vpop.f32.mrb[16].mxu0 }
0x1845   : > { %v2349_v19 = vadd.f32 %v2345_v18, %v6176_v17  ;;  %v5017_v21 = vpop.f32.mrb[17].mxu0 }
0x1847   : > { %5456 = vtanh.f32 %v2349_v19  ;;  %v4733_v25 = vmul.f32 -1.442695, %v2349_v19 }
0x1849   : > { %5458 = vpow2.f32 %v4733_v25 }
0x1851   : > { %v5457_v22 = vpop.eup %5456 }
0x1852   : > { %2439 = vrot.lane.b32.xlu0 %v5457_v22, %s5746_s21 }
0x1853   : > { %v5459_v27 = vpop.eup %5458 }
0x1854   : > { %v2433_v28 = vadd.f32 1.0, %v5459_v27 }
0x1856   : > { %5460 = vrcp.f32 %v2433_v28 }
0x1860   : > { %v5461_v29 = vpop.eup %5460 }
0x1861   : > { %v2437_v36 = vmul.f32 %v5461_v29, %v2239_v3 }
0x18a4   : > { %v2629_v23 = vpop.f32.mrb[16].mxu1 }
0x18a5   : > { %2634 = vrot.lane.b32.xlu1 %v2629_v23, %s5745_s19  ;;  %v5038_v26 = vpop.f32.mrb[17].mxu1 }
0x18c4   : > { %v2440_v30 = vpop.permute.xlu0 %2439 }
0x18c5   : > { %v2442_v31 = vmul.f32 %v5461_v29, %v2440_v30 }
0x18c7   : > { %2444 = vrot.lane.b32.xlu0 %v2442_v31, %s5747_s3 }
0x1917   : > { %v2635_v32 = vpop.permute.xlu1 %2634 }
0x1918   : > { %v2637_v33 = vadd.f32 %v2635_v32, %v6182_v20 }
0x191a   : > { %5462 = vtanh.f32 %v2637_v33  ;;  %v4738_v42 = vmul.f32 -1.442695, %v2637_v33 }
0x1924   : > { %v5463_v35 = vpop.eup %5462 }
0x1925   : > { %2671 = vrot.lane.b32.xlu1 %v5463_v35, %s5746_s21 }
0x1939   : > { %v2445_v37 = vpop.permute.xlu0 %2444 }
0x193a   : > { %v2447_v39 = vadd.f32 %v2445_v37, %v2437_v36 }
0x193c   : > { %5464 = vtanh.f32 %v2447_v39 }
0x193d   : > { %5466 = vpow2.f32 %v4738_v42 }
0x1946   : > { %v5465_v41 = vpop.eup %5464 }
0x1947   : > { %2450 = vrot.lane.b32.xlu0 %v5465_v41, %s5748_s27  ;;  %v5467_v43 = vpop.eup %5466 }
0x1948   : > { %v2665_v44 = vadd.f32 1.0, %v5467_v43 }
0x194a   : > { %5468 = vrcp.f32 %v2665_v44 }
0x1954   : > { %v5469_v46 = vpop.eup %5468 }
0x1955   : > { %v2669_v52 = vmul.f32 %v5469_v46, %v6157_v7 }
0x1997   : > { %v2672_v47 = vpop.permute.xlu1 %2671 }
0x1998   : > { %v2674_v48 = vmul.f32 %v5469_v46, %v2672_v47 }
0x199a   : > { %2676 = vrot.lane.b32.xlu1 %v2674_v48, %s5747_s3 }
0x19b9   : > { %v2451_v49 = vpop.permute.xlu0 %2450 }
0x19ba   : > { %v2453_v50 = vmul.f32 %v5461_v29, %v2451_v49 }
0x19bc   : > { %v6188_v51 = vadd.f32 %v2453_v50, %v2270_v11  ;;  %2483 = vrot.lane.b32.xlu0 %v2453_v50, %s5749_s23 }
0x1a0c   : > { %v2677_v53 = vpop.permute.xlu1 %2676 }
0x1a0d   : > { %v2679_v54 = vadd.f32 %v2677_v53, %v2669_v52 }
0x1a0f   : > { %5470 = vtanh.f32 %v2679_v54 }
0x1a19   : > { %v5471_v55 = vpop.eup %5470 }
0x1a1a   : > { %2682 = vrot.lane.b32.xlu1 %v5471_v55, %s5748_s27 }
0x1a2e   : > { %v2484_v56 = vpop.permute.xlu0 %2483 }
0x1a2f   : > { %5030 = vmatmul.mubr.msk.f32.vlgmr.msra.gmra.mrb[18].mxu0 %vm735_vm1, %v2484_v56 }
0x1a30   : > { %5235 = vmatpush3.bf16.msra.mxu0 %v5973_v58  ;;  %5043 = vmatprep.mubr.msk.f32.mxu0 %vm5744_vm4, %v5742_v24 }
0x1a31   : > { %5239 = vmatprep.subr.bf16.mxu0 %v5743_v34 }
0x1a8c   : > { %v2683_v57 = vpop.permute.xlu1 %2682 }
0x1a8d   : > { %v2685_v59 = vmul.f32 %v5469_v46, %v2683_v57 }
0x1a8f   : > { %v6199_v60 = vadd.f32 %v2685_v59, %v6163_v14  ;;  %2765 = vrot.lane.b32.xlu1 %v2685_v59, %s5747_s3 }
0x1b01   : > { %v2766_v63 = vpop.permute.xlu1 %2765 }
0x1b02   : > { %v2553_v1 = vpop.f32.mrb[18].mxu0  ;;  %5051 = vmatmul.mubr.msk.f32.vlgmr.msra.gmra.mrb[18].mxu1 %vm735_vm1, %v2766_v63 }
0x1b03   : > { %v2557_v3 = vadd.f32 %v2553_v1, %v2480_v0  ;;  %v5031_v4 = vpop.f32.mrb[19].mxu0  ;;  %5244 = vmatpush3.bf16.msra.mxu1 %v5943_v38  ;;  %5064 = vmatprep.mubr.msk.f32.mxu1 %vm5744_vm4, %v5742_v24 }
0x1b04   : > { %5248 = vmatprep.subr.bf16.mxu1 %v5743_v34 }
0x1b05   : > { %5472 = vtanh.f32 %v2557_v3  ;;  %v4737_v6 = vmul.f32 -1.442695, %v2557_v3 }
0x1b07   : > { %5474 = vpow2.f32 %v4737_v6 }
0x1b0f   : > { %v5473_v5 = vpop.eup %5472 }
0x1b10   : > { %2647 = vrot.lane.b32.xlu1 %v5473_v5, %s5746_s21 }
0x1b11   : > { %v5475_v7 = vpop.eup %5474 }
0x1b12   : > { %v2641_v8 = vadd.f32 1.0, %v5475_v7 }
0x1b14   : > { %5476 = vrcp.f32 %v2641_v8 }
0x1b1e   : > { %v5477_v12 = vpop.eup %5476 }
0x1b1f   : > { %v2645_v16 = vmul.f32 %v5477_v12, %v2447_v39 }
0x1b82   : > { %v2648_v9 = vpop.permute.xlu1 %2647 }
0x1b83   : > { %v2650_v13 = vmul.f32 %v5477_v12, %v2648_v9 }
0x1bd5   : > { %v2835_v10 = vpop.f32.mrb[18].mxu1 }
0x1bd6   : > { %2840 = vrot.lane.b32.xlu0 %v2835_v10, %s5745_s19  ;;  %v5052_v11 = vpop.f32.mrb[19].mxu1 }
0x1bda   : > { %2652 = vrot.lane.b32.xlu0 %v2650_v13, %s5747_s3 }
0x1c48   : > { %v2841_v14 = vpop.permute.xlu0 %2840 }
0x1c49   : > { %v2843_v15 = vadd.f32 %v2841_v14, %v2480_v0 }
0x1c4b   : > { %5478 = vtanh.f32 %v2843_v15  ;;  %v4742_v23 = vmul.f32 -1.442695, %v2843_v15 }
0x1c4c   : > { %v2653_v18 = vpop.permute.xlu0 %2652 }
0x1c4d   : > { %v2655_v19 = vadd.f32 %v2653_v18, %v2645_v16 }
0x1c4f   : > { %5480 = vtanh.f32 %v2655_v19 }
0x1c50   : > { %5482 = vpow2.f32 %v4742_v23 }
0x1c55   : > { %v5479_v21 = vpop.eup %5478 }
0x1c56   : > { %2877 = vrot.lane.b32.xlu1 %v5479_v21, %s5746_s21 }
0x1c59   : > { %v5481_v22 = vpop.eup %5480 }
0x1c5a   : > { %2658 = vrot.lane.b32.xlu1 %v5481_v22, %s5748_s27  ;;  %v5483_v25 = vpop.eup %5482 }
0x1c5b   : > { %v2871_v26 = vadd.f32 1.0, %v5483_v25 }
0x1c5d   : > { %5484 = vrcp.f32 %v2871_v26 }
0x1c67   : > { %v5485_v27 = vpop.eup %5484 }
0x1c68   : > { %v2875_v33 = vmul.f32 %v5485_v27, %v2679_v54 }
0x1cc8   : > { %v2878_v28 = vpop.permute.xlu1 %2877 }
0x1cc9   : > { %v2880_v29 = vmul.f32 %v5485_v27, %v2878_v28 }
0x1ccb   : > { %2882 = vrot.lane.b32.xlu0 %v2880_v29, %s5747_s3 }
0x1ccc   : > { %v2659_v30 = vpop.permute.xlu1 %2658 }
0x1ccd   : > { %v2661_v31 = vmul.f32 %v5477_v12, %v2659_v30 }
0x1ccf   : > { %v2686_v32 = vadd.f32 %v2661_v31, %v6188_v51  ;;  %2689 = vrot.lane.b32.xlu0 %v2661_v31, %s5749_s23 }
0x1d3d   : > { %v2883_v35 = vpop.permute.xlu0 %2882 }
0x1d3e   : > { %v6215_v36 = vadd.f32 %v2883_v35, %v2875_v33 }
0x1d40   : > { %5486 = vtanh.f32 %v6215_v36 }
0x1d41   : > { %v2690_v37 = vpop.permute.xlu0 %2689 }
0x1d42   : > { %5044 = vmatmul.mubr.msk.f32.vlgmr.msra.gmra.mrb[20].mxu0 %vm735_vm1, %v2690_v37 }
0x1d43   : > { %5241 = vmatpush3.bf16.msra.mxu0 %v5973_v58  ;;  %5057 = vmatprep.mubr.msk.f32.mxu0 %vm5744_vm4, %v5742_v24 }
0x1d44   : > { %5245 = vmatprep.subr.bf16.mxu0 %v5743_v34 }
0x1d4a   : > { %v5487_v39 = vpop.eup %5486 }
0x1d4b   : > { %2888 = vrot.lane.b32.xlu1 %v5487_v39, %s5748_s27 }
0x1dbd   : > { %v2889_v41 = vpop.permute.xlu1 %2888 }
0x1dbe   : > { %v2891_v42 = vmul.f32 %v5485_v27, %v2889_v41 }
0x1dc0   : > { %v6225_v43 = vadd.f32 %v2891_v42, %v6199_v60  ;;  %2971 = vrot.lane.b32.xlu0 %v2891_v42, %s5747_s3 }
0x1e15   : > { %v2759_v44 = vpop.f32.mrb[20].mxu0 }
0x1e16   : > { %v2763_v46 = vadd.f32 %v2759_v44, %v6182_v20  ;;  %v5045_v47 = vpop.f32.mrb[21].mxu0 }
0x1e18   : > { %5488 = vtanh.f32 %v2763_v46  ;;  %v4741_v50 = vmul.f32 -1.442695, %v2763_v46 }
0x1e1a   : > { %5490 = vpow2.f32 %v4741_v50 }
0x1e22   : > { %v5489_v48 = vpop.eup %5488 }
0x1e23   : > { %2853 = vrot.lane.b32.xlu1 %v5489_v48, %s5746_s21 }
0x1e24   : > { %v5491_v51 = vpop.eup %5490 }
0x1e25   : > { %v2847_v52 = vadd.f32 1.0, %v5491_v51 }
0x1e27   : > { %5492 = vrcp.f32 %v2847_v52 }
0x1e31   : > { %v5493_v20 = vpop.eup %5492 }
0x1e32   : > { %v2972_v49 = vpop.permute.xlu0 %2971  ;;  %v2851_v57 = vmul.f32 %v5493_v20, %v2655_v19 }
0x1e33   : > { %5065 = vmatmul.mubr.msk.f32.vlgmr.msra.gmra.mrb[20].mxu1 %vm735_vm1, %v2972_v49 }
0x1e34   : > { %5250 = vmatpush3.bf16.msra.mxu1 %v5943_v38  ;;  %5078 = vmatprep.mubr.msk.f32.mxu1 %vm5744_vm4, %v5742_v24 }
0x1e35   : > { %5254 = vmatprep.subr.bf16.mxu1 %v5743_v34 }
0x1e95   : > { %v2854_v53 = vpop.permute.xlu1 %2853 }
0x1e96   : > { %v2856_v54 = vmul.f32 %v5493_v20, %v2854_v53 }
0x1e98   : > { %2858 = vrot.lane.b32.xlu1 %v2856_v54, %s5747_s3 }
0x1f06   : > { %v3041_v55 = vpop.f32.mrb[20].mxu1 }
0x1f07   : > { %3046 = vrot.lane.b32.xlu0 %v3041_v55, %s5745_s19  ;;  %v5066_v56 = vpop.f32.mrb[21].mxu1 }
0x1f0a   : > { %v2859_v59 = vpop.permute.xlu1 %2858 }
0x1f0b   : > { %v2861_v60 = vadd.f32 %v2859_v59, %v2851_v57 }
0x1f0d   : > { %5494 = vtanh.f32 %v2861_v60 }
0x1f17   : > { %v5495_v63 = vpop.eup %5494 }
0x1f18   : > { %2864 = vrot.lane.b32.xlu1 %v5495_v63, %s5748_s27 }
0x1f79   : > { %v3047_v0 = vpop.permute.xlu0 %3046 }
0x1f7a   : > { %v3049_v1 = vadd.f32 %v3047_v0, %v6176_v17 }
0x1f7c   : > { %5496 = vtanh.f32 %v3049_v1  ;;  %v4746_v7 = vmul.f32 -1.442695, %v3049_v1 }
0x1f7e   : > { %5498 = vpow2.f32 %v4746_v7 }
0x1f86   : > { %v5497_v3 = vpop.eup %5496 }
0x1f87   : > { %3083 = vrot.lane.b32.xlu0 %v5497_v3, %s5746_s21 }
0x1f88   : > { %v5499_v8 = vpop.eup %5498 }
0x1f89   : > { %v3077_v9 = vadd.f32 1.0, %v5499_v8 }
0x1f8a   : > { %v2865_v4 = vpop.permute.xlu1 %2864 }
0x1f8b   : > { %v2867_v5 = vmul.f32 %v5493_v20, %v2865_v4  ;;  %5500 = vrcp.f32 %v3077_v9 }
0x1f8d   : > { %v2892_v6 = vadd.f32 %v2867_v5, %v2686_v32  ;;  %2895 = vrot.lane.b32.xlu1 %v2867_v5, %s5749_s23 }
0x1f95   : > { %v5501_v10 = vpop.eup %5500 }
0x1f96   : > { %v3081_v13 = vmul.f32 %v5501_v10, %v6215_v36 }
0x1ff9   : > { %v3084_v11 = vpop.permute.xlu0 %3083 }
0x1ffa   : > { %v3086_v12 = vmul.f32 %v5501_v10, %v3084_v11 }
0x1ffc   : > { %3088 = vrot.lane.b32.xlu0 %v3086_v12, %s5747_s3 }
0x1fff   : > { %v2896_v17 = vpop.permute.xlu1 %2895 }
0x2000   : > { %5058 = vmatmul.mubr.msk.f32.vlgmr.msra.gmra.mrb[22].mxu0 %vm735_vm1, %v2896_v17 }
0x2001   : > { %5247 = vmatpush3.bf16.msra.mxu0 %v5973_v58  ;;  %5071 = vmatprep.mubr.msk.f32.mxu0 %vm5744_vm4, %v5742_v24 }
0x2002   : > { %5251 = vmatprep.subr.bf16.mxu0 %v5743_v34 }
0x206e   : > { %v3089_v14 = vpop.permute.xlu0 %3088 }
0x206f   : > { %v3091_v15 = vadd.f32 %v3089_v14, %v3081_v13 }
0x2071   : > { %5502 = vtanh.f32 %v3091_v15 }
0x207b   : > { %v5503_v16 = vpop.eup %5502 }
0x207c   : > { %3094 = vrot.lane.b32.xlu0 %v5503_v16, %s5748_s27 }
0x20d3   : > { %v2965_v18 = vpop.f32.mrb[22].mxu0 }
0x20d4   : > { %v2969_v19 = vadd.f32 %v2965_v18, %v6149_v45  ;;  %v5059_v21 = vpop.f32.mrb[23].mxu0 }
0x20d6   : > { %5504 = vtanh.f32 %v2969_v19  ;;  %v4745_v27 = vmul.f32 -1.442695, %v2969_v19 }
0x20d8   : > { %5506 = vpow2.f32 %v4745_v27 }
0x20e0   : > { %v5505_v22 = vpop.eup %5504 }
0x20e1   : > { %3059 = vrot.lane.b32.xlu0 %v5505_v22, %s5746_s21 }
0x20e2   : > { %v5507_v28 = vpop.eup %5506 }
0x20e3   : > { %v3053_v29 = vadd.f32 1.0, %v5507_v28 }
0x20e5   : > { %5508 = vrcp.f32 %v3053_v29 }
0x20ee   : > { %v3095_v23 = vpop.permute.xlu0 %3094 }
0x20ef   : > { %v3097_v25 = vmul.f32 %v5501_v10, %v3095_v23  ;;  %v5509_v30 = vpop.eup %5508 }
0x20f0   : > { %v3057_v33 = vmul.f32 %v5509_v30, %v2861_v60 }
0x20f1   : > { %v6252_v26 = vadd.f32 %v3097_v25, %v6225_v43  ;;  %3177 = vrot.lane.b32.xlu1 %v3097_v25, %s5747_s3 }
0x2153   : > { %v3060_v31 = vpop.permute.xlu0 %3059 }
0x2154   : > { %v3062_v45 = vmul.f32 %v5509_v30, %v3060_v31 }
0x2156   : > { %3064 = vrot.lane.b32.xlu1 %v3062_v45, %s5747_s3 }
0x2163   : > { %v3178_v32 = vpop.permute.xlu1 %3177 }
0x2164   : > { %5079 = vmatmul.mubr.msk.f32.vlgmr.msra.gmra.mrb[22].mxu1 %vm735_vm1, %v3178_v32 }
0x2165   : > { %5256 = vmatpush3.bf16.msra.mxu1 %v5943_v38  ;;  %5092 = vmatprep.mubr.msk.f32.mxu1 %vm5744_vm4, %v5742_v24 }
0x2166   : > { %5260 = vmatprep.subr.bf16.mxu1 %v5743_v34 }
0x21c8   : > { %v3065_v35 = vpop.permute.xlu1 %3064 }
0x21c9   : > { %v3067_v36 = vadd.f32 %v3065_v35, %v3057_v33 }
0x21cb   : > { %5510 = vtanh.f32 %v3067_v36 }
0x21d5   : > { %v5511_v37 = vpop.eup %5510 }
0x21d6   : > { %3070 = vrot.lane.b32.xlu1 %v5511_v37, %s5748_s27 }
0x2237   : > { %v3247_v39 = vpop.f32.mrb[22].mxu1 }
0x2238   : > { %3252 = vrot.lane.b32.xlu0 %v3247_v39, %s5745_s19  ;;  %v5080_v41 = vpop.f32.mrb[23].mxu1 }
0x2248   : > { %v3071_v42 = vpop.permute.xlu1 %3070 }
0x2249   : > { %v3073_v43 = vmul.f32 %v5509_v30, %v3071_v42 }
0x224b   : > { %v3098_v44 = vadd.f32 %v3073_v43, %v2892_v6  ;;  %3101 = vrot.lane.b32.xlu1 %v3073_v43, %s5749_s23 }
0x22aa   : > { %v3253_v46 = vpop.permute.xlu0 %3252 }
0x22ab   : > { %v3255_v47 = vadd.f32 %v3253_v46, %v6145_v40 }
0x22ad   : > { %5512 = vtanh.f32 %v3255_v47  ;;  %v4750_v50 = vmul.f32 -1.442695, %v3255_v47 }
0x22af   : > { %5514 = vpow2.f32 %v4750_v50 }
0x22b7   : > { %v5513_v48 = vpop.eup %5512 }
0x22b8   : > { %3289 = vrot.lane.b32.xlu0 %v5513_v48, %s5746_s21 }
0x22b9   : > { %v5515_v51 = vpop.eup %5514 }
0x22ba   : > { %v3283_v52 = vadd.f32 1.0, %v5515_v51 }
0x22bc   : > { %5516 = vrcp.f32 %v3283_v52 }
0x22bd   : > { %v3102_v49 = vpop.permute.xlu1 %3101 }
0x22be   : > { %5072 = vmatmul.mubr.msk.f32.vlgmr.msra.gmra.mrb[24].mxu0 %vm735_vm1, %v3102_v49 }
0x22bf   : > { %5253 = vmatpush3.bf16.msra.mxu0 %v5973_v58  ;;  %5085 = vmatprep.mubr.msk.f32.mxu0 %vm5744_vm4, %v5742_v24 }
0x22c0   : > { %5257 = vmatprep.subr.bf16.mxu0 %v5743_v34 }
0x22c6   : > { %v5517_v40 = vpop.eup %5516 }
0x22c7   : > { %v3287_v56 = vmul.f32 %v5517_v40, %v3091_v15 }
0x232a   : > { %v3290_v20 = vpop.permute.xlu0 %3289 }
0x232b   : > { %v3292_v53 = vmul.f32 %v5517_v40, %v3290_v20 }
0x232d   : > { %3294 = vrot.lane.b32.xlu0 %v3292_v53, %s5747_s3 }
0x2391   : > { %v3171_v54 = vpop.f32.mrb[24].mxu0 }
0x2392   : > { %v5073_v55 = vpop.f32.mrb[25].mxu0  ;;  %v3175_v60 = vadd.f32 %v3171_v54, %v6113_v62 }
0x2394   : > { %v4749_v1 = vmul.f32 -1.442695, %v3175_v60 }
0x239f   : > { %v3295_v57 = vpop.permute.xlu0 %3294 }
0x23a0   : > { %v3297_v59 = vadd.f32 %v3295_v57, %v3287_v56 }
0x23a2   : > { %5518 = vtanh.f32 %v3297_v59 }
0x23a3   : > { %5520 = vtanh.f32 %v3175_v60 }
0x23a4   : > { %5522 = vpow2.f32 %v4749_v1 }
0x23ac   : > { %v5519_v63 = vpop.eup %5518 }
0x23ad   : > { %3300 = vrot.lane.b32.xlu1 %v5519_v63, %s5748_s27  ;;  %v5521_v0 = vpop.eup %5520  ;;  %v5610_v63 = vld [vmem:[#allocation2 + $0x3] sm:$0x1] }
0x23ae   : > { %v5523_v3 = vpop.eup %5522 }
0x23af   : > { %v3259_v4 = vadd.f32 1.0, %v5523_v3 }
0x23b1   : > { %3265 = vrot.lane.b32.xlu1 %v5521_v0, %s5746_s21  ;;  %5524 = vrcp.f32 %v3259_v4 }
0x23bb   : > { %v5525_v62 = vpop.eup %5524 }
0x23bc   : > { %v3263_v11 = vmul.f32 %v5525_v62, %v3067_v36 }
0x241f   : > { %v3301_v5 = vpop.permute.xlu1 %3300 }
0x2420   : > { %v3303_v6 = vmul.f32 %v5517_v40, %v3301_v5 }
0x2422   : > { %v3305_v7 = vadd.f32 %v3303_v6, %v6252_v26  ;;  %3383 = vrot.lane.b32.xlu0 %v3303_v6, %s5747_s3 }
0x2423   : > { %v3266_v8 = vpop.permute.xlu1 %3265 }
0x2424   : > { %v3268_v9 = vmul.f32 %v5525_v62, %v3266_v8 }
0x2426   : > { %3270 = vrot.lane.b32.xlu0 %v3268_v9, %s5747_s3  ;;  %v5611_v9 = vld [vmem:[#allocation2 + $0xc] sm:$0x1] }
0x2494   : > { %v3384_v10 = vpop.permute.xlu0 %3383 }
0x2495   : > { %5093 = vmatmul.mubr.msk.f32.vlgmr.msra.gmra.mrb[24].mxu1 %vm735_vm1, %v3384_v10 }
0x2496   : > { %5262 = vmatpush3.bf16.msra.mxu1 %v5943_v38  ;;  %5106 = vmatprep.mubr.msk.f32.mxu1 %vm5744_vm4, %v5742_v24 }
0x2497   : > { %5266 = vmatprep.subr.bf16.mxu1 %v5743_v34 }
0x2498   : > { %v3271_v12 = vpop.permute.xlu0 %3270 }
0x2499   : > { %v3273_v17 = vadd.f32 %v3271_v12, %v3263_v11 }
0x249b   : > { %5526 = vtanh.f32 %v3273_v17 }
0x24a5   : > { %v5527_v13 = vpop.eup %5526 }
0x24a6   : > { %3276 = vrot.lane.b32.xlu1 %v5527_v13, %s5748_s27 }
0x2518   : > { %v3277_v14 = vpop.permute.xlu1 %3276 }
0x2519   : > { %v3279_v15 = vmul.f32 %v5525_v62, %v3277_v14 }
0x251b   : > { %v3304_v16 = vadd.f32 %v3279_v15, %v3098_v44  ;;  %3307 = vrot.lane.b32.xlu1 %v3279_v15, %s5749_s23 }
0x2568   : > { %v3453_v18 = vpop.f32.mrb[24].mxu1 }
0x2569   : > { %3458 = vrot.lane.b32.xlu0 %v3453_v18, %s5745_s19  ;;  %v5094_v19 = vpop.f32.mrb[25].mxu1 }
0x258d   : > { %v3308_v21 = vpop.permute.xlu1 %3307 }
0x258e   : > { %5086 = vmatmul.mubr.msk.f32.vlgmr.msra.gmra.mrb[26].mxu0 %vm735_vm1, %v3308_v21 }
0x258f   : > { %5259 = vmatpush3.bf16.msra.mxu0 %v5973_v58  ;;  %5099 = vmatprep.mubr.msk.f32.mxu0 %vm5744_vm4, %v5742_v24 }
0x2590   : > { %5263 = vmatprep.subr.bf16.mxu0 %v5743_v34 }
0x25db   : > { %v3459_v22 = vpop.permute.xlu0 %3458 }
0x25dc   : > { %v3461_v23 = vadd.f32 %v3459_v22, %v6117_v2 }
0x25de   : > { %5528 = vtanh.f32 %v3461_v23  ;;  %v4754_v26 = vmul.f32 -1.442695, %v3461_v23 }
0x25e0   : > { %5530 = vpow2.f32 %v4754_v26 }
0x25e8   : > { %v5529_v25 = vpop.eup %5528 }
0x25e9   : > { %3495 = vrot.lane.b32.xlu0 %v5529_v25, %s5746_s21 }
0x25ea   : > { %v5531_v27 = vpop.eup %5530 }
0x25eb   : > { %v3489_v28 = vadd.f32 1.0, %v5531_v27 }
0x25ed   : > { %5532 = vrcp.f32 %v3489_v28 }
0x25f7   : > { %v5533_v29 = vpop.eup %5532 }
0x25f8   : > { %v3493_v33 = vmul.f32 %v5533_v29, %v3297_v59 }
0x265b   : > { %v3496_v30 = vpop.permute.xlu0 %3495 }
0x265c   : > { %v3498_v31 = vmul.f32 %v5533_v29, %v3496_v30 }
0x265e   : > { %3500 = vrot.lane.b32.xlu1 %v3498_v31, %s5747_s3 }
0x2661   : > { %v3377_v45 = vpop.f32.mrb[26].mxu0 }
0x2662   : > { %v5087_v32 = vpop.f32.mrb[27].mxu0  ;;  %v3381_v2 = vadd.f32 %v3377_v45, %v6083_v61 }
0x2664   : > { %v4753_v41 = vmul.f32 -1.442695, %v3381_v2 }
0x26d0   : > { %v3501_v35 = vpop.permute.xlu1 %3500 }
0x26d1   : > { %v6294_v36 = vadd.f32 %v3501_v35, %v3493_v33 }
0x26d3   : > { %5534 = vtanh.f32 %v6294_v36 }
0x26d4   : > { %5536 = vtanh.f32 %v3381_v2 }
0x26d5   : > { %5538 = vpow2.f32 %v4753_v41  ;;  %v5612_v41 = vld [vmem:[#allocation2 + $0x2] sm:$0x1] }
0x26dd   : > { %v5535_v37 = vpop.eup %5534 }
0x26de   : > { %3506 = vrot.lane.b32.xlu0 %v5535_v37, %s5748_s27  ;;  %v5537_v39 = vpop.eup %5536 }
0x26df   : > { %v5539_v42 = vpop.eup %5538 }
0x26e0   : > { %v3465_v43 = vadd.f32 1.0, %v5539_v42 }
0x26e2   : > { %3471 = vrot.lane.b32.xlu0 %v5537_v39, %s5746_s21  ;;  %5540 = vrcp.f32 %v3465_v43 }
0x26ec   : > { %v5541_v61 = vpop.eup %5540 }
0x26ed   : > { %v3469_v51 = vmul.f32 %v5541_v61, %v3273_v17 }
0x2750   : > { %v3507_v44 = vpop.permute.xlu0 %3506 }
0x2751   : > { %v3509_v46 = vmul.f32 %v5533_v29, %v3507_v44 }
0x2753   : > { %v6300_v47 = vadd.f32 %v3509_v46, %v3305_v7  ;;  %3589 = vrot.lane.b32.xlu1 %v3509_v46, %s5747_s3  ;;  %v5613_v46 = vld [vmem:[#allocation2 + $0xd] sm:$0x1] }
0x2754   : > { %v3472_v48 = vpop.permute.xlu0 %3471 }
0x2755   : > { %v3474_v49 = vmul.f32 %v5541_v61, %v3472_v48 }
0x2757   : > { %3476 = vrot.lane.b32.xlu1 %v3474_v49, %s5747_s3 }
0x27c5   : > { %v3590_v50 = vpop.permute.xlu1 %3589 }
0x27c6   : > { %5107 = vmatmul.mubr.msk.f32.vlgmr.msra.gmra.mrb[26].mxu1 %vm735_vm1, %v3590_v50 }
0x27c7   : > { %5268 = vmatpush3.bf16.msra.mxu1 %v5943_v38  ;;  %5120 = vmatprep.mubr.msk.f32.mxu1 %vm5744_vm4, %v5742_v24 }
0x27c8   : > { %5272 = vmatprep.subr.bf16.mxu1 %v5743_v34 }
0x27c9   : > { %v3477_v52 = vpop.permute.xlu1 %3476 }
0x27ca   : > { %v3479_v40 = vadd.f32 %v3477_v52, %v3469_v51 }
0x27cc   : > { %5542 = vtanh.f32 %v3479_v40 }
0x27d6   : > { %v5543_v20 = vpop.eup %5542 }
0x27d7   : > { %3482 = vrot.lane.b32.xlu0 %v5543_v20, %s5748_s27 }
0x2849   : > { %v3483_v53 = vpop.permute.xlu0 %3482 }
0x284a   : > { %v3485_v54 = vmul.f32 %v5541_v61, %v3483_v53 }
0x284c   : > { %v6310_v55 = vadd.f32 %v3485_v54, %v3304_v16  ;;  %3513 = vrot.lane.b32.xlu1 %v3485_v54, %s5749_s23 }
0x2899   : > { %v3659_v56 = vpop.f32.mrb[26].mxu1 }
0x289a   : > { %3664 = vrot.lane.b32.xlu0 %v3659_v56, %s5745_s19  ;;  %v5108_v57 = vpop.f32.mrb[27].mxu1 }
0x28be   : > { %v3514_v59 = vpop.permute.xlu1 %3513 }
0x28bf   : > { %5100 = vmatmul.mubr.msk.f32.vlgmr.msra.gmra.mrb[28].mxu0 %vm735_vm1, %v3514_v59 }
0x28c0   : > { %5265 = vmatpush3.bf16.msra.mxu0 %v5973_v58  ;;  %5113 = vmatprep.mubr.msk.f32.mxu0 %vm5744_vm4, %v5742_v24 }
0x28c1   : > { %5269 = vmatprep.subr.bf16.mxu0 %v5743_v34 }
0x290c   : > { %v3665_v60 = vpop.permute.xlu0 %3664 }
0x290d   : > { %v3667_v0 = vadd.f32 %v5610_v63, %v3665_v60 }
0x290f   : > { %5544 = vtanh.f32 %v3667_v0  ;;  %v4758_v3 = vmul.f32 -1.442695, %v3667_v0 }
0x2911   : > { %5546 = vpow2.f32 %v4758_v3 }
0x2919   : > { %v5545_v1 = vpop.eup %5544 }
0x291a   : > { %3701 = vrot.lane.b32.xlu1 %v5545_v1, %s5746_s21 }
0x291b   : > { %v5547_v4 = vpop.eup %5546 }
0x291c   : > { %v3695_v5 = vadd.f32 1.0, %v5547_v4 }
0x291e   : > { %5548 = vrcp.f32 %v3695_v5 }
0x2928   : > { %v5549_v6 = vpop.eup %5548 }
0x2929   : > { %v3699_v13 = vmul.f32 %v5549_v6, %v6294_v36 }
0x298c   : > { %v3702_v7 = vpop.permute.xlu1 %3701 }
0x298d   : > { %v3704_v62 = vmul.f32 %v5549_v6, %v3702_v7 }
0x298f   : > { %3706 = vrot.lane.b32.xlu0 %v3704_v62, %s5747_s3 }
0x2992   : > { %v3583_v8 = vpop.f32.mrb[28].mxu0 }
0x2993   : > { %v3587_v10 = vadd.f32 %v5611_v9, %v3583_v8  ;;  %v5101_v11 = vpop.f32.mrb[29].mxu0 }
0x2995   : > { %5550 = vtanh.f32 %v3587_v10  ;;  %v4757_v17 = vmul.f32 -1.442695, %v3587_v10 }
0x2997   : > { %5552 = vpow2.f32 %v4757_v17 }
0x299f   : > { %v5551_v12 = vpop.eup %5550 }
0x29a0   : > { %3677 = vrot.lane.b32.xlu0 %v5551_v12, %s5746_s21 }
0x29a1   : > { %v5553_v14 = vpop.eup %5552 }
0x29a2   : > { %v3671_v18 = vadd.f32 1.0, %v5553_v14 }
0x2a01   : > { %v3707_v15 = vpop.permute.xlu0 %3706 }
0x2a02   : > { %v6323_v16 = vadd.f32 %v3707_v15, %v3699_v13  ;;  %v5614_v15 = vld [vmem:[#allocation2 + $0xe] sm:$0x1] }
0x2a04   : > { %5554 = vtanh.f32 %v6323_v16 }
0x2a05   : > { %5556 = vrcp.f32 %v3671_v18 }
0x2a0e   : > { %v5555_v19 = vpop.eup %5554 }
0x2a0f   : > { %3712 = vrot.lane.b32.xlu1 %v5555_v19, %s5748_s27  ;;  %v5557_v21 = vpop.eup %5556 }
0x2a10   : > { %v3675_v28 = vmul.f32 %v5557_v21, %v3479_v40 }
0x2a12   : > { %v3678_v22 = vpop.permute.xlu0 %3677 }
0x2a13   : > { %v3680_v23 = vmul.f32 %v5557_v21, %v3678_v22 }
0x2a15   : > { %3682 = vrot.lane.b32.xlu0 %v3680_v23, %s5747_s3 }
0x2a81   : > { %v3713_v25 = vpop.permute.xlu1 %3712 }
0x2a82   : > { %v3715_v26 = vmul.f32 %v5549_v6, %v3713_v25 }
0x2a84   : > { %v6329_v27 = vadd.f32 %v3715_v26, %v6300_v47  ;;  %3795 = vrot.lane.b32.xlu1 %v3715_v26, %s5747_s3 }
0x2a87   : > { %v3683_v29 = vpop.permute.xlu0 %3682 }
0x2a88   : > { %v3685_v30 = vadd.f32 %v3683_v29, %v3675_v28 }
0x2a8a   : > { %5558 = vtanh.f32 %v3685_v30 }
0x2a94   : > { %v5559_v31 = vpop.eup %5558 }
0x2a95   : > { %3688 = vrot.lane.b32.xlu1 %v5559_v31, %s5748_s27 }
0x2af6   : > { %v3796_v45 = vpop.permute.xlu1 %3795 }
0x2af7   : > { %5121 = vmatmul.mubr.msk.f32.vlgmr.msra.gmra.mrb[28].mxu1 %vm735_vm1, %v3796_v45 }
0x2af8   : > { %5274 = vmatpush3.bf16.msra.mxu1 %v5943_v38  ;;  %5134 = vmatprep.mubr.msk.f32.mxu1 %vm5744_vm4, %v5742_v24 }
0x2af9   : > { %5278 = vmatprep.subr.bf16.mxu1 %v5743_v34 }
0x2b07   : > { %v3689_v32 = vpop.permute.xlu1 %3688 }
0x2b08   : > { %v3691_v33 = vmul.f32 %v5557_v21, %v3689_v32 }
0x2b0a   : > { %v3716_v35 = vadd.f32 %v3691_v33, %v6310_v55  ;;  %3719 = vrot.lane.b32.xlu0 %v3691_v33, %s5749_s23 }
0x2b7c   : > { %v3720_v36 = vpop.permute.xlu0 %3719 }
0x2b7d   : > { %5114 = vmatmul.mubr.msk.f32.vlgmr.msra.gmra.mrb[30].mxu0 %vm735_vm1, %v3720_v36 }
0x2b7e   : > { %5271 = vmatpush3.bf16.msra.mxu0 %v5973_v58  ;;  %5127 = vmatprep.mubr.msk.f32.mxu0 %vm5744_vm4, %v5742_v24 }
0x2b7f   : > { %5275 = vmatprep.subr.bf16.mxu0 %v5743_v34 }
0x2bca   : > { %v3865_v2 = vpop.f32.mrb[28].mxu1 }
0x2bcb   : > { %3870 = vrot.lane.b32.xlu1 %v3865_v2, %s5745_s19  ;;  %v5122_v37 = vpop.f32.mrb[29].mxu1 }
0x2c3d   : > { %v3871_v39 = vpop.permute.xlu1 %3870 }
0x2c3e   : > { %v3873_v42 = vadd.f32 %v5612_v41, %v3871_v39 }
0x2c40   : > { %5560 = vtanh.f32 %v3873_v42  ;;  %v4762_v49 = vmul.f32 -1.442695, %v3873_v42 }
0x2c4a   : > { %v5561_v43 = vpop.eup %5560 }
0x2c4b   : > { %3907 = vrot.lane.b32.xlu0 %v5561_v43, %s5746_s21 }
0x2c50   : > { %v3789_v44 = vpop.f32.mrb[30].mxu0 }
0x2c51   : > { %v3793_v47 = vadd.f32 %v5613_v46, %v3789_v44  ;;  %v5115_v61 = vpop.f32.mrb[31].mxu0 }
0x2c53   : > { %5562 = vtanh.f32 %v3793_v47  ;;  %v4761_v52 = vmul.f32 -1.442695, %v3793_v47 }
0x2c54   : > { %5564 = vpow2.f32 %v4762_v49 }
0x2c5d   : > { %v5563_v48 = vpop.eup %5562 }
0x2c5e   : > { %3883 = vrot.lane.b32.xlu0 %v5563_v48, %s5746_s21  ;;  %v5565_v50 = vpop.eup %5564 }
0x2c5f   : > { %v3901_v51 = vadd.f32 1.0, %v5565_v50 }
0x2c61   : > { %5566 = vrcp.f32 %v3901_v51 }
0x2c62   : > { %5568 = vpow2.f32 %v4761_v52 }
0x2c6b   : > { %v5567_v40 = vpop.eup %5566 }
0x2c6c   : > { %v5569_v54 = vpop.eup %5568  ;;  %v3905_v60 = vmul.f32 %v5567_v40, %v6323_v16 }
0x2c6d   : > { %v3877_v55 = vadd.f32 1.0, %v5569_v54 }
0x2c6f   : > { %5570 = vrcp.f32 %v3877_v55 }
0x2c79   : > { %v5571_v56 = vpop.eup %5570 }
0x2c7a   : > { %v3881_v3 = vmul.f32 %v5571_v56, %v3685_v30 }
0x2cbd   : > { %v3908_v20 = vpop.permute.xlu0 %3907 }
0x2cbe   : > { %v3910_v53 = vmul.f32 %v5567_v40, %v3908_v20 }
0x2cc0   : > { %3912 = vrot.lane.b32.xlu1 %v3910_v53, %s5747_s3  ;;  %v5616_v53 = vld [vmem:[#allocation2 + $0xf] sm:$0x1] }
0x2cd0   : > { %v3884_v57 = vpop.permute.xlu0 %3883 }
0x2cd1   : > { %v3886_v59 = vmul.f32 %v5571_v56, %v3884_v57 }
0x2cd3   : > { %3888 = vrot.lane.b32.xlu0 %v3886_v59, %s5747_s3 }
0x2d32   : > { %v3913_v63 = vpop.permute.xlu1 %3912 }
0x2d33   : > { %v6351_v0 = vadd.f32 %v3913_v63, %v3905_v60 }
0x2d35   : > { %5572 = vtanh.f32 %v6351_v0 }
0x2d3f   : > { %v5573_v1 = vpop.eup %5572 }
0x2d40   : > { %3918 = vrot.lane.b32.xlu1 %v5573_v1, %s5748_s27 }
0x2d45   : > { %v3889_v4 = vpop.permute.xlu0 %3888 }
0x2d46   : > { %v3891_v5 = vadd.f32 %v3889_v4, %v3881_v3 }
0x2d48   : > { %5574 = vtanh.f32 %v3891_v5 }
0x2d52   : > { %v5575_v6 = vpop.eup %5574 }
0x2d53   : > { %3894 = vrot.lane.b32.xlu0 %v5575_v6, %s5748_s27 }
0x2db2   : > { %v3919_v7 = vpop.permute.xlu1 %3918 }
0x2db3   : > { %v3921_v62 = vmul.f32 %v5567_v40, %v3919_v7 }
0x2db5   : > { %v6357_v8 = vadd.f32 %v3921_v62, %v6329_v27  ;;  %4001 = vrot.lane.b32.xlu1 %v3921_v62, %s5747_s3 }
0x2dc5   : > { %v3895_v9 = vpop.permute.xlu0 %3894 }
0x2dc6   : > { %v3897_v10 = vmul.f32 %v5571_v56, %v3895_v9 }
0x2dc8   : > { %v3922_v11 = vadd.f32 %v3897_v10, %v3716_v35  ;;  %3925 = vrot.lane.b32.xlu1 %v3897_v10, %s5749_s23 }
0x2e27   : > { %v4002_v12 = vpop.permute.xlu1 %4001 }
0x2e28   : > { %5135 = vmatmul.mubr.msk.f32.vlgmr.msra.gmra.mrb[30].mxu1 %vm735_vm1, %v4002_v12 }
0x2e29   : > { %5280 = vmatpush3.bf16.msra.mxu1 %v5943_v38  ;;  %5148 = vmatprep.mubr.msk.f32.mxu1 %vm5744_vm4, %v5742_v24 }
0x2e2a   : > { %5287 = vmatprep.subr.bf16.mxu1 %v5743_v34 }
0x2e3a   : > { %v3926_v17 = vpop.permute.xlu1 %3925 }
0x2e3b   : > { %5128 = vmatmul.mubr.msk.f32.vlgmr.msra.gmra.mrb[32].mxu0 %vm735_vm1, %v3926_v17 }
0x2e3c   : > { %5277 = vmatpush3.bf16.msra.mxu0 %v5973_v58  ;;  %5141 = vmatprep.mubr.msk.f32.mxu0 %vm5744_vm4, %v5742_v24  ;;  %v5615_v58 = vld [vmem:[#allocation2 + $0x1] sm:$0x1] }
0x2e3d   : > { %5281 = vmatprep.subr.bf16.mxu0 %v5743_v34 }
0x2efb   : > { %v4071_v13 = vpop.f32.mrb[30].mxu1 }
0x2efc   : > { %4076 = vrot.lane.b32.xlu0 %v4071_v13, %s5745_s19  ;;  %v5136_v14 = vpop.f32.mrb[31].mxu1 }
0x2f0e   : > { %v3995_v38 = vpop.f32.mrb[32].mxu0 }
0x2f0f   : > { %v3999_v16 = vadd.f32 %v5614_v15, %v3995_v38  ;;  %v5129_v18 = vpop.f32.mrb[33].mxu0 }
0x2f11   : > { %5576 = vtanh.f32 %v3999_v16  ;;  %v4765_v22 = vmul.f32 -1.442695, %v3999_v16 }
0x2f1b   : > { %v5577_v19 = vpop.eup %5576 }
0x2f1c   : > { %4089 = vrot.lane.b32.xlu0 %v5577_v19, %s5746_s21 }
0x2f6e   : > { %v4077_v21 = vpop.permute.xlu0 %4076 }
0x2f6f   : > { %v4079_v23 = vadd.f32 %v5615_v58, %v4077_v21  ;;  %v4346_v58 = vld [vmem:[%s6577_s12] sm:$0xff] }
0x2f71   : > { %5578 = vtanh.f32 %v4079_v23  ;;  %v4766_v31 = vmul.f32 -1.442695, %v4079_v23  ;;  %v4347_v23 = vld [vmem:[%s6577_s12 + $0x8] sm:$0xff] }
0x2f72   : > { %5580 = vpow2.f32 %v4765_v22 }
0x2f7b   : > { %v5579_v25 = vpop.eup %5578 }
0x2f7c   : > { %4113 = vrot.lane.b32.xlu1 %v5579_v25, %s5746_s21  ;;  %v5581_v26 = vpop.eup %5580  ;;  %v4425_v25 = vld [vmem:[%s6579_s14] sm:$0xff] }
0x2f7d   : > { %v4083_v27 = vadd.f32 1.0, %v5581_v26  ;;  %v5282_v26 = vpack.c.bf16 %v4347_v23, %v4346_v58 }
0x2f7f   : > { %5582 = vrcp.f32 %v4083_v27  ;;  %v4426_v27 = vld [vmem:[%s6579_s14 + $0x8] sm:$0xff] }
0x2f80   : > { %5584 = vpow2.f32 %v4766_v31  ;;  %v4349_v31 = vld [vmem:[%s6577_s12 + $0x18] sm:$0xff] }
0x2f89   : > { %v5583_v28 = vpop.eup %5582 }
0x2f8a   : > { %v5585_v45 = vpop.eup %5584  ;;  %v4087_v2 = vmul.f32 %v5583_v28, %v3891_v5  ;;  %v5617_v5 = vld [vmem:[#allocation2] sm:$0x1] }
0x2f8b   : > { %v4107_v32 = vadd.f32 1.0, %v5585_v45  ;;  %v4427_v45 = vld [vmem:[%s6579_s14 + $0x10] sm:$0xff] }
0x2f8d   : > { %5586 = vrcp.f32 %v4107_v32 }
0x2f8e   : > { %v4090_v29 = vpop.permute.xlu0 %4089 }
0x2f8f   : > { %v4092_v30 = vmul.f32 %v5583_v28, %v4090_v29 }
0x2f91   : > { %4094 = vrot.lane.b32.xlu0 %v4092_v30, %s5747_s3  ;;  %v4348_v30 = vld [vmem:[%s6577_s12 + $0x10] sm:$0xff] }
0x2f92   : > { %v5285_v32 = vpack.c.bf16 %v4349_v31, %v4348_v30 }
0x2f97   : > { %v5587_v33 = vpop.eup %5586 }
0x2f98   : > { %v4111_v42 = vmul.f32 %v5587_v33, %v6351_v0 }
0x2fee   : > { %v4114_v35 = vpop.permute.xlu1 %4113 }
0x2fef   : > { %v4116_v36 = vmul.f32 %v5587_v33, %v4114_v35 }
0x2ff1   : > { %4118 = vrot.lane.b32.xlu1 %v4116_v36, %s5747_s3 }
0x3003   : > { %v4095_v37 = vpop.permute.xlu0 %4094 }
0x3004   : > { %v4097_v39 = vadd.f32 %v4095_v37, %v4087_v2 }
0x3006   : > { %5588 = vtanh.f32 %v4097_v39 }
0x3010   : > { %v5589_v41 = vpop.eup %5588 }
0x3011   : > { %4100 = vrot.lane.b32.xlu0 %v5589_v41, %s5748_s27 }
0x3063   : > { %v4119_v43 = vpop.permute.xlu1 %4118 }
0x3064   : > { %v4121_v44 = vadd.f32 %v4119_v43, %v4111_v42  ;;  %v4350_v43 = vld [vmem:[%s6578_s13] sm:$0x1] }
0x3066   : > { %5590 = vtanh.f32 %v4121_v44 }
0x3070   : > { %v5591_v46 = vpop.eup %5590 }
0x3071   : > { %4124 = vrot.lane.b32.xlu1 %v5591_v46, %s5748_s27 }
0x3083   : > { %v4101_v47 = vpop.permute.xlu0 %4100 }
0x3084   : > { %v4103_v61 = vmul.f32 %v5583_v28, %v4101_v47  ;;  %v5288_v28 = vpack.c.bf16 %v4426_v27, %v4425_v25 }
0x3086   : > { %v4128_v48 = vadd.f32 %v4103_v61, %v3922_v11  ;;  %4131 = vrot.lane.b32.xlu0 %v4103_v61, %s5749_s23 }
0x30e3   : > { %v4125_v49 = vpop.permute.xlu1 %4124 }
0x30e4   : > { %v4127_v50 = vmul.f32 %v5587_v33, %v4125_v49 }
0x30e6   : > { %v6381_v51 = vadd.f32 %v4127_v50, %v6357_v8  ;;  %4207 = vrot.lane.b32.xlu1 %v4127_v50, %s5747_s3 }
0x30f8   : > { %v4132_v52 = vpop.permute.xlu0 %4131 }
0x30f9   : > { %5142 = vmatmul.mubr.msk.f32.vlgmr.msra.gmra.mrb[34].mxu0 %vm735_vm1, %v4132_v52 }
0x30fa   : > { %5159 = vmatprep.mubr.msk.f32.mxu0 %vm5744_vm4, %v5742_v24  ;;  %5283 = vmatpush3.bf16.msra.mxu0 %v5282_v26 }
0x30fb   : > { %5284 = vmatprep.subr.bf16.mxu0 %v5743_v34 }
0x30fe   : > { %5286 = vmatpush3.bf16.msra.mxu0 %v5285_v32 }
0x3158   : > { %v4208_v40 = vpop.permute.xlu1 %4207 }
0x3159   : > { %5149 = vmatmul.mubr.msk.f32.vlgmr.msra.gmra.mrb[32].mxu1 %vm735_vm1, %v4208_v40 }
0x315a   : > { %5170 = vmatprep.mubr.msk.f32.mxu1 %vm5744_vm4, %v5742_v24  ;;  %5289 = vmatpush3.bf16.msra.mxu1 %v5288_v28 }
0x315b   : > { %5290 = vmatprep.subr.bf16.mxu1 %v5743_v34  ;;  %v4428_v34 = vld [vmem:[%s6579_s14 + $0x18] sm:$0xff] }
0x315c   : > { %v5291_v33 = vpack.c.bf16 %v4428_v34, %v4427_v45 }
0x315e   : > { %5292 = vmatpush3.bf16.msra.mxu1 %v5291_v33 }
0x31cc   : > { %v4201_v20 = vpop.f32.mrb[34].mxu0 }
0x31cd   : > { %v4205_v54 = vadd.f32 %v5616_v53, %v4201_v20  ;;  %v5143_v55 = vpop.f32.mrb[35].mxu0 }
0x31cf   : > { %5592 = vtanh.f32 %v4205_v54  ;;  %v4769_v59 = vmul.f32 -1.442695, %v4205_v54 }
0x31d1   : > { %5594 = vpow2.f32 %v4769_v59 }
0x31d9   : > { %v5593_v56 = vpop.eup %5592 }
0x31da   : > { %4295 = vrot.lane.b32.xlu0 %v5593_v56, %s5746_s21 }
0x31db   : > { %v5595_v63 = vpop.eup %5594 }
0x31dc   : > { %v4289_v0 = vadd.f32 1.0, %v5595_v63 }
0x31de   : > { %5596 = vrcp.f32 %v4289_v0 }
0x31e8   : > { %v5597_v1 = vpop.eup %5596 }
0x31e9   : > { %v4293_v62 = vmul.f32 %v5597_v1, %v4097_v39 }
0x322c   : > { %v4277_v57 = vpop.f32.mrb[32].mxu1 }
0x322d   : > { %4282 = vrot.lane.b32.xlu1 %v4277_v57, %s5745_s19  ;;  %v5150_v60 = vpop.f32.mrb[33].mxu1  ;;  %s609_s19 = scalar_lea.vmem [#allocation7], %s6428_s29 }
0x322e   : > { %s4557_s22 = sshll.u32 %s609_s19, 4  ;;  %s6458_s22 = int_to_ptr.vmem [resolvable:$true] %s4557_s22 }
0x324c   : > { %v4296_v3 = vpop.permute.xlu0 %4295 }
0x324d   : > { %v4298_v24 = vmul.f32 %v5597_v1, %v4296_v3 }
0x324f   : > { %4300 = vrot.lane.b32.xlu0 %v4298_v24, %s5747_s3 }
0x329f   : > { %v4283_v4 = vpop.permute.xlu1 %4282 }
0x32a0   : > { %v4285_v6 = vadd.f32 %v5617_v5, %v4283_v4 }
0x32a2   : > { %5598 = vtanh.f32 %v4285_v6  ;;  %v4770_v11 = vmul.f32 -1.442695, %v4285_v6 }
0x32ac   : > { %v5599_v7 = vpop.eup %5598 }
0x32ad   : > { %4319 = vrot.lane.b32.xlu1 %v5599_v7, %s5746_s21  ;;  %s4514_s21 = sand.u32 1, %s5869_s0  }
0x32c1   : > { %v4301_v8 = vpop.permute.xlu0 %4300 }
0x32c2   : > { %v4303_v9 = vadd.f32 %v4301_v8, %v4293_v62 }
0x32c4   : > { %5600 = vtanh.f32 %v4303_v9 }
0x32c5   : > { %5602 = vpow2.f32 %v4770_v11 }
0x32ce   : > { %v5601_v10 = vpop.eup %5600 }
0x32cf   : > { %4306 = vrot.lane.b32.xlu0 %v5601_v10, %s5748_s27  ;;  %v5603_v12 = vpop.eup %5602 }
0x32d0   : > { %v4313_v17 = vadd.f32 1.0, %v5603_v12 }
0x32d2   : > { %5604 = vrcp.f32 %v4313_v17 }
0x32dc   : > { %v5605_v13 = vpop.eup %5604 }
0x32dd   : > { %v4317_v19 = vmul.f32 %v5605_v13, %v4121_v44  ;;  %v4429_v44 = vld [vmem:[%s6580_s15] sm:$0x1] }
0x331f   : > { %v4320_v14 = vpop.permute.xlu1 %4319 }
0x3320   : > { %v4322_v38 = vmul.f32 %v5605_v13, %v4320_v14 }
0x3322   : > { %4324 = vrot.lane.b32.xlu1 %v4322_v38, %s5747_s3  ;;  %s6463_s3 = scalar_lea.sflag [#allocation6], %s4514_s21 }
0x3341   : > { %v4307_v15 = vpop.permute.xlu0 %4306 }
0x3342   : > { %v4309_v16 = vmul.f32 %v5597_v1, %v4307_v15 }
0x3344   : > { %v4334_v18 = vadd.f32 %v4309_v16, %v4128_v48 }
0x3346   : > { %4337 = vrot.lane.b32.xlu0 %v4334_v18, %s5749_s23  ;;  %s5618_s23 = scalar_lea.vmem %s6450_s25, 16 }
0x3347   : > { %p5619_p11 = scmp.ne.s32.totalorder %s6450_s25, %s5618_s23  ;;  %p5626_p1 = scmp.lt.s32.totalorder %s5624_s5, %s5618_s23 }
0x3349   : > { %p5620_p12 = pnand %p5619_p11, %p5888_p5  ;;  %p5627_p2 = por %p5626_p1, %p5625_p0 }
0x334b   : > { %p5621_p13 = pneg %p5620_p12 }
0x334d   : > { %p5628_p3 = pnand %p5627_p2, %p5621_p13 }
0x3394   : > { %v4325_v21 = vpop.permute.xlu1 %4324 }
0x3395   : > { %v4327_v22 = vadd.f32 %v4325_v21, %v4317_v19 }
0x3397   : > { %5606 = vtanh.f32 %v4327_v22 }
0x33a1   : > { %v5607_v29 = vpop.eup %5606 }
0x33a2   : > { %4330 = vrot.lane.b32.xlu1 %v5607_v29, %s5748_s27 }
0x33b8   : > { %v4338_v37 = vpop.permute.xlu0 %4337 }
0x3414   : > { %v4331_v35 = vpop.permute.xlu1 %4330 }
0x3415   : > { %v4333_v36 = vmul.f32 %v5605_v13, %v4331_v35 }
0x3417   : > { %v4335_v2 = vadd.f32 %v4333_v36, %v6381_v51 }
0x3419   : > { %4341 = vrot.lane.b32.xlu1 %v4335_v2, %s5748_s27  ;;  %s6438_s27 = sshll.u32 %s5869_s0, 4 }
0x341a   : > { %s6448_s0 = scalar_lea.hbm %s6582_s17, %s6438_s27  ;;  %s6456_s4 = scalar_lea.hbm %s6583_s18, %s6438_s27 }
0x348b   : > { %v4342_v39 = vpop.permute.xlu1 %4341 }
0x348c   : > { %v4344_v41 = vsel %vm735_vm1, %v4338_v37, %v4342_v39 }
0x348d   : > { %v4345_v42 = vmul.f32 0.0625, %v4344_v41 }
0x348f   : > { %5160 = vmatmul.mubr.msk.f32.vlgmr.msra.gmra.mrb[36].mxu0 %vm4351_vm7, %v4345_v42  ;;  %5171 = vmatmul.mubr.msk.f32.vlgmr.msra.gmra.mrb[34].mxu1 %vm4351_vm7, %v4345_v42 }
0x3562   : > { %v4421_v46 = vpop.f32.mrb[36].mxu0  ;;  %v4496_v47 = vpop.f32.mrb[34].mxu1 }
0x3563   : > { %v6442_v61 = vadd.f32 %v4421_v46, %v4350_v43  ;;  %v4497_v48 = vadd.f32 %v4496_v47, %v4429_v44  ;;  %v5161_v49 = vpop.f32.mrb[37].mxu0  ;;  %v5172_v50 = vpop.f32.mrb[35].mxu1 }
0x3565   : > { %v4501_v51 = vmul.f32 0.5, %v4497_v48  ;;  %4509 = vst.msk [vmem:[%s609_s19] sm:$0x1] %vm4506_vm8, %v4497_v48  ;;  %4508 = vst.msk [vmem:[%s603_s24] sm:$0x1] %vm4506_vm8, %v6442_v61 }
0x3566   : > { %5631 = shalt.err (!%p5628_p3)
}
0x3567   : > { %s5632_s21 = scalar_lea.hbm %s6448_s0, 16  ;;  %s5636_s20 = scalar_lea.hbm %s6582_s17, 32 }
0x3568   : > { %p5633_p4 = scmp.ne.s32.totalorder %s6448_s0, %s5632_s21  ;;  %p5637_p9 = scmp.lt.u32.totalorder %s6448_s0, %s6582_s17 }
0x3569   : > { %p5638_p10 = scmp.lt.u32.totalorder %s5636_s20, %s5632_s21  ;;  %p5640_p12 = scmp.lt.u32.totalorder %s5632_s21, %s6448_s0 }
0x356a   : > { %p5634_p7 = pnand %p5633_p4, %p5888_p5 }
0x356b   : > { %p5639_p11 = por %p5638_p10, %p5637_p9 }
0x356c   : > { %p5635_p8 = pneg %p5634_p7 }
0x356d   : > { %p5641_p13 = por %p5640_p12, %p5639_p11 }
0x356f   : > { %p5642_p0 = pnand %p5641_p13, %p5635_p8 }
0x3571   : > { %5645 = shalt.err (!%p5642_p0)
}
0x3572   : > { %5296 = dma.vmem_to_hbm [thread:$0]  (%p5888_p5), %s6450_s25, 16, %s6448_s0, %s6463_s3   ;;  %v4502_v52 = vmul.f32 1.442695, %v4501_v51 }
0x3573   : > { %s5646_s5 = scalar_lea.vmem %s6458_s22, 16  ;;  %s5751_s6 = smov [#allocation7]  }
0x3574   : > { %p5647_p1 = scmp.ne.s32.totalorder %s6458_s22, %s5646_s5  ;;  %s5650_s23 = sshll.u32 %s5751_s6, 4  ;;  %s5651_s23 = int_to_ptr.vmem [resolvable:$false] %s5650_s23 }
0x3575   : > { %s5652_s21 = scalar_lea.vmem %s5651_s23, 32  ;;  %p5653_p4 = scmp.lt.s32.totalorder %s6458_s22, %s5651_s23 }
0x3576   : > { %p5648_p2 = pnand %p5647_p1, %p5888_p5  ;;  %p5654_p7 = scmp.lt.s32.totalorder %s5652_s21, %s5646_s5 }
0x3578   : > { %p5649_p3 = pneg %p5648_p2  ;;  %p5655_p8 = por %p5654_p7, %p5653_p4 }
0x357a   : > { %p5656_p9 = pnand %p5655_p8, %p5649_p3 }
0x357c   : > { %5659 = shalt.err (!%p5656_p9)
}
0x357d   : > { %s5660_s25 = scalar_lea.hbm %s6456_s4, 16  ;;  %s5664_s19 = scalar_lea.hbm %s6583_s18, 32 }
0x357e   : > { %p5661_p10 = scmp.ne.s32.totalorder %s6456_s4, %s5660_s25  ;;  %p5665_p13 = scmp.lt.u32.totalorder %s6456_s4, %s6583_s18 }
0x357f   : > { %p5666_p0 = scmp.lt.u32.totalorder %s5664_s19, %s5660_s25  ;;  %p5668_p2 = scmp.lt.u32.totalorder %s5660_s25, %s6456_s4 }
0x3580   : > { %p5662_p11 = pnand %p5661_p10, %p5888_p5 }
0x3581   : > { %p5667_p1 = por %p5666_p0, %p5665_p13 }
0x3582   : > { %p5663_p12 = pneg %p5662_p11 }
0x3583   : > { %p5669_p3 = por %p5668_p2, %p5667_p1 }
0x3585   : > { %p5670_p4 = pnand %p5669_p3, %p5663_p12 }
0x3587   : > { %5673 = shalt.err (!%p5670_p4)
}
0x3588   : > { %5297 = dma.vmem_to_hbm [thread:$0]  (%p5888_p5), %s6458_s22, 16, %s6456_s4, %s6463_s3   ;;  %5608 = vpow2.f32 %v4502_v52 }
0x3589   : > { %s6610_s23 = sld [smem:[#allocation17_spill]]  ;;  %s597_s25 = scalar_lea.vmem [#allocation3], %s6428_s29 }
0x358a   : > { %s4531_s0 = sshll.u32 %s597_s25, 4  ;;  %s6519_s20 = scalar_lea.hbm %s6581_s16, %s6438_s27  ;;  %s6521_s0 = int_to_ptr.vmem [resolvable:$true] %s4531_s0 }
0x358b   : > { %s4511_s4 = scalar_lea.sflag [#allocation4], %s6428_s29  ;;  %s5752_s22 = smov [#allocation3]  }
0x358c   : > { %s5678_s3 = sshll.u32 %s5752_s22, 4  ;;  %s5679_s3 = int_to_ptr.vmem [resolvable:$false] %s5678_s3 }
0x358d   : > { %s5680_s1 = scalar_lea.vmem %s5679_s3, 32  ;;  %p5681_p10 = scmp.lt.s32.totalorder %s6521_s0, %s5679_s3 }
0x358f   : > { %s622_s21 = scalar_lea.vmem %s6610_s23, %s5903_s26  ;;  %s5674_s26 = scalar_lea.vmem %s6521_s0, 16 }
0x3590   : > { %v4500_v40 = vld [vmem:[%s622_s21] sm:$0x1]  ;;  %p5675_p7 = scmp.ne.s32.totalorder %s6521_s0, %s5674_s26  ;;  %p5682_p11 = scmp.lt.s32.totalorder %s5680_s1, %s5674_s26 }
0x3592   : > { %v5609_v20 = vpop.eup %5608  ;;  %p5676_p8 = pnand %p5675_p7, %p5888_p5  ;;  %p5683_p12 = por %p5682_p11, %p5681_p10 }
0x3593   : > { %v4504_v53 = vmul.f32 %v5609_v20, %v4500_v40 }
0x3594   : > { %p5677_p9 = pneg %p5676_p8 }
0x3595   : > { %v4505_v54 = vadd.f32 %v4504_v53, %v6442_v61 }
0x3596   : > { %p5684_p13 = pnand %p5683_p12, %p5677_p9 }
0x3597   : > { %4507 = vst.msk [vmem:[%s597_s25] sm:$0x1] %vm4506_vm8, %v4505_v54 }
0x3598   : > { %5687 = shalt.err (!%p5684_p13)
}
0x3599   : > { %s5688_s29 = scalar_lea.hbm %s6519_s20, 16  ;;  %s5692_s6 = scalar_lea.hbm %s6581_s16, 32 }
0x359a   : > { %p5689_p0 = scmp.ne.s32.totalorder %s6519_s20, %s5688_s29  ;;  %p5693_p3 = scmp.lt.u32.totalorder %s6519_s20, %s6581_s16 }
0x359b   : > { %p5694_p4 = scmp.lt.u32.totalorder %s5692_s6, %s5688_s29  ;;  %p5696_p8 = scmp.lt.u32.totalorder %s5688_s29, %s6519_s20 }
0x359c   : > { %p5690_p1 = pnand %p5689_p0, %p5888_p5 }
0x359d   : > { %p5695_p7 = por %p5694_p4, %p5693_p3 }
0x359e   : > { %p5691_p2 = pneg %p5690_p1 }
0x359f   : > { %p5697_p9 = por %p5696_p8, %p5695_p7 }
0x35a1   : > { %p5698_p10 = pnand %p5697_p9, %p5691_p2 }
0x35a3   : > { %5701 = shalt.err (!%p5698_p10)
}
0x35a4   : > { %5295 = dma.vmem_to_hbm [thread:$0]  (%p5888_p5), %s6521_s0, 16, %s6519_s20, %s4511_s4  }
0x35a5 PF: > { %s6611_s25 = sld [smem:[#allocation10_spill]]  ;;  %p5311_p11 = scmp.ge.s32.totalorder %s5740_s30, 2 }
0x35a7   : > { %p5302_p12 = pnand %p5311_p11, %p5892_p6 }
0x35ab   : > { %s4569_s19 = sand.u32 1, %s6611_s25  }
0x35ac   : > { %s4570_s26 = scalar_lea.sflag [#allocation4], %s4569_s19 }
0x35ad   : > { %5719 = dma.done.wait (!%p5302_p12), %s4570_s26, 16  }
0x35ae   : > { %5721 = vsyncadd (!%p5302_p12), %s4570_s26, 4294967280  ;;  %s6613_s22 = sadd.s32 4294967294, %s5740_s30  }
0x35af   : > { %s4577_s3 = sand.u32 1, %s6613_s22  }
0x35b0   : > { %s4578_s1 = scalar_lea.sflag [#allocation6], %s4577_s3 }
0x35b1   : > { %5723 = dma.done.wait (!%p5302_p12), %s4578_s1, 32  }
0x35b2   : > { %5725 = vsyncadd (!%p5302_p12), %s4578_s1, 4294967264  ;;  %s6614_s30 = sld [smem:[#allocation12_spill]]  ;;  %s6615_s2 = sld [smem:[#allocation11_spill]] }
0x35b3   : > { %s6616_s29 = sld [smem:[#allocation13_spill]]  ;;  %s6617_s27 = smov %s5732_s28 }
0x35b8   : > { %p32_p5 = scmp.ge.s32.totalorder %s6614_s30, 4   ;;  %s6618_s28 = smov %s6615_s2 }
0x35ba   :  { %34 = sbr.rel (!%p32_p5) target bundleno = 13 (0xd), region = 157 }
0x35c1   :  { %4590 = vsyncpa [#allocation4], 1 }
0x35c2   :  { %4592 = vsyncpa [#allocation4 + $0x1], 1 }
0x35c3   :  { %4593 = vsyncpa [#allocation6], 1 }
0x35c4   :  { %4595 = vsyncpa [#allocation6 + $0x1], 1 }

</bundles_post_ra>
